<compile_context>
chip_gen: v6e
topology: v6e:2x2x1
jax: 0.10.0
libtpu: 0.0.40
codegen_flags: <defaults>
</compile_context>

<pallas_src>
import jax
import jax.numpy as jnp
from jax.experimental import pallas as pl
from jax.experimental.pallas import tpu as pltpu


def gns_kernel(bt_ref, yrT_ref, yiT_ref, p_ref, q_ref, offd_ref,
               ws_ref, bs_ref, wg_ref, bg_ref, wl_ref, bl_ref,
               wh_ref, wm0_ref, wm1_ref, bleap_ref, wdec_ref, bdec_ref,
               out_ref):
    """One batch element: embedding + K Newton / message-passing steps.

    Shapes seen by the kernel (batch dim squeezed by BlockSpec, Np = padded N):
      bt/p/q : (1, Np)        yrT/yiT : (Np, Np) bf16 (already transposed Ybus)
      offd   : (Np, Np) f32   (1 off-diagonal, 0 on diagonal)
      ws/wg/wl : (d, 2)       bs/bg/bl : (d, 1)
      wh : (K, d, d)          wm0/wm1 : (K, d, 1)     bleap : (K, d, 1)
      wdec : (2, d)           bdec : (2, 1)           out : (2, Np)
    """
    Np = yrT_ref.shape[0]
    K = wh_ref.shape[0]

    bt = bt_ref[...]                       # (1, Np) int32
    Ps = p_ref[...]                        # (1, Np)
    Qs = q_ref[...]                        # (1, Np)
    YrT = yrT_ref[...]                     # (Np, Np) bf16
    YiT = yiT_ref[...]                     # (Np, Np) bf16

    slack = bt == 1
    pv = bt == 2
    pq = bt == 3
    valid = slack | pv | pq

    # ---- V_start (default flat start, 1.06 at slack); padded buses -> 1.0 / 0.0
    vmag0 = jnp.where(slack, 1.06, 1.0).astype(jnp.float32)          # (1, Np)
    vang0 = jnp.zeros_like(vmag0)                                     # (1, Np)

    # ---- per-type input features (lane-dense rows) ----
    f0 = jnp.where(slack, vmag0, jnp.where(pv | pq, Ps, 0.0))
    f1 = jnp.where(slack, vang0, jnp.where(pv, vmag0, jnp.where(pq, Qs, 0.0)))

    # ---- BusEmbedding on the VPU: mask-select weight columns, no MXU ----
    w0 = jnp.where(slack, ws_ref[:, 0:1],
                   jnp.where(pv, wg_ref[:, 0:1], wl_ref[:, 0:1]))     # (d, Np)
    w1 = jnp.where(slack, ws_ref[:, 1:2],
                   jnp.where(pv, wg_ref[:, 1:2], wl_ref[:, 1:2]))     # (d, Np)
    bb = jnp.where(slack, bs_ref[...],
                   jnp.where(pv, bg_ref[...], bl_ref[...]))           # (d, Np)
    Ht0 = jnp.where(valid, jnp.tanh(w0 * f0 + w1 * f1 + bb), 0.0)     # (d, Np) = H^T

    # ---- adjacency (adj_mode == 'default'), transposed, A^T never materialized:
    #      keep only the 0/1 connectivity and a hoisted reciprocal degree row.
    AconT = jnp.where((YrT != 0.0) | (YiT != 0.0), offd_ref[...], 0.0)  # (Np, Np) f32
    deg = jnp.maximum(jnp.sum(AconT, axis=0, keepdims=True), 1.0)        # (1, Np)
    inv_deg = pl.reciprocal(deg, approx=True)                            # EUP slot

    def step(k, carry):
        vmag, vang, Ht = carry

        # calc_PQ: two (2, Np) @ (Np, Np) bf16 matmuls (no Yct concat buffer).
        # NOTE: bf16 operands, f32 accumulation; not bit-parity with torch f32.
        Vre = vmag * jnp.cos(vang)                                    # (1, Np)
        Vim = vmag * jnp.sin(vang)                                    # (1, Np)
        Vs = jnp.concatenate([Vre, Vim], axis=0).astype(YrT.dtype)    # (2, Np)
        Ar = jnp.dot(Vs, YrT, preferred_element_type=jnp.float32)     # [Vre@YrT; Vim@YrT]
        Ai = jnp.dot(Vs, YiT, preferred_element_type=jnp.float32)     # [Vre@YiT; Vim@YiT]
        Ir = Ar[0:1, :] - Ai[1:2, :]
        Ii = Ar[1:2, :] + Ai[0:1, :]
        Pc = Vre * Ir + Vim * Ii
        Qc = Vim * Ir - Vre * Ii

        dP = jnp.where(slack, 0.0, Ps - Pc)                           # (1, Np)
        dQ = jnp.where(slack | pv, 0.0, Qs - Qc)                      # (1, Np)

        # message passing + leap MLP (mismatch handled as rank-1 VPU MACs)
        Hnt = jnp.dot(Ht, AconT, preferred_element_type=jnp.float32) * inv_deg
        pre = (jnp.dot(wh_ref[k], Hnt, preferred_element_type=jnp.float32)
               + wm0_ref[k] * dP + wm1_ref[k] * dQ + bleap_ref[k])    # (d, Np)
        # torch applies the leap update to every bus; padded columns never leak
        # into real buses (their AconT rows/columns are zero, outputs column-wise)
        Ht = Ht + jnp.tanh(pre)

        # decoder head -> (dVm, dVa), masked voltage updates
        dV = jnp.dot(wdec_ref[...], Ht,
                     preferred_element_type=jnp.float32) + bdec_ref[...]  # (2, Np)
        vmag = vmag + jnp.where(pq, dV[0:1, :], 0.0)     # dVm[bus_type != 3] = 0
        vang = vang + jnp.where(slack, 0.0, dV[1:2, :])  # dVa[bus_type == 1] = 0
        return vmag, vang, Ht

    # fori_loop keeps the working set one-iteration sized; unroll=True gives the
    # LLO scheduler visibility for small K (drop to unroll=False for large K*d).
    vmag, vang, _ = jax.lax.fori_loop(0, K, step, (vmag0, vang0, Ht0), unroll=True)

    out_ref[...] = jnp.concatenate([vmag, vang], axis=0)              # (2, Np)


def init_params(key, d, K):
    """Synthetic parameters in torch-like (out, in) layout, biases as columns."""
    keys = jax.random.split(key, 12)
    s = 0.05

    def lin(kw, kb, fan_in, fan_out):
        w = jax.random.uniform(kw, (fan_out, fan_in), jnp.float32, -s, s)
        b = jax.random.uniform(kb, (fan_out, 1), jnp.float32, -s, s)
        return w, b

    w_slack, b_slack = lin(keys[0], keys[1], 2, d)
    w_gen,   b_gen   = lin(keys[2], keys[3], 2, d)
    w_load,  b_load  = lin(keys[4], keys[5], 2, d)
    w_leap = jax.random.uniform(keys[6], (K, d, d + 2), jnp.float32, -s, s)
    b_leap = jax.random.uniform(keys[7], (K, d, 1), jnp.float32, -s, s)
    w_dec,  b_dec    = lin(keys[8], keys[9], d, 2)
    return (w_slack, b_slack, w_gen, b_gen, w_load, b_load,
            w_leap, b_leap, w_dec, b_dec)


@jax.jit
def gns_forward(bus_type, Yr, Yi, P_spec, Q_spec, params):
    B, N = bus_type.shape
    (w_s, b_s, w_g, b_g, w_l, b_l, w_leap, b_leap, w_dec, b_dec) = params
    K, d, _ = w_leap.shape

    # ---- pad the bus axis to a lane multiple (128). Padded buses: type 0,
    #      zero Ybus rows/columns, zero specs -> fully decoupled from real buses.
    Np = ((N + 127) // 128) * 128
    pad = Np - N
    bt_p = jnp.pad(bus_type.astype(jnp.int32), ((0, 0), (0, pad)))
    yr_p = jnp.pad(Yr.astype(jnp.float32), ((0, 0), (0, pad), (0, pad)))
    yi_p = jnp.pad(Yi.astype(jnp.float32), ((0, 0), (0, pad), (0, pad)))
    p_p = jnp.pad(P_spec.astype(jnp.float32), ((0, 0), (0, pad)))
    q_p = jnp.pad(Q_spec.astype(jnp.float32), ((0, 0), (0, pad)))

    # lane-dense per-bus scalars; Ybus transposed and cast to bf16 (dominant HBM
    # stream -> half the bytes and half the VMEM residency; accumulation is f32).
    btr = bt_p.reshape(B, 1, Np)
    pr = p_p.reshape(B, 1, Np)
    qr = q_p.reshape(B, 1, Np)
    yrT = jnp.swapaxes(yr_p, 1, 2).astype(jnp.bfloat16)
    yiT = jnp.swapaxes(yi_p, 1, 2).astype(jnp.bfloat16)
    offd = 1.0 - jnp.eye(Np, dtype=jnp.float32)       # zero-diag mask (replicated)

    # pre-split the leap weights wrapper-side (clean aligned operands in-kernel)
    wh = w_leap[:, :, :d]                              # (K, d, d)
    wm0 = w_leap[:, :, d:d + 1]                        # (K, d, 1)
    wm1 = w_leap[:, :, d + 1:d + 2]                    # (K, d, 1)

    inputs = (btr, yrT, yiT, pr, qr, offd,
              w_s, b_s, w_g, b_g, w_l, b_l, wh, wm0, wm1, b_leap, w_dec, b_dec)

    def per_batch(shape):
        return pl.BlockSpec((None,) + tuple(shape[1:]),
                            lambda b, m=len(shape) - 1: (b,) + (0,) * m)

    def replicated(shape):
        # constant block index across the grid -> fetched once, never re-DMA'd
        return pl.BlockSpec(tuple(shape), lambda b, n=len(shape): (0,) * n)

    in_specs = ([per_batch(btr.shape), per_batch(yrT.shape), per_batch(yiT.shape),
                 per_batch(pr.shape), per_batch(qr.shape)]
                + [replicated(x.shape) for x in inputs[5:]])

    # VMEM budget: double-buffered bf16 Ybus pair + offd + AconT + temporaries,
    # with headroom, clamped to [32 MiB, 96 MiB].
    Np2 = Np * Np
    need = (2 * (2 * 2 * Np2)                 # yrT/yiT bf16, Buffered(2)
            + 4 * Np2 + 4 * Np2               # offd + AconT (f32)
            + 4 * (8 * d * Np + 32 * Np)      # Ht/Hnt/pre + per-bus row temps
            + 4 * (K * d * (d + 3) + 8 * d + 2))
    vmem_limit = int(min(96 * 1024 * 1024, max(32 * 1024 * 1024, int(1.4 * need))))

    # advisory cost estimate for XLA scheduling around the custom call
    flops = int(B * K * (8 * Np2             # calc_PQ matmuls
                         + 2 * d * Np2       # Ht @ AconT
                         + 2 * d * d * Np    # leap
                         + 4 * d * Np))      # decoder
    transcendentals = int(B * (d * Np + Np + K * (2 * Np + d * Np)))
    bytes_accessed = int(B * (2 * 2 * Np2 + 4 * 7 * Np) + 4 * Np2
                         + 4 * (K * d * (d + 3) + 8 * d + 2))

    # TODO(synk): if B is 1 / odd on v7x, add a second "parallel" grid axis over
    #             column tiles of N so both TensorCores have work.
    out = pl.pallas_call(
        gns_kernel,
        out_shape=jax.ShapeDtypeStruct((B, 2, Np), jnp.float32),
        grid=(B,),
        in_specs=in_specs,
        out_specs=pl.BlockSpec((None, 2, Np), lambda b: (b, 0, 0)),
        compiler_params=pltpu.CompilerParams(
            dimension_semantics=("parallel",),
            vmem_limit_bytes=vmem_limit),
        cost_estimate=pl.CostEstimate(flops=flops,
                                      transcendentals=transcendentals,
                                      bytes_accessed=bytes_accessed),
    )(*inputs)

    # (B, N, 2) = [V, delta]; drop the padded buses
    return jnp.transpose(out, (0, 2, 1))[:, :N, :]


if __name__ == "__main__":
    B, N, d, K = 2, 16, 32, 4

    key = jax.random.PRNGKey(0)
    k_bt, k_yr, k_yi, k_m, k_p, k_q, k_w = jax.random.split(key, 7)

    # bus types: bus 0 slack (1), buses 1-2 PV (2), rest PQ (3)
    bus_type = jnp.full((B, N), 3, dtype=jnp.int32)
    bus_type = bus_type.at[:, 0].set(1)
    bus_type = bus_type.at[:, 1:3].set(2)

    # synthetic symmetric, sparse-ish Ybus
    conn = (jax.random.uniform(k_m, (B, N, N)) < 0.35)
    conn = conn | jnp.transpose(conn, (0, 2, 1))
    eye = jnp.eye(N, dtype=bool)[None]
    conn = conn | eye
    Yr = 0.5 * (jax.random.normal(k_yr, (B, N, N)) +
                jnp.transpose(jax.random.normal(k_yr, (B, N, N)), (0, 2, 1)))
    Yi = 0.5 * (jax.random.normal(k_yi, (B, N, N)) +
                jnp.transpose(jax.random.normal(k_yi, (B, N, N)), (0, 2, 1)))
    Yr = jnp.where(conn, Yr, 0.0).astype(jnp.float32)
    Yi = jnp.where(conn, Yi, 0.0).astype(jnp.float32)

    P_spec = (0.5 * jax.random.normal(k_p, (B, N))).astype(jnp.float32)
    Q_spec = (0.5 * jax.random.normal(k_q, (B, N))).astype(jnp.float32)

    params = init_params(k_w, d, K)

    V_pred = gns_forward(bus_type, Yr, Yi, P_spec, Q_spec, params)
    V_pred = jax.block_until_ready(V_pred)

    assert V_pred.shape == (B, N, 2)
    assert bool(jnp.all(jnp.isfinite(V_pred)))
    print("KERNEL_OK")
</pallas_src>

<mosaic_0001>
module attributes {stable_mosaic.version = 11 : i64} {
  func.func @gns_kernel(%arg0: i32, %arg1: memref<1x1x128xi32, #tpu.memory_space<vmem>>, %arg2: memref<1x128x128xbf16, #tpu.memory_space<vmem>>, %arg3: memref<1x128x128xbf16, #tpu.memory_space<vmem>>, %arg4: memref<1x1x128xf32, #tpu.memory_space<vmem>>, %arg5: memref<1x1x128xf32, #tpu.memory_space<vmem>>, %arg6: memref<128x128xf32, #tpu.memory_space<vmem>>, %arg7: memref<32x2xf32, #tpu.memory_space<vmem>>, %arg8: memref<32x1xf32, #tpu.memory_space<vmem>>, %arg9: memref<32x2xf32, #tpu.memory_space<vmem>>, %arg10: memref<32x1xf32, #tpu.memory_space<vmem>>, %arg11: memref<32x2xf32, #tpu.memory_space<vmem>>, %arg12: memref<32x1xf32, #tpu.memory_space<vmem>>, %arg13: memref<4x32x32xf32, #tpu.memory_space<vmem>>, %arg14: memref<4x32x1xf32, #tpu.memory_space<vmem>>, %arg15: memref<4x32x1xf32, #tpu.memory_space<vmem>>, %arg16: memref<4x32x1xf32, #tpu.memory_space<vmem>>, %arg17: memref<2x32xf32, #tpu.memory_space<vmem>>, %arg18: memref<2x1xf32, #tpu.memory_space<vmem>>, %arg19: memref<1x2x128xf32, #tpu.memory_space<vmem>>) attributes {dimension_semantics = [#tpu.dimension_semantics<parallel>], iteration_bounds = array<i64: 2>, scalar_prefetch = 0 : i64, scratch_operands = 0 : i64, tpu.core_type = #tpu.core_type<tc>, window_params = [{transform_indices = @transform_0, window_bounds = array<i64: 1, 1, 128>}, {transform_indices = @transform_1, window_bounds = array<i64: 1, 128, 128>}, {transform_indices = @transform_2, window_bounds = array<i64: 1, 128, 128>}, {transform_indices = @transform_3, window_bounds = array<i64: 1, 1, 128>}, {transform_indices = @transform_4, window_bounds = array<i64: 1, 1, 128>}, {pipeline_mode = #tpu.pipeline_mode<synchronous>, transform_indices = @transform_5, window_bounds = array<i64: 128, 128>}, {pipeline_mode = #tpu.pipeline_mode<synchronous>, transform_indices = @transform_6, window_bounds = array<i64: 32, 2>}, {pipeline_mode = #tpu.pipeline_mode<synchronous>, transform_indices = @transform_7, window_bounds = array<i64: 32, 1>}, {pipeline_mode = #tpu.pipeline_mode<synchronous>, transform_indices = @transform_8, window_bounds = array<i64: 32, 2>}, {pipeline_mode = #tpu.pipeline_mode<synchronous>, transform_indices = @transform_9, window_bounds = array<i64: 32, 1>}, {pipeline_mode = #tpu.pipeline_mode<synchronous>, transform_indices = @transform_10, window_bounds = array<i64: 32, 2>}, {pipeline_mode = #tpu.pipeline_mode<synchronous>, transform_indices = @transform_11, window_bounds = array<i64: 32, 1>}, {pipeline_mode = #tpu.pipeline_mode<synchronous>, transform_indices = @transform_12, window_bounds = array<i64: 4, 32, 32>}, {pipeline_mode = #tpu.pipeline_mode<synchronous>, transform_indices = @transform_13, window_bounds = array<i64: 4, 32, 1>}, {pipeline_mode = #tpu.pipeline_mode<synchronous>, transform_indices = @transform_14, window_bounds = array<i64: 4, 32, 1>}, {pipeline_mode = #tpu.pipeline_mode<synchronous>, transform_indices = @transform_15, window_bounds = array<i64: 4, 32, 1>}, {pipeline_mode = #tpu.pipeline_mode<synchronous>, transform_indices = @transform_16, window_bounds = array<i64: 2, 32>}, {pipeline_mode = #tpu.pipeline_mode<synchronous>, transform_indices = @transform_17, window_bounds = array<i64: 2, 1>}, {transform_indices = @transform_18, window_bounds = array<i64: 1, 2, 128>}]} {
    %c0 = arith.constant 0 : index
    %c0_0 = arith.constant 0 : index
    %c0_1 = arith.constant 0 : index
    %0 = vector.load %arg1[%c0, %c0_0, %c0_1] : memref<1x1x128xi32, #tpu.memory_space<vmem>>, vector<1x1x128xi32>
    %1 = vector.shape_cast %0 : vector<1x1x128xi32> to vector<1x128xi32>
    %c0_2 = arith.constant 0 : index
    %c0_3 = arith.constant 0 : index
    %c0_4 = arith.constant 0 : index
    %2 = vector.load %arg4[%c0_2, %c0_3, %c0_4] : memref<1x1x128xf32, #tpu.memory_space<vmem>>, vector<1x1x128xf32>
    %3 = vector.shape_cast %2 : vector<1x1x128xf32> to vector<1x128xf32>
    %c0_5 = arith.constant 0 : index
    %c0_6 = arith.constant 0 : index
    %c0_7 = arith.constant 0 : index
    %4 = vector.load %arg5[%c0_5, %c0_6, %c0_7] : memref<1x1x128xf32, #tpu.memory_space<vmem>>, vector<1x1x128xf32>
    %5 = vector.shape_cast %4 : vector<1x1x128xf32> to vector<1x128xf32>
    %c0_8 = arith.constant 0 : index
    %c0_9 = arith.constant 0 : index
    %c0_10 = arith.constant 0 : index
    %6 = vector.load %arg2[%c0_8, %c0_9, %c0_10] : memref<1x128x128xbf16, #tpu.memory_space<vmem>>, vector<1x128x128xbf16>
    %7 = vector.shape_cast %6 : vector<1x128x128xbf16> to vector<128x128xbf16>
    %c0_11 = arith.constant 0 : index
    %c0_12 = arith.constant 0 : index
    %c0_13 = arith.constant 0 : index
    %8 = vector.load %arg3[%c0_11, %c0_12, %c0_13] : memref<1x128x128xbf16, #tpu.memory_space<vmem>>, vector<1x128x128xbf16>
    %9 = vector.shape_cast %8 : vector<1x128x128xbf16> to vector<128x128xbf16>
    %c1_i32 = arith.constant 1 : i32
    %10 = vector.broadcast %c1_i32 : i32 to vector<1x128xi32>
    %11 = arith.cmpi eq, %1, %10 : vector<1x128xi32>
    %c2_i32 = arith.constant 2 : i32
    %12 = vector.broadcast %c2_i32 : i32 to vector<1x128xi32>
    %13 = arith.cmpi eq, %1, %12 : vector<1x128xi32>
    %c3_i32 = arith.constant 3 : i32
    %14 = vector.broadcast %c3_i32 : i32 to vector<1x128xi32>
    %15 = arith.cmpi eq, %1, %14 : vector<1x128xi32>
    %16 = arith.ori %11, %13 : vector<1x128xi1>
    %17 = arith.ori %16, %15 : vector<1x128xi1>
    %cst = arith.constant 1.060000e+00 : f32
    %cst_14 = arith.constant 1.000000e+00 : f32
    %18 = vector.broadcast %cst : f32 to vector<1x128xf32>
    %19 = vector.broadcast %cst_14 : f32 to vector<1x128xf32>
    %20 = arith.select %11, %18, %19 : vector<1x128xi1>, vector<1x128xf32>
    %cst_15 = arith.constant 0.000000e+00 : f32
    %21 = vector.broadcast %cst_15 : f32 to vector<1x128xf32>
    %22 = arith.ori %13, %15 : vector<1x128xi1>
    %cst_16 = arith.constant 0.000000e+00 : f32
    %23 = vector.broadcast %cst_16 : f32 to vector<1x128xf32>
    %24 = arith.select %22, %3, %23 : vector<1x128xi1>, vector<1x128xf32>
    %25 = arith.select %11, %20, %24 : vector<1x128xi1>, vector<1x128xf32>
    %cst_17 = arith.constant 0.000000e+00 : f32
    %26 = vector.broadcast %cst_17 : f32 to vector<1x128xf32>
    %27 = arith.select %15, %5, %26 : vector<1x128xi1>, vector<1x128xf32>
    %28 = arith.select %13, %20, %27 : vector<1x128xi1>, vector<1x128xf32>
    %29 = arith.select %11, %21, %28 : vector<1x128xi1>, vector<1x128xf32>
    %c0_18 = arith.constant 0 : index
    %c0_19 = arith.constant 0 : index
    %30 = vector.load %arg7[%c0_18, %c0_19] : memref<32x2xf32, #tpu.memory_space<vmem>>, vector<32x1xf32>
    %c0_20 = arith.constant 0 : index
    %c0_21 = arith.constant 0 : index
    %31 = vector.load %arg9[%c0_20, %c0_21] : memref<32x2xf32, #tpu.memory_space<vmem>>, vector<32x1xf32>
    %c0_22 = arith.constant 0 : index
    %c0_23 = arith.constant 0 : index
    %32 = vector.load %arg11[%c0_22, %c0_23] : memref<32x2xf32, #tpu.memory_space<vmem>>, vector<32x1xf32>
    %33 = vector.shape_cast %13 : vector<1x128xi1> to vector<1x128xi1>
    %34 = vector.broadcast %33 : vector<1x128xi1> to vector<32x128xi1>
    %35 = vector.shape_cast %31 : vector<32x1xf32> to vector<32x1xf32>
    %36 = vector.broadcast %35 : vector<32x1xf32> to vector<32x128xf32>
    %37 = vector.shape_cast %32 : vector<32x1xf32> to vector<32x1xf32>
    %38 = vector.broadcast %37 : vector<32x1xf32> to vector<32x128xf32>
    %39 = arith.select %34, %36, %38 : vector<32x128xi1>, vector<32x128xf32>
    %40 = vector.shape_cast %11 : vector<1x128xi1> to vector<1x128xi1>
    %41 = vector.broadcast %40 : vector<1x128xi1> to vector<32x128xi1>
    %42 = vector.shape_cast %30 : vector<32x1xf32> to vector<32x1xf32>
    %43 = vector.broadcast %42 : vector<32x1xf32> to vector<32x128xf32>
    %44 = arith.select %41, %43, %39 : vector<32x128xi1>, vector<32x128xf32>
    %c0_24 = arith.constant 0 : index
    %c1 = arith.constant 1 : index
    %45 = vector.load %arg7[%c0_24, %c1] : memref<32x2xf32, #tpu.memory_space<vmem>>, vector<32x1xf32>
    %c0_25 = arith.constant 0 : index
    %c1_26 = arith.constant 1 : index
    %46 = vector.load %arg9[%c0_25, %c1_26] : memref<32x2xf32, #tpu.memory_space<vmem>>, vector<32x1xf32>
    %c0_27 = arith.constant 0 : index
    %c1_28 = arith.constant 1 : index
    %47 = vector.load %arg11[%c0_27, %c1_28] : memref<32x2xf32, #tpu.memory_space<vmem>>, vector<32x1xf32>
    %48 = vector.shape_cast %13 : vector<1x128xi1> to vector<1x128xi1>
    %49 = vector.broadcast %48 : vector<1x128xi1> to vector<32x128xi1>
    %50 = vector.shape_cast %46 : vector<32x1xf32> to vector<32x1xf32>
    %51 = vector.broadcast %50 : vector<32x1xf32> to vector<32x128xf32>
    %52 = vector.shape_cast %47 : vector<32x1xf32> to vector<32x1xf32>
    %53 = vector.broadcast %52 : vector<32x1xf32> to vector<32x128xf32>
    %54 = arith.select %49, %51, %53 : vector<32x128xi1>, vector<32x128xf32>
    %55 = vector.shape_cast %11 : vector<1x128xi1> to vector<1x128xi1>
    %56 = vector.broadcast %55 : vector<1x128xi1> to vector<32x128xi1>
    %57 = vector.shape_cast %45 : vector<32x1xf32> to vector<32x1xf32>
    %58 = vector.broadcast %57 : vector<32x1xf32> to vector<32x128xf32>
    %59 = arith.select %56, %58, %54 : vector<32x128xi1>, vector<32x128xf32>
    %c0_29 = arith.constant 0 : index
    %c0_30 = arith.constant 0 : index
    %60 = vector.load %arg8[%c0_29, %c0_30] : memref<32x1xf32, #tpu.memory_space<vmem>>, vector<32x1xf32>
    %c0_31 = arith.constant 0 : index
    %c0_32 = arith.constant 0 : index
    %61 = vector.load %arg10[%c0_31, %c0_32] : memref<32x1xf32, #tpu.memory_space<vmem>>, vector<32x1xf32>
    %c0_33 = arith.constant 0 : index
    %c0_34 = arith.constant 0 : index
    %62 = vector.load %arg12[%c0_33, %c0_34] : memref<32x1xf32, #tpu.memory_space<vmem>>, vector<32x1xf32>
    %63 = vector.shape_cast %13 : vector<1x128xi1> to vector<1x128xi1>
    %64 = vector.broadcast %63 : vector<1x128xi1> to vector<32x128xi1>
    %65 = vector.shape_cast %61 : vector<32x1xf32> to vector<32x1xf32>
    %66 = vector.broadcast %65 : vector<32x1xf32> to vector<32x128xf32>
    %67 = vector.shape_cast %62 : vector<32x1xf32> to vector<32x1xf32>
    %68 = vector.broadcast %67 : vector<32x1xf32> to vector<32x128xf32>
    %69 = arith.select %64, %66, %68 : vector<32x128xi1>, vector<32x128xf32>
    %70 = vector.shape_cast %11 : vector<1x128xi1> to vector<1x128xi1>
    %71 = vector.broadcast %70 : vector<1x128xi1> to vector<32x128xi1>
    %72 = vector.shape_cast %60 : vector<32x1xf32> to vector<32x1xf32>
    %73 = vector.broadcast %72 : vector<32x1xf32> to vector<32x128xf32>
    %74 = arith.select %71, %73, %69 : vector<32x128xi1>, vector<32x128xf32>
    %75 = vector.broadcast %25 : vector<1x128xf32> to vector<32x128xf32>
    %76 = arith.mulf %44, %75 : vector<32x128xf32>
    %77 = vector.broadcast %29 : vector<1x128xf32> to vector<32x128xf32>
    %78 = arith.mulf %59, %77 : vector<32x128xf32>
    %79 = arith.addf %76, %78 : vector<32x128xf32>
    %80 = arith.addf %79, %74 : vector<32x128xf32>
    %81 = math.tanh %80 : vector<32x128xf32>
    %cst_35 = arith.constant 0.000000e+00 : f32
    %82 = vector.shape_cast %17 : vector<1x128xi1> to vector<1x128xi1>
    %83 = vector.broadcast %82 : vector<1x128xi1> to vector<32x128xi1>
    %84 = vector.broadcast %cst_35 : f32 to vector<32x128xf32>
    %85 = arith.select %83, %81, %84 : vector<32x128xi1>, vector<32x128xf32>
    %cst_36 = arith.constant 0.000000e+00 : bf16
    %86 = vector.broadcast %cst_36 : bf16 to vector<128x128xbf16>
    %87 = arith.cmpf one, %7, %86 : vector<128x128xbf16>
    %cst_37 = arith.constant 0.000000e+00 : bf16
    %88 = vector.broadcast %cst_37 : bf16 to vector<128x128xbf16>
    %89 = arith.cmpf one, %9, %88 : vector<128x128xbf16>
    %90 = arith.ori %87, %89 : vector<128x128xi1>
    %c0_38 = arith.constant 0 : index
    %c0_39 = arith.constant 0 : index
    %91 = vector.load %arg6[%c0_38, %c0_39] : memref<128x128xf32, #tpu.memory_space<vmem>>, vector<128x128xf32>
    %cst_40 = arith.constant 0.000000e+00 : f32
    %92 = vector.broadcast %cst_40 : f32 to vector<128x128xf32>
    %93 = arith.select %90, %91, %92 : vector<128x128xi1>, vector<128x128xf32>
    %cst_41 = arith.constant dense<0.000000e+00> : vector<128xf32>
    %94 = vector.multi_reduction <add>, %93, %cst_41 [0] : vector<128x128xf32> to vector<128xf32>
    %95 = vector.shape_cast %94 : vector<128xf32> to vector<1x128xf32>
    %cst_42 = arith.constant 1.000000e+00 : f32
    %96 = vector.broadcast %cst_42 : f32 to vector<1x128xf32>
    %97 = arith.maximumf %95, %96 : vector<1x128xf32>
    %98 = tpu.reciprocal %97 {approx = true} : vector<1x128xf32> -> vector<1x128xf32>
    %c0_i32 = arith.constant 0 : i32
    %99 = math.cos %21 : vector<1x128xf32>
    %100 = arith.mulf %20, %99 : vector<1x128xf32>
    %101 = math.sin %21 : vector<1x128xf32>
    %102 = arith.mulf %20, %101 : vector<1x128xf32>
    %103 = tpu.concatenate %100, %102 in 0 : vector<1x128xf32>, vector<1x128xf32> -> vector<2x128xf32>
    %104 = arith.truncf %103 : vector<2x128xf32> to vector<2x128xbf16>
    %cst_43 = arith.constant dense<0.000000e+00> : vector<2x128xf32>
    %105 = tpu.matmul %104, %7, %cst_43 {dimension_numbers = #tpu.dot_dimension_numbers<[1], [0], [0], [1], [0, 0, 1, 1], [], []>} : vector<2x128xbf16>, vector<128x128xbf16>, vector<2x128xf32> -> vector<2x128xf32>
    %cst_44 = arith.constant dense<0.000000e+00> : vector<2x128xf32>
    %106 = tpu.matmul %104, %9, %cst_44 {dimension_numbers = #tpu.dot_dimension_numbers<[1], [0], [0], [1], [0, 0, 1, 1], [], []>} : vector<2x128xbf16>, vector<128x128xbf16>, vector<2x128xf32> -> vector<2x128xf32>
    %107 = vector.extract_strided_slice %105 {offsets = [0, 0], sizes = [1, 128], strides = [1, 1]} : vector<2x128xf32> to vector<1x128xf32>
    %108 = vector.extract_strided_slice %106 {offsets = [1, 0], sizes = [1, 128], strides = [1, 1]} : vector<2x128xf32> to vector<1x128xf32>
    %109 = arith.subf %107, %108 : vector<1x128xf32>
    %110 = vector.extract_strided_slice %105 {offsets = [1, 0], sizes = [1, 128], strides = [1, 1]} : vector<2x128xf32> to vector<1x128xf32>
    %111 = vector.extract_strided_slice %106 {offsets = [0, 0], sizes = [1, 128], strides = [1, 1]} : vector<2x128xf32> to vector<1x128xf32>
    %112 = arith.addf %110, %111 : vector<1x128xf32>
    %113 = arith.mulf %100, %109 : vector<1x128xf32>
    %114 = arith.mulf %102, %112 : vector<1x128xf32>
    %115 = arith.addf %113, %114 : vector<1x128xf32>
    %116 = arith.mulf %102, %109 : vector<1x128xf32>
    %117 = arith.mulf %100, %112 : vector<1x128xf32>
    %118 = arith.subf %116, %117 : vector<1x128xf32>
    %119 = arith.subf %3, %115 : vector<1x128xf32>
    %cst_45 = arith.constant 0.000000e+00 : f32
    %120 = vector.broadcast %cst_45 : f32 to vector<1x128xf32>
    %121 = arith.select %11, %120, %119 : vector<1x128xi1>, vector<1x128xf32>
    %122 = arith.ori %11, %13 : vector<1x128xi1>
    %123 = arith.subf %5, %118 : vector<1x128xf32>
    %cst_46 = arith.constant 0.000000e+00 : f32
    %124 = vector.broadcast %cst_46 : f32 to vector<1x128xf32>
    %125 = arith.select %122, %124, %123 : vector<1x128xi1>, vector<1x128xf32>
    %cst_47 = arith.constant dense<0.000000e+00> : vector<32x128xf32>
    %126 = tpu.matmul %85, %93, %cst_47 {dimension_numbers = #tpu.dot_dimension_numbers<[1], [0], [0], [1], [0, 0, 1, 1], [], []>} : vector<32x128xf32>, vector<128x128xf32>, vector<32x128xf32> -> vector<32x128xf32>
    %127 = vector.broadcast %98 : vector<1x128xf32> to vector<32x128xf32>
    %128 = arith.mulf %126, %127 : vector<32x128xf32>
    %129 = arith.index_cast %c0_i32 : i32 to index
    %c0_48 = arith.constant 0 : index
    %c0_49 = arith.constant 0 : index
    %130 = vector.load %arg13[%129, %c0_48, %c0_49] : memref<4x32x32xf32, #tpu.memory_space<vmem>>, vector<1x32x32xf32>
    %131 = vector.shape_cast %130 : vector<1x32x32xf32> to vector<32x32xf32>
    %cst_50 = arith.constant dense<0.000000e+00> : vector<32x128xf32>
    %132 = tpu.matmul %131, %128, %cst_50 {dimension_numbers = #tpu.dot_dimension_numbers<[1], [0], [0], [1], [0, 0, 1, 1], [], []>} : vector<32x32xf32>, vector<32x128xf32>, vector<32x128xf32> -> vector<32x128xf32>
    %133 = arith.index_cast %c0_i32 : i32 to index
    %c0_51 = arith.constant 0 : index
    %c0_52 = arith.constant 0 : index
    %134 = vector.load %arg14[%133, %c0_51, %c0_52] : memref<4x32x1xf32, #tpu.memory_space<vmem>>, vector<1x32x1xf32>
    %135 = vector.shape_cast %134 : vector<1x32x1xf32> to vector<32x1xf32>
    %136 = vector.broadcast %135 : vector<32x1xf32> to vector<32x128xf32>
    %137 = vector.broadcast %121 : vector<1x128xf32> to vector<32x128xf32>
    %138 = arith.mulf %136, %137 : vector<32x128xf32>
    %139 = arith.addf %132, %138 : vector<32x128xf32>
    %140 = arith.index_cast %c0_i32 : i32 to index
    %c0_53 = arith.constant 0 : index
    %c0_54 = arith.constant 0 : index
    %141 = vector.load %arg15[%140, %c0_53, %c0_54] : memref<4x32x1xf32, #tpu.memory_space<vmem>>, vector<1x32x1xf32>
    %142 = vector.shape_cast %141 : vector<1x32x1xf32> to vector<32x1xf32>
    %143 = vector.broadcast %142 : vector<32x1xf32> to vector<32x128xf32>
    %144 = vector.broadcast %125 : vector<1x128xf32> to vector<32x128xf32>
    %145 = arith.mulf %143, %144 : vector<32x128xf32>
    %146 = arith.addf %139, %145 : vector<32x128xf32>
    %147 = arith.index_cast %c0_i32 : i32 to index
    %c0_55 = arith.constant 0 : index
    %c0_56 = arith.constant 0 : index
    %148 = vector.load %arg16[%147, %c0_55, %c0_56] : memref<4x32x1xf32, #tpu.memory_space<vmem>>, vector<1x32x1xf32>
    %149 = vector.shape_cast %148 : vector<1x32x1xf32> to vector<32x1xf32>
    %150 = vector.broadcast %149 : vector<32x1xf32> to vector<32x128xf32>
    %151 = arith.addf %146, %150 : vector<32x128xf32>
    %152 = math.tanh %151 : vector<32x128xf32>
    %153 = arith.addf %85, %152 : vector<32x128xf32>
    %c0_57 = arith.constant 0 : index
    %c0_58 = arith.constant 0 : index
    %154 = vector.load %arg17[%c0_57, %c0_58] : memref<2x32xf32, #tpu.memory_space<vmem>>, vector<2x32xf32>
    %cst_59 = arith.constant dense<0.000000e+00> : vector<2x128xf32>
    %155 = tpu.matmul %154, %153, %cst_59 {dimension_numbers = #tpu.dot_dimension_numbers<[1], [0], [0], [1], [0, 0, 1, 1], [], []>} : vector<2x32xf32>, vector<32x128xf32>, vector<2x128xf32> -> vector<2x128xf32>
    %c0_60 = arith.constant 0 : index
    %c0_61 = arith.constant 0 : index
    %156 = vector.load %arg18[%c0_60, %c0_61] : memref<2x1xf32, #tpu.memory_space<vmem>>, vector<2x1xf32>
    %157 = vector.broadcast %156 : vector<2x1xf32> to vector<2x128xf32>
    %158 = arith.addf %155, %157 : vector<2x128xf32>
    %159 = vector.extract_strided_slice %158 {offsets = [0, 0], sizes = [1, 128], strides = [1, 1]} : vector<2x128xf32> to vector<1x128xf32>
    %cst_62 = arith.constant 0.000000e+00 : f32
    %160 = vector.broadcast %cst_62 : f32 to vector<1x128xf32>
    %161 = arith.select %15, %159, %160 : vector<1x128xi1>, vector<1x128xf32>
    %162 = arith.addf %20, %161 : vector<1x128xf32>
    %163 = vector.extract_strided_slice %158 {offsets = [1, 0], sizes = [1, 128], strides = [1, 1]} : vector<2x128xf32> to vector<1x128xf32>
    %cst_63 = arith.constant 0.000000e+00 : f32
    %164 = vector.broadcast %cst_63 : f32 to vector<1x128xf32>
    %165 = arith.select %11, %164, %163 : vector<1x128xi1>, vector<1x128xf32>
    %166 = arith.addf %21, %165 : vector<1x128xf32>
    %c1_i32_64 = arith.constant 1 : i32
    %167 = math.cos %166 : vector<1x128xf32>
    %168 = arith.mulf %162, %167 : vector<1x128xf32>
    %169 = math.sin %166 : vector<1x128xf32>
    %170 = arith.mulf %162, %169 : vector<1x128xf32>
    %171 = tpu.concatenate %168, %170 in 0 : vector<1x128xf32>, vector<1x128xf32> -> vector<2x128xf32>
    %172 = arith.truncf %171 : vector<2x128xf32> to vector<2x128xbf16>
    %cst_65 = arith.constant dense<0.000000e+00> : vector<2x128xf32>
    %173 = tpu.matmul %172, %7, %cst_65 {dimension_numbers = #tpu.dot_dimension_numbers<[1], [0], [0], [1], [0, 0, 1, 1], [], []>} : vector<2x128xbf16>, vector<128x128xbf16>, vector<2x128xf32> -> vector<2x128xf32>
    %cst_66 = arith.constant dense<0.000000e+00> : vector<2x128xf32>
    %174 = tpu.matmul %172, %9, %cst_66 {dimension_numbers = #tpu.dot_dimension_numbers<[1], [0], [0], [1], [0, 0, 1, 1], [], []>} : vector<2x128xbf16>, vector<128x128xbf16>, vector<2x128xf32> -> vector<2x128xf32>
    %175 = vector.extract_strided_slice %173 {offsets = [0, 0], sizes = [1, 128], strides = [1, 1]} : vector<2x128xf32> to vector<1x128xf32>
    %176 = vector.extract_strided_slice %174 {offsets = [1, 0], sizes = [1, 128], strides = [1, 1]} : vector<2x128xf32> to vector<1x128xf32>
    %177 = arith.subf %175, %176 : vector<1x128xf32>
    %178 = vector.extract_strided_slice %173 {offsets = [1, 0], sizes = [1, 128], strides = [1, 1]} : vector<2x128xf32> to vector<1x128xf32>
    %179 = vector.extract_strided_slice %174 {offsets = [0, 0], sizes = [1, 128], strides = [1, 1]} : vector<2x128xf32> to vector<1x128xf32>
    %180 = arith.addf %178, %179 : vector<1x128xf32>
    %181 = arith.mulf %168, %177 : vector<1x128xf32>
    %182 = arith.mulf %170, %180 : vector<1x128xf32>
    %183 = arith.addf %181, %182 : vector<1x128xf32>
    %184 = arith.mulf %170, %177 : vector<1x128xf32>
    %185 = arith.mulf %168, %180 : vector<1x128xf32>
    %186 = arith.subf %184, %185 : vector<1x128xf32>
    %187 = arith.subf %3, %183 : vector<1x128xf32>
    %cst_67 = arith.constant 0.000000e+00 : f32
    %188 = vector.broadcast %cst_67 : f32 to vector<1x128xf32>
    %189 = arith.select %11, %188, %187 : vector<1x128xi1>, vector<1x128xf32>
    %190 = arith.ori %11, %13 : vector<1x128xi1>
    %191 = arith.subf %5, %186 : vector<1x128xf32>
    %cst_68 = arith.constant 0.000000e+00 : f32
    %192 = vector.broadcast %cst_68 : f32 to vector<1x128xf32>
    %193 = arith.select %190, %192, %191 : vector<1x128xi1>, vector<1x128xf32>
    %cst_69 = arith.constant dense<0.000000e+00> : vector<32x128xf32>
    %194 = tpu.matmul %153, %93, %cst_69 {dimension_numbers = #tpu.dot_dimension_numbers<[1], [0], [0], [1], [0, 0, 1, 1], [], []>} : vector<32x128xf32>, vector<128x128xf32>, vector<32x128xf32> -> vector<32x128xf32>
    %195 = vector.broadcast %98 : vector<1x128xf32> to vector<32x128xf32>
    %196 = arith.mulf %194, %195 : vector<32x128xf32>
    %197 = arith.index_cast %c1_i32_64 : i32 to index
    %c0_70 = arith.constant 0 : index
    %c0_71 = arith.constant 0 : index
    %198 = vector.load %arg13[%197, %c0_70, %c0_71] : memref<4x32x32xf32, #tpu.memory_space<vmem>>, vector<1x32x32xf32>
    %199 = vector.shape_cast %198 : vector<1x32x32xf32> to vector<32x32xf32>
    %cst_72 = arith.constant dense<0.000000e+00> : vector<32x128xf32>
    %200 = tpu.matmul %199, %196, %cst_72 {dimension_numbers = #tpu.dot_dimension_numbers<[1], [0], [0], [1], [0, 0, 1, 1], [], []>} : vector<32x32xf32>, vector<32x128xf32>, vector<32x128xf32> -> vector<32x128xf32>
    %201 = arith.index_cast %c1_i32_64 : i32 to index
    %c0_73 = arith.constant 0 : index
    %c0_74 = arith.constant 0 : index
    %202 = vector.load %arg14[%201, %c0_73, %c0_74] : memref<4x32x1xf32, #tpu.memory_space<vmem>>, vector<1x32x1xf32>
    %203 = vector.shape_cast %202 : vector<1x32x1xf32> to vector<32x1xf32>
    %204 = vector.broadcast %203 : vector<32x1xf32> to vector<32x128xf32>
    %205 = vector.broadcast %189 : vector<1x128xf32> to vector<32x128xf32>
    %206 = arith.mulf %204, %205 : vector<32x128xf32>
    %207 = arith.addf %200, %206 : vector<32x128xf32>
    %208 = arith.index_cast %c1_i32_64 : i32 to index
    %c0_75 = arith.constant 0 : index
    %c0_76 = arith.constant 0 : index
    %209 = vector.load %arg15[%208, %c0_75, %c0_76] : memref<4x32x1xf32, #tpu.memory_space<vmem>>, vector<1x32x1xf32>
    %210 = vector.shape_cast %209 : vector<1x32x1xf32> to vector<32x1xf32>
    %211 = vector.broadcast %210 : vector<32x1xf32> to vector<32x128xf32>
    %212 = vector.broadcast %193 : vector<1x128xf32> to vector<32x128xf32>
    %213 = arith.mulf %211, %212 : vector<32x128xf32>
    %214 = arith.addf %207, %213 : vector<32x128xf32>
    %215 = arith.index_cast %c1_i32_64 : i32 to index
    %c0_77 = arith.constant 0 : index
    %c0_78 = arith.constant 0 : index
    %216 = vector.load %arg16[%215, %c0_77, %c0_78] : memref<4x32x1xf32, #tpu.memory_space<vmem>>, vector<1x32x1xf32>
    %217 = vector.shape_cast %216 : vector<1x32x1xf32> to vector<32x1xf32>
    %218 = vector.broadcast %217 : vector<32x1xf32> to vector<32x128xf32>
    %219 = arith.addf %214, %218 : vector<32x128xf32>
    %220 = math.tanh %219 : vector<32x128xf32>
    %221 = arith.addf %153, %220 : vector<32x128xf32>
    %c0_79 = arith.constant 0 : index
    %c0_80 = arith.constant 0 : index
    %222 = vector.load %arg17[%c0_79, %c0_80] : memref<2x32xf32, #tpu.memory_space<vmem>>, vector<2x32xf32>
    %cst_81 = arith.constant dense<0.000000e+00> : vector<2x128xf32>
    %223 = tpu.matmul %222, %221, %cst_81 {dimension_numbers = #tpu.dot_dimension_numbers<[1], [0], [0], [1], [0, 0, 1, 1], [], []>} : vector<2x32xf32>, vector<32x128xf32>, vector<2x128xf32> -> vector<2x128xf32>
    %c0_82 = arith.constant 0 : index
    %c0_83 = arith.constant 0 : index
    %224 = vector.load %arg18[%c0_82, %c0_83] : memref<2x1xf32, #tpu.memory_space<vmem>>, vector<2x1xf32>
    %225 = vector.broadcast %224 : vector<2x1xf32> to vector<2x128xf32>
    %226 = arith.addf %223, %225 : vector<2x128xf32>
    %227 = vector.extract_strided_slice %226 {offsets = [0, 0], sizes = [1, 128], strides = [1, 1]} : vector<2x128xf32> to vector<1x128xf32>
    %cst_84 = arith.constant 0.000000e+00 : f32
    %228 = vector.broadcast %cst_84 : f32 to vector<1x128xf32>
    %229 = arith.select %15, %227, %228 : vector<1x128xi1>, vector<1x128xf32>
    %230 = arith.addf %162, %229 : vector<1x128xf32>
    %231 = vector.extract_strided_slice %226 {offsets = [1, 0], sizes = [1, 128], strides = [1, 1]} : vector<2x128xf32> to vector<1x128xf32>
    %cst_85 = arith.constant 0.000000e+00 : f32
    %232 = vector.broadcast %cst_85 : f32 to vector<1x128xf32>
    %233 = arith.select %11, %232, %231 : vector<1x128xi1>, vector<1x128xf32>
    %234 = arith.addf %166, %233 : vector<1x128xf32>
    %c2_i32_86 = arith.constant 2 : i32
    %235 = math.cos %234 : vector<1x128xf32>
    %236 = arith.mulf %230, %235 : vector<1x128xf32>
    %237 = math.sin %234 : vector<1x128xf32>
    %238 = arith.mulf %230, %237 : vector<1x128xf32>
    %239 = tpu.concatenate %236, %238 in 0 : vector<1x128xf32>, vector<1x128xf32> -> vector<2x128xf32>
    %240 = arith.truncf %239 : vector<2x128xf32> to vector<2x128xbf16>
    %cst_87 = arith.constant dense<0.000000e+00> : vector<2x128xf32>
    %241 = tpu.matmul %240, %7, %cst_87 {dimension_numbers = #tpu.dot_dimension_numbers<[1], [0], [0], [1], [0, 0, 1, 1], [], []>} : vector<2x128xbf16>, vector<128x128xbf16>, vector<2x128xf32> -> vector<2x128xf32>
    %cst_88 = arith.constant dense<0.000000e+00> : vector<2x128xf32>
    %242 = tpu.matmul %240, %9, %cst_88 {dimension_numbers = #tpu.dot_dimension_numbers<[1], [0], [0], [1], [0, 0, 1, 1], [], []>} : vector<2x128xbf16>, vector<128x128xbf16>, vector<2x128xf32> -> vector<2x128xf32>
    %243 = vector.extract_strided_slice %241 {offsets = [0, 0], sizes = [1, 128], strides = [1, 1]} : vector<2x128xf32> to vector<1x128xf32>
    %244 = vector.extract_strided_slice %242 {offsets = [1, 0], sizes = [1, 128], strides = [1, 1]} : vector<2x128xf32> to vector<1x128xf32>
    %245 = arith.subf %243, %244 : vector<1x128xf32>
    %246 = vector.extract_strided_slice %241 {offsets = [1, 0], sizes = [1, 128], strides = [1, 1]} : vector<2x128xf32> to vector<1x128xf32>
    %247 = vector.extract_strided_slice %242 {offsets = [0, 0], sizes = [1, 128], strides = [1, 1]} : vector<2x128xf32> to vector<1x128xf32>
    %248 = arith.addf %246, %247 : vector<1x128xf32>
    %249 = arith.mulf %236, %245 : vector<1x128xf32>
    %250 = arith.mulf %238, %248 : vector<1x128xf32>
    %251 = arith.addf %249, %250 : vector<1x128xf32>
    %252 = arith.mulf %238, %245 : vector<1x128xf32>
    %253 = arith.mulf %236, %248 : vector<1x128xf32>
    %254 = arith.subf %252, %253 : vector<1x128xf32>
    %255 = arith.subf %3, %251 : vector<1x128xf32>
    %cst_89 = arith.constant 0.000000e+00 : f32
    %256 = vector.broadcast %cst_89 : f32 to vector<1x128xf32>
    %257 = arith.select %11, %256, %255 : vector<1x128xi1>, vector<1x128xf32>
    %258 = arith.ori %11, %13 : vector<1x128xi1>
    %259 = arith.subf %5, %254 : vector<1x128xf32>
    %cst_90 = arith.constant 0.000000e+00 : f32
    %260 = vector.broadcast %cst_90 : f32 to vector<1x128xf32>
    %261 = arith.select %258, %260, %259 : vector<1x128xi1>, vector<1x128xf32>
    %cst_91 = arith.constant dense<0.000000e+00> : vector<32x128xf32>
    %262 = tpu.matmul %221, %93, %cst_91 {dimension_numbers = #tpu.dot_dimension_numbers<[1], [0], [0], [1], [0, 0, 1, 1], [], []>} : vector<32x128xf32>, vector<128x128xf32>, vector<32x128xf32> -> vector<32x128xf32>
    %263 = vector.broadcast %98 : vector<1x128xf32> to vector<32x128xf32>
    %264 = arith.mulf %262, %263 : vector<32x128xf32>
    %265 = arith.index_cast %c2_i32_86 : i32 to index
    %c0_92 = arith.constant 0 : index
    %c0_93 = arith.constant 0 : index
    %266 = vector.load %arg13[%265, %c0_92, %c0_93] : memref<4x32x32xf32, #tpu.memory_space<vmem>>, vector<1x32x32xf32>
    %267 = vector.shape_cast %266 : vector<1x32x32xf32> to vector<32x32xf32>
    %cst_94 = arith.constant dense<0.000000e+00> : vector<32x128xf32>
    %268 = tpu.matmul %267, %264, %cst_94 {dimension_numbers = #tpu.dot_dimension_numbers<[1], [0], [0], [1], [0, 0, 1, 1], [], []>} : vector<32x32xf32>, vector<32x128xf32>, vector<32x128xf32> -> vector<32x128xf32>
    %269 = arith.index_cast %c2_i32_86 : i32 to index
    %c0_95 = arith.constant 0 : index
    %c0_96 = arith.constant 0 : index
    %270 = vector.load %arg14[%269, %c0_95, %c0_96] : memref<4x32x1xf32, #tpu.memory_space<vmem>>, vector<1x32x1xf32>
    %271 = vector.shape_cast %270 : vector<1x32x1xf32> to vector<32x1xf32>
    %272 = vector.broadcast %271 : vector<32x1xf32> to vector<32x128xf32>
    %273 = vector.broadcast %257 : vector<1x128xf32> to vector<32x128xf32>
    %274 = arith.mulf %272, %273 : vector<32x128xf32>
    %275 = arith.addf %268, %274 : vector<32x128xf32>
    %276 = arith.index_cast %c2_i32_86 : i32 to index
    %c0_97 = arith.constant 0 : index
    %c0_98 = arith.constant 0 : index
    %277 = vector.load %arg15[%276, %c0_97, %c0_98] : memref<4x32x1xf32, #tpu.memory_space<vmem>>, vector<1x32x1xf32>
    %278 = vector.shape_cast %277 : vector<1x32x1xf32> to vector<32x1xf32>
    %279 = vector.broadcast %278 : vector<32x1xf32> to vector<32x128xf32>
    %280 = vector.broadcast %261 : vector<1x128xf32> to vector<32x128xf32>
    %281 = arith.mulf %279, %280 : vector<32x128xf32>
    %282 = arith.addf %275, %281 : vector<32x128xf32>
    %283 = arith.index_cast %c2_i32_86 : i32 to index
    %c0_99 = arith.constant 0 : index
    %c0_100 = arith.constant 0 : index
    %284 = vector.load %arg16[%283, %c0_99, %c0_100] : memref<4x32x1xf32, #tpu.memory_space<vmem>>, vector<1x32x1xf32>
    %285 = vector.shape_cast %284 : vector<1x32x1xf32> to vector<32x1xf32>
    %286 = vector.broadcast %285 : vector<32x1xf32> to vector<32x128xf32>
    %287 = arith.addf %282, %286 : vector<32x128xf32>
    %288 = math.tanh %287 : vector<32x128xf32>
    %289 = arith.addf %221, %288 : vector<32x128xf32>
    %c0_101 = arith.constant 0 : index
    %c0_102 = arith.constant 0 : index
    %290 = vector.load %arg17[%c0_101, %c0_102] : memref<2x32xf32, #tpu.memory_space<vmem>>, vector<2x32xf32>
    %cst_103 = arith.constant dense<0.000000e+00> : vector<2x128xf32>
    %291 = tpu.matmul %290, %289, %cst_103 {dimension_numbers = #tpu.dot_dimension_numbers<[1], [0], [0], [1], [0, 0, 1, 1], [], []>} : vector<2x32xf32>, vector<32x128xf32>, vector<2x128xf32> -> vector<2x128xf32>
    %c0_104 = arith.constant 0 : index
    %c0_105 = arith.constant 0 : index
    %292 = vector.load %arg18[%c0_104, %c0_105] : memref<2x1xf32, #tpu.memory_space<vmem>>, vector<2x1xf32>
    %293 = vector.broadcast %292 : vector<2x1xf32> to vector<2x128xf32>
    %294 = arith.addf %291, %293 : vector<2x128xf32>
    %295 = vector.extract_strided_slice %294 {offsets = [0, 0], sizes = [1, 128], strides = [1, 1]} : vector<2x128xf32> to vector<1x128xf32>
    %cst_106 = arith.constant 0.000000e+00 : f32
    %296 = vector.broadcast %cst_106 : f32 to vector<1x128xf32>
    %297 = arith.select %15, %295, %296 : vector<1x128xi1>, vector<1x128xf32>
    %298 = arith.addf %230, %297 : vector<1x128xf32>
    %299 = vector.extract_strided_slice %294 {offsets = [1, 0], sizes = [1, 128], strides = [1, 1]} : vector<2x128xf32> to vector<1x128xf32>
    %cst_107 = arith.constant 0.000000e+00 : f32
    %300 = vector.broadcast %cst_107 : f32 to vector<1x128xf32>
    %301 = arith.select %11, %300, %299 : vector<1x128xi1>, vector<1x128xf32>
    %302 = arith.addf %234, %301 : vector<1x128xf32>
    %c3_i32_108 = arith.constant 3 : i32
    %303 = math.cos %302 : vector<1x128xf32>
    %304 = arith.mulf %298, %303 : vector<1x128xf32>
    %305 = math.sin %302 : vector<1x128xf32>
    %306 = arith.mulf %298, %305 : vector<1x128xf32>
    %307 = tpu.concatenate %304, %306 in 0 : vector<1x128xf32>, vector<1x128xf32> -> vector<2x128xf32>
    %308 = arith.truncf %307 : vector<2x128xf32> to vector<2x128xbf16>
    %cst_109 = arith.constant dense<0.000000e+00> : vector<2x128xf32>
    %309 = tpu.matmul %308, %7, %cst_109 {dimension_numbers = #tpu.dot_dimension_numbers<[1], [0], [0], [1], [0, 0, 1, 1], [], []>} : vector<2x128xbf16>, vector<128x128xbf16>, vector<2x128xf32> -> vector<2x128xf32>
    %cst_110 = arith.constant dense<0.000000e+00> : vector<2x128xf32>
    %310 = tpu.matmul %308, %9, %cst_110 {dimension_numbers = #tpu.dot_dimension_numbers<[1], [0], [0], [1], [0, 0, 1, 1], [], []>} : vector<2x128xbf16>, vector<128x128xbf16>, vector<2x128xf32> -> vector<2x128xf32>
    %311 = vector.extract_strided_slice %309 {offsets = [0, 0], sizes = [1, 128], strides = [1, 1]} : vector<2x128xf32> to vector<1x128xf32>
    %312 = vector.extract_strided_slice %310 {offsets = [1, 0], sizes = [1, 128], strides = [1, 1]} : vector<2x128xf32> to vector<1x128xf32>
    %313 = arith.subf %311, %312 : vector<1x128xf32>
    %314 = vector.extract_strided_slice %309 {offsets = [1, 0], sizes = [1, 128], strides = [1, 1]} : vector<2x128xf32> to vector<1x128xf32>
    %315 = vector.extract_strided_slice %310 {offsets = [0, 0], sizes = [1, 128], strides = [1, 1]} : vector<2x128xf32> to vector<1x128xf32>
    %316 = arith.addf %314, %315 : vector<1x128xf32>
    %317 = arith.mulf %304, %313 : vector<1x128xf32>
    %318 = arith.mulf %306, %316 : vector<1x128xf32>
    %319 = arith.addf %317, %318 : vector<1x128xf32>
    %320 = arith.mulf %306, %313 : vector<1x128xf32>
    %321 = arith.mulf %304, %316 : vector<1x128xf32>
    %322 = arith.subf %320, %321 : vector<1x128xf32>
    %323 = arith.subf %3, %319 : vector<1x128xf32>
    %cst_111 = arith.constant 0.000000e+00 : f32
    %324 = vector.broadcast %cst_111 : f32 to vector<1x128xf32>
    %325 = arith.select %11, %324, %323 : vector<1x128xi1>, vector<1x128xf32>
    %326 = arith.ori %11, %13 : vector<1x128xi1>
    %327 = arith.subf %5, %322 : vector<1x128xf32>
    %cst_112 = arith.constant 0.000000e+00 : f32
    %328 = vector.broadcast %cst_112 : f32 to vector<1x128xf32>
    %329 = arith.select %326, %328, %327 : vector<1x128xi1>, vector<1x128xf32>
    %cst_113 = arith.constant dense<0.000000e+00> : vector<32x128xf32>
    %330 = tpu.matmul %289, %93, %cst_113 {dimension_numbers = #tpu.dot_dimension_numbers<[1], [0], [0], [1], [0, 0, 1, 1], [], []>} : vector<32x128xf32>, vector<128x128xf32>, vector<32x128xf32> -> vector<32x128xf32>
    %331 = vector.broadcast %98 : vector<1x128xf32> to vector<32x128xf32>
    %332 = arith.mulf %330, %331 : vector<32x128xf32>
    %333 = arith.index_cast %c3_i32_108 : i32 to index
    %c0_114 = arith.constant 0 : index
    %c0_115 = arith.constant 0 : index
    %334 = vector.load %arg13[%333, %c0_114, %c0_115] : memref<4x32x32xf32, #tpu.memory_space<vmem>>, vector<1x32x32xf32>
    %335 = vector.shape_cast %334 : vector<1x32x32xf32> to vector<32x32xf32>
    %cst_116 = arith.constant dense<0.000000e+00> : vector<32x128xf32>
    %336 = tpu.matmul %335, %332, %cst_116 {dimension_numbers = #tpu.dot_dimension_numbers<[1], [0], [0], [1], [0, 0, 1, 1], [], []>} : vector<32x32xf32>, vector<32x128xf32>, vector<32x128xf32> -> vector<32x128xf32>
    %337 = arith.index_cast %c3_i32_108 : i32 to index
    %c0_117 = arith.constant 0 : index
    %c0_118 = arith.constant 0 : index
    %338 = vector.load %arg14[%337, %c0_117, %c0_118] : memref<4x32x1xf32, #tpu.memory_space<vmem>>, vector<1x32x1xf32>
    %339 = vector.shape_cast %338 : vector<1x32x1xf32> to vector<32x1xf32>
    %340 = vector.broadcast %339 : vector<32x1xf32> to vector<32x128xf32>
    %341 = vector.broadcast %325 : vector<1x128xf32> to vector<32x128xf32>
    %342 = arith.mulf %340, %341 : vector<32x128xf32>
    %343 = arith.addf %336, %342 : vector<32x128xf32>
    %344 = arith.index_cast %c3_i32_108 : i32 to index
    %c0_119 = arith.constant 0 : index
    %c0_120 = arith.constant 0 : index
    %345 = vector.load %arg15[%344, %c0_119, %c0_120] : memref<4x32x1xf32, #tpu.memory_space<vmem>>, vector<1x32x1xf32>
    %346 = vector.shape_cast %345 : vector<1x32x1xf32> to vector<32x1xf32>
    %347 = vector.broadcast %346 : vector<32x1xf32> to vector<32x128xf32>
    %348 = vector.broadcast %329 : vector<1x128xf32> to vector<32x128xf32>
    %349 = arith.mulf %347, %348 : vector<32x128xf32>
    %350 = arith.addf %343, %349 : vector<32x128xf32>
    %351 = arith.index_cast %c3_i32_108 : i32 to index
    %c0_121 = arith.constant 0 : index
    %c0_122 = arith.constant 0 : index
    %352 = vector.load %arg16[%351, %c0_121, %c0_122] : memref<4x32x1xf32, #tpu.memory_space<vmem>>, vector<1x32x1xf32>
    %353 = vector.shape_cast %352 : vector<1x32x1xf32> to vector<32x1xf32>
    %354 = vector.broadcast %353 : vector<32x1xf32> to vector<32x128xf32>
    %355 = arith.addf %350, %354 : vector<32x128xf32>
    %356 = math.tanh %355 : vector<32x128xf32>
    %357 = arith.addf %289, %356 : vector<32x128xf32>
    %c0_123 = arith.constant 0 : index
    %c0_124 = arith.constant 0 : index
    %358 = vector.load %arg17[%c0_123, %c0_124] : memref<2x32xf32, #tpu.memory_space<vmem>>, vector<2x32xf32>
    %cst_125 = arith.constant dense<0.000000e+00> : vector<2x128xf32>
    %359 = tpu.matmul %358, %357, %cst_125 {dimension_numbers = #tpu.dot_dimension_numbers<[1], [0], [0], [1], [0, 0, 1, 1], [], []>} : vector<2x32xf32>, vector<32x128xf32>, vector<2x128xf32> -> vector<2x128xf32>
    %c0_126 = arith.constant 0 : index
    %c0_127 = arith.constant 0 : index
    %360 = vector.load %arg18[%c0_126, %c0_127] : memref<2x1xf32, #tpu.memory_space<vmem>>, vector<2x1xf32>
    %361 = vector.broadcast %360 : vector<2x1xf32> to vector<2x128xf32>
    %362 = arith.addf %359, %361 : vector<2x128xf32>
    %363 = vector.extract_strided_slice %362 {offsets = [0, 0], sizes = [1, 128], strides = [1, 1]} : vector<2x128xf32> to vector<1x128xf32>
    %cst_128 = arith.constant 0.000000e+00 : f32
    %364 = vector.broadcast %cst_128 : f32 to vector<1x128xf32>
    %365 = arith.select %15, %363, %364 : vector<1x128xi1>, vector<1x128xf32>
    %366 = arith.addf %298, %365 : vector<1x128xf32>
    %367 = vector.extract_strided_slice %362 {offsets = [1, 0], sizes = [1, 128], strides = [1, 1]} : vector<2x128xf32> to vector<1x128xf32>
    %cst_129 = arith.constant 0.000000e+00 : f32
    %368 = vector.broadcast %cst_129 : f32 to vector<1x128xf32>
    %369 = arith.select %11, %368, %367 : vector<1x128xi1>, vector<1x128xf32>
    %370 = arith.addf %302, %369 : vector<1x128xf32>
    %c4_i32 = arith.constant 4 : i32
    %371 = tpu.concatenate %366, %370 in 0 : vector<1x128xf32>, vector<1x128xf32> -> vector<2x128xf32>
    %c0_130 = arith.constant 0 : index
    %c0_131 = arith.constant 0 : index
    %c0_132 = arith.constant 0 : index
    %372 = vector.load %arg19[%c0_130, %c0_131, %c0_132] : memref<1x2x128xf32, #tpu.memory_space<vmem>>, vector<1x2x128xf32>
    %373 = vector.shape_cast %372 : vector<1x2x128xf32> to vector<2x128xf32>
    %374 = vector.shape_cast %371 : vector<2x128xf32> to vector<1x2x128xf32>
    tpu.vector_store %arg19[%c0_130, %c0_131, %c0_132], %374 {strides = array<i32>} : memref<1x2x128xf32, #tpu.memory_space<vmem>>, vector<1x2x128xf32>,
    return
  }
  func.func @transform_0(%arg0: i32) -> (i32, i32, i32) {
    %c0_i32 = arith.constant 0 : i32
    %c0_i32_0 = arith.constant 0 : i32
    %c0_i32_1 = arith.constant 0 : i32
    return %arg0, %c0_i32, %c0_i32_0 : i32, i32, i32
  }
  func.func @transform_1(%arg0: i32) -> (i32, i32, i32) {
    %c0_i32 = arith.constant 0 : i32
    %c0_i32_0 = arith.constant 0 : i32
    %c0_i32_1 = arith.constant 0 : i32
    return %arg0, %c0_i32, %c0_i32_0 : i32, i32, i32
  }
  func.func @transform_2(%arg0: i32) -> (i32, i32, i32) {
    %c0_i32 = arith.constant 0 : i32
    %c0_i32_0 = arith.constant 0 : i32
    %c0_i32_1 = arith.constant 0 : i32
    return %arg0, %c0_i32, %c0_i32_0 : i32, i32, i32
  }
  func.func @transform_3(%arg0: i32) -> (i32, i32, i32) {
    %c0_i32 = arith.constant 0 : i32
    %c0_i32_0 = arith.constant 0 : i32
    %c0_i32_1 = arith.constant 0 : i32
    return %arg0, %c0_i32, %c0_i32_0 : i32, i32, i32
  }
  func.func @transform_4(%arg0: i32) -> (i32, i32, i32) {
    %c0_i32 = arith.constant 0 : i32
    %c0_i32_0 = arith.constant 0 : i32
    %c0_i32_1 = arith.constant 0 : i32
    return %arg0, %c0_i32, %c0_i32_0 : i32, i32, i32
  }
  func.func @transform_5(%arg0: i32) -> (i32, i32) {
    %c0_i32 = arith.constant 0 : i32
    %c0_i32_0 = arith.constant 0 : i32
    %c0_i32_1 = arith.constant 0 : i32
    return %c0_i32, %c0_i32_0 : i32, i32
  }
  func.func @transform_6(%arg0: i32) -> (i32, i32) {
    %c0_i32 = arith.constant 0 : i32
    %c0_i32_0 = arith.constant 0 : i32
    %c0_i32_1 = arith.constant 0 : i32
    return %c0_i32, %c0_i32_0 : i32, i32
  }
  func.func @transform_7(%arg0: i32) -> (i32, i32) {
    %c0_i32 = arith.constant 0 : i32
    %c0_i32_0 = arith.constant 0 : i32
    %c0_i32_1 = arith.constant 0 : i32
    return %c0_i32, %c0_i32_0 : i32, i32
  }
  func.func @transform_8(%arg0: i32) -> (i32, i32) {
    %c0_i32 = arith.constant 0 : i32
    %c0_i32_0 = arith.constant 0 : i32
    %c0_i32_1 = arith.constant 0 : i32
    return %c0_i32, %c0_i32_0 : i32, i32
  }
  func.func @transform_9(%arg0: i32) -> (i32, i32) {
    %c0_i32 = arith.constant 0 : i32
    %c0_i32_0 = arith.constant 0 : i32
    %c0_i32_1 = arith.constant 0 : i32
    return %c0_i32, %c0_i32_0 : i32, i32
  }
  func.func @transform_10(%arg0: i32) -> (i32, i32) {
    %c0_i32 = arith.constant 0 : i32
    %c0_i32_0 = arith.constant 0 : i32
    %c0_i32_1 = arith.constant 0 : i32
    return %c0_i32, %c0_i32_0 : i32, i32
  }
  func.func @transform_11(%arg0: i32) -> (i32, i32) {
    %c0_i32 = arith.constant 0 : i32
    %c0_i32_0 = arith.constant 0 : i32
    %c0_i32_1 = arith.constant 0 : i32
    return %c0_i32, %c0_i32_0 : i32, i32
  }
  func.func @transform_12(%arg0: i32) -> (i32, i32, i32) {
    %c0_i32 = arith.constant 0 : i32
    %c0_i32_0 = arith.constant 0 : i32
    %c0_i32_1 = arith.constant 0 : i32
    %c0_i32_2 = arith.constant 0 : i32
    return %c0_i32, %c0_i32_0, %c0_i32_1 : i32, i32, i32
  }
  func.func @transform_13(%arg0: i32) -> (i32, i32, i32) {
    %c0_i32 = arith.constant 0 : i32
    %c0_i32_0 = arith.constant 0 : i32
    %c0_i32_1 = arith.constant 0 : i32
    %c0_i32_2 = arith.constant 0 : i32
    return %c0_i32, %c0_i32_0, %c0_i32_1 : i32, i32, i32
  }
  func.func @transform_14(%arg0: i32) -> (i32, i32, i32) {
    %c0_i32 = arith.constant 0 : i32
    %c0_i32_0 = arith.constant 0 : i32
    %c0_i32_1 = arith.constant 0 : i32
    %c0_i32_2 = arith.constant 0 : i32
    return %c0_i32, %c0_i32_0, %c0_i32_1 : i32, i32, i32
  }
  func.func @transform_15(%arg0: i32) -> (i32, i32, i32) {
    %c0_i32 = arith.constant 0 : i32
    %c0_i32_0 = arith.constant 0 : i32
    %c0_i32_1 = arith.constant 0 : i32
    %c0_i32_2 = arith.constant 0 : i32
    return %c0_i32, %c0_i32_0, %c0_i32_1 : i32, i32, i32
  }
  func.func @transform_16(%arg0: i32) -> (i32, i32) {
    %c0_i32 = arith.constant 0 : i32
    %c0_i32_0 = arith.constant 0 : i32
    %c0_i32_1 = arith.constant 0 : i32
    return %c0_i32, %c0_i32_0 : i32, i32
  }
  func.func @transform_17(%arg0: i32) -> (i32, i32) {
    %c0_i32 = arith.constant 0 : i32
    %c0_i32_0 = arith.constant 0 : i32
    %c0_i32_1 = arith.constant 0 : i32
    return %c0_i32, %c0_i32_0 : i32, i32
  }
  func.func @transform_18(%arg0: i32) -> (i32, i32, i32) {
    %c0_i32 = arith.constant 0 : i32
    %c0_i32_0 = arith.constant 0 : i32
    %c0_i32_1 = arith.constant 0 : i32
    return %arg0, %c0_i32, %c0_i32_0 : i32, i32, i32
  }
}

</mosaic_0001>

<bundles_post_ra>
// kernel: gns_forward.1
= control target key start
LH: loop header
LB: loop body
LE: loop exit
PB: predicated region body
PF: predicated region fallthrough
CT: control target
= control target key end

     0   :  { %s7281_s0 = inlined_call_operand.vmem [shape: s32[2,1,128], index: 0, kind: input, shape index: {}]   ;;  %s7282_s1 = inlined_call_operand.vmem [shape: bf16[2,128,128], index: 1, kind: input, shape index: {}]   ;;  %s7283_s2 = inlined_call_operand.vmem [shape: bf16[2,128,128], index: 2, kind: input, shape index: {}]   ;;  %s7284_s3 = inlined_call_operand.vmem [shape: f32[2,1,128], index: 3, kind: input, shape index: {}]   ;;  %s7285_s4 = inlined_call_operand.vmem [shape: f32[2,1,128], index: 4, kind: input, shape index: {}]   ;;  %s7286_s5 = inlined_call_operand.vmem [shape: f32[128,128], index: 5, kind: input, shape index: {}]   ;;  %s7287_s6 = inlined_call_operand.vmem [shape: f32[32,2], index: 6, kind: input, shape index: {}]   ;;  %s7288_s7 = inlined_call_operand.vmem [shape: f32[32,1], index: 7, kind: input, shape index: {}]   ;;  %s7289_s8 = inlined_call_operand.vmem [shape: f32[32,2], index: 8, kind: input, shape index: {}]   ;;  %s7290_s9 = inlined_call_operand.vmem [shape: f32[32,1], index: 9, kind: input, shape index: {}]   ;;  %s7291_s10 = inlined_call_operand.vmem [shape: f32[32,2], index: 10, kind: input, shape index: {}]   ;;  %s7292_s11 = inlined_call_operand.vmem [shape: f32[32,1], index: 11, kind: input, shape index: {}]   ;;  %s7293_s12 = inlined_call_operand.vmem [shape: f32[4,32,32], index: 12, kind: input, shape index: {}]   ;;  %s7294_s13 = inlined_call_operand.vmem [shape: f32[4,32,1], index: 13, kind: input, shape index: {}]   ;;  %s7295_s14 = inlined_call_operand.vmem [shape: f32[4,32,1], index: 14, kind: input, shape index: {}]   ;;  %s7296_s15 = inlined_call_operand.vmem [shape: f32[4,32,1], index: 15, kind: input, shape index: {}]   ;;  %s7297_s16 = inlined_call_operand.vmem [shape: f32[2,32], index: 16, kind: input, shape index: {}]   ;;  %s7298_s17 = inlined_call_operand.vmem [shape: f32[2,1], index: 17, kind: input, shape index: {}]   ;;  %s7299_s18 = inlined_call_operand.hbm [shape: f32[2,2,128], index: 18, kind: output, shape index: {}]  }
   0x1   :  { %7469 = sst [smem:[#allocation51_spill]] %s7281_s0 }
   0x2   :  { %7470 = sst [smem:[#allocation52_spill]] %s7282_s1 }
   0x3   :  { %7471 = sst [smem:[#allocation53_spill]] %s7283_s2 }
   0x4   :  { %7472 = sst [smem:[#allocation54_spill]] %s7287_s6 }
   0x5   :  { %23 = vsyncpa [#allocation3], 0 }
   0x6   :  { %25 = vsyncpa [#allocation3 + $0x1], 0  ;;  %s5176_s27 = smov 0   ;;  %s5178_s28 = smov 0  }
   0x7   :  { %s5180_s29 = smov 0   ;;  %s5182_s30 = smov 0  }
   0x8 LB: > { %7473 = sst [smem:[#allocation5_spill]] %s5062_s29  ;;  %s5197_s0 = sadd.s32 4294967295, %s5066_s30   ;;  %s5066_s30 = sphi %s5182_s30, %s7739_s30   ;;  %s5062_s29 = sphi %s5180_s29, %s7741_s29   ;;  %s5058_s28 = sphi %s5178_s28, %s7743_s28   ;;  %s5054_s27 = sphi %s5176_s27, %s7742_s27  }
   0x9   : > { %s4019_s19 = sadd.s32 4294967294, %s5066_s30   ;;  %s5201_s1 = sadd.s32 1, %s5066_s30  }
   0xa   : > { %7474 = sst [smem:[#allocation6_spill]] %s5201_s1  ;;  %s441_s20 = sadd.s32 1, %s5062_s29 }
   0xb   : > { %s438_s21 = ssub.s32 %s5066_s30, %s5201_s1  ;;  %p451_p0 = scmp.ne.s32.totalorder %s5062_s29, %s5058_s28 }
   0xc   : > { %p439_p1 = scmp.eq.s32.totalorder %s438_s21, 0  ;;  %p452_p2 = scmp.eq.s32.totalorder %s5197_s0, 1 }
   0xd   : > { %p457_p3 = scmp.ne.s32.totalorder %s5058_s28, %s5054_s27  ;;  %p458_p4 = scmp.eq.s32.totalorder %s4019_s19, 1 }
   0xe   : > { %s5212_s22 = scalar_select %p439_p1, %s5062_s29, %s441_s20  }
   0xf   : > { %p5214_p5 = por %p452_p2, %p451_p0  ;;  %p5218_p6 = por %p458_p4, %p457_p3 }
  0x10   : > { %7475 = sst [smem:[#allocation7_spill]] %s5212_s22  ;;  %p4022_p7 = scmp.ge.s32.totalorder %s5066_s30, 1 }
  0x11   : > { %s7477_s23 = scalar_select %p5218_p6, 1, 0 }
  0x12   : > { %p549_p8 = scmp.lt.s32.totalorder %s5066_s30, 3 }
  0x13   : > { %7478 = sst [smem:[#allocation8_spill]] %s7477_s23 }
  0x14   : > { %p550_p9 = pnand %p4022_p7, %p549_p8 }
  0x16   : > { %553 = sbr.rel (%p550_p9) target bundleno = 3180 (0xc6c), region = 92 }
  0x1b   : > { %v695_v0 = vld [vmem:[%s7291_s10 + $0x8] sm:$0xff]  ;;  %v5230_v1 = vld [vmem:[%s7289_s8] sm:$0xff]  ;;  %p617_p10 = scmp.lt.s32.totalorder %s5197_s0, 1  ;;  %v5068_v2 = vmov 1   ;;  %s7479_s6 = sld [smem:[#allocation54_spill]]  ;;  %v7310_v5 = vmov 0.0   ;;  %v699_v39 = vlaneseq }
  0x1c   : > { %4892 = vset.pattern.permute.xlu0 %v5068_v2  ;;  %4889 = vset.pattern.permute.xlu1 %v5068_v2  ;;  %v5242_v3 = vld [vmem:[%s7291_s10] sm:$0xff]  ;;  %vm7305_vm0 = vmmov 0   ;;  %s7480_s22 = sld [smem:[#allocation53_spill]]  ;;  %v5284_v10 = vld [vmem:[%s7291_s10 + $0x18] sm:$0xff]  ;;  %v7312_v17 = vmov 0   ;;  %v691_v25 = vld [vmem:[%s7289_s8 + $0x8] sm:$0xff] }
  0x1d   : > { %799 = vperm.xlu0 %4892, %v695_v0   ;;  %779 = vperm.xlu1 %4889, %v5230_v1   ;;  %s5237_s20 = scalar_select %p617_p10, %s5197_s0, 1  ;;  %v5426_v47 = vshrl.u32 %v699_v39, 7  ;;  %v692_v49 = vld [vmem:[%s7289_s8 + $0x10] sm:$0xff]  ;;  %v5072_v57 = vmov 1.0   ;;  %vm7304_vm2 = vcmask 1040384   ;;  %v838_v39 = vld [vmem:[%s7290_s9] sm:$0xff] }
  0x1e   : > { %4434 = vmatprep.subr.bf16.mxu1 %v7310_v5  ;;  %4414 = vmatprep.subr.bf16.mxu0 %v7310_v5  ;;  %s7481_s1 = sld [smem:[#allocation52_spill]]  ;;  %v696_v63 = vld [vmem:[%s7291_s10 + $0x10] sm:$0xff] }
  0x1f   : > { %s4208_s19 = sshll.u32 %s5237_s20, 6  ;;  %4450 = vmatprep.mubr.msk.bf16.mxu1 %vm7305_vm0, %v7310_v5  ;;  %4430 = vmatprep.mubr.msk.bf16.mxu0 %vm7305_vm0, %v7310_v5  ;;  %s7490_s21 = sld [smem:[#allocation51_spill]]  ;;  %v5458_v55 = vsub.s32 0, %v5426_v47 }
  0x21   : > { %v5247_v4 = vld [vmem:[%s7479_s6 + $0x8] sm:$0xff]  ;;  %795 = vperm.xlu1 %4889, %v5242_v3   ;;  %v5319_v20 = vld [vmem:[%s7479_s6 + $0x18] sm:$0xff]  ;;  %v686_v32 = vld [vmem:[%s7479_s6] sm:$0xff] }
  0x22   : > { %s5259_s29 = scalar_lea.vmem %s7480_s22, %s4208_s19  ;;  %819 = vperm.xlu0 %4892, %v5247_v4  }
  0x23   : > { %v5269_v6 = vld [vmem:[%s5259_s29 + $0x38] sm:$0xf]  ;;  %v5272_v7 = vld [vmem:[%s5259_s29 + $0x3c] sm:$0xf]  ;;  %v5294_v13 = vld [vmem:[%s5259_s29 + $0x30] sm:$0xf] }
  0x24   : > { %s5264_s23 = scalar_lea.vmem %s7481_s1, %s4208_s19  ;;  %v5279_v9 = vcombine.low %v5269_v6, %v5272_v7  ;;  %v5297_v14 = vld [vmem:[%s5259_s29 + $0x34] sm:$0xf]  ;;  %v5313_v19 = vld [vmem:[%s5259_s29 + $0x28] sm:$0xf]  ;;  %v5326_v22 = vld [vmem:[%s5259_s29 + $0x2c] sm:$0xf] }
  0x25   : > { %v5275_v8 = vld [vmem:[%s5264_s23 + $0x38] sm:$0xf]  ;;  %v5287_v11 = vld [vmem:[%s5264_s23 + $0x3c] sm:$0xf]  ;;  %v5302_v15 = vcombine.low %v5294_v13, %v5297_v14  ;;  %v5305_v16 = vld [vmem:[%s5264_s23 + $0x30] sm:$0xf]  ;;  %4890 = vset.pattern.permute.xlu1 %v7312_v17  ;;  %v5342_v26 = vcombine.low %v5313_v19, %v5326_v22  ;;  %s619_s24 = scalar_lea.vmem %s7490_s21, %s5237_s20  ;;  %s6064_s21 = scalar_lea.vmem %s7284_s3, %s5237_s20 }
  0x26   : > { %7482 = vst [vmem:[#allocation9_spill] sm:$0xff] %v5279_v9  ;;  %v5291_v12 = vcombine.low %v5275_v8, %v5287_v11  ;;  %4435 = vmatpush3.bf16.msra.mxu1 %v5279_v9  ;;  %807 = vperm.xlu0 %4892, %v5284_v10   ;;  %v5310_v18 = vld [vmem:[%s5264_s23 + $0x34] sm:$0xf]  ;;  %v5331_v23 = vld [vmem:[%s5264_s23 + $0x28] sm:$0xf]  ;;  %vm987_vm3 = vcmp.ne.bf16.partialorder %v5272_v7, 0 }
  0x27   : > { %7484 = vst [vmem:[#allocation11_spill] sm:$0xff] %v5302_v15  ;;  %731 = vperm.xlu1 %4890, %v695_v0   ;;  %v5323_v21 = vcombine.low %v5305_v16, %v5310_v18  ;;  %4436 = vmatprep.subr.bf16.mxu1 %v7310_v5  ;;  %v5334_v24 = vld [vmem:[%s5264_s23 + $0x2c] sm:$0xf]  ;;  %7486 = vst [vmem:[#allocation13_spill] sm:$0xff] %v5342_v26  ;;  %v5347_v27 = vld [vmem:[%s5259_s29 + $0x20] sm:$0xf] }
  0x28   : > { %7483 = vst [vmem:[#allocation10_spill] sm:$0xff] %v5291_v12  ;;  %4415 = vmatpush3.bf16.msra.mxu0 %v5291_v12  ;;  %v5350_v28 = vld [vmem:[%s5259_s29 + $0x24] sm:$0xf]  ;;  %v5356_v29 = vcombine.low %v5331_v23, %v5334_v24  ;;  %v5360_v30 = vld [vmem:[%s5264_s23 + $0x20] sm:$0xf]  ;;  %vm971_vm4 = vcmp.ne.bf16.partialorder %v5287_v11, 0 }
  0x29   : > { %7485 = vst [vmem:[#allocation12_spill] sm:$0xff] %v5323_v21  ;;  %4416 = vmatprep.subr.bf16.mxu0 %v7310_v5  ;;  %v5363_v31 = vld [vmem:[%s5264_s23 + $0x24] sm:$0xf]  ;;  %v5371_v33 = vcombine.low %v5347_v27, %v5350_v28  ;;  %v5376_v34 = vld [vmem:[%s5259_s29 + $0x18] sm:$0xf]  ;;  %vm986_vm5 = vcmp.ne.bf16.partialorder %v5269_v6, 0  ;;  %vm1003_vm7 = vmor %vm971_vm4, %vm987_vm3 }
  0x2a   : > { %4437 = vmatpush3.bf16.msra.mxu1 %v5302_v15  ;;  %827 = vperm.xlu0 %4892, %v5319_v20   ;;  %7487 = vst [vmem:[#allocation14_spill] sm:$0xff] %v5356_v29  ;;  %v5379_v35 = vld [vmem:[%s5259_s29 + $0x1c] sm:$0xf]  ;;  %v5385_v36 = vcombine.low %v5360_v30, %v5363_v31  ;;  %v5389_v37 = vld [vmem:[%s5264_s23 + $0x18] sm:$0xf]  ;;  %vm970_vm6 = vcmp.ne.bf16.partialorder %v5275_v8, 0 }
  0x2b   : > { %4438 = vmatprep.subr.bf16.mxu1 %v7310_v5  ;;  %4891 = vset.pattern.permute.xlu1 %v5068_v2  ;;  %7488 = vst [vmem:[#allocation15_spill] sm:$0xff] %v5371_v33  ;;  %v5392_v38 = vld [vmem:[%s5264_s23 + $0x1c] sm:$0xf]  ;;  %v5401_v40 = vcombine.low %v5376_v34, %v5379_v35  ;;  %v5405_v41 = vld [vmem:[%s5259_s29 + $0x10] sm:$0xf]  ;;  %vm985_vm8 = vcmp.ne.bf16.partialorder %v5297_v14, 0  ;;  %vm1002_vm10 = vmor %vm970_vm6, %vm986_vm5 }
  0x2c   : > { %4417 = vmatpush3.bf16.msra.mxu0 %v5323_v21  ;;  %783 = vperm.xlu1 %4891, %v691_v25   ;;  %7489 = vst [vmem:[#allocation16_spill] sm:$0xff] %v5385_v36  ;;  %v5408_v42 = vld [vmem:[%s5259_s29 + $0x14] sm:$0xf]  ;;  %v5414_v43 = vcombine.low %v5389_v37, %v5392_v38  ;;  %v5416_v44 = vld [vmem:[%s619_s24] sm:$0x1]  ;;  %vm969_vm9 = vcmp.ne.bf16.partialorder %v5310_v18, 0 }
  0x2d   : > { %4418 = vmatprep.subr.bf16.mxu0 %v7310_v5  ;;  %7491 = vst [vmem:[#allocation17_spill] sm:$0xff] %v5401_v40  ;;  %v5421_v45 = vld [vmem:[%s5264_s23 + $0x10] sm:$0xf]  ;;  %v5424_v46 = vld [vmem:[%s5264_s23 + $0x14] sm:$0xf]  ;;  %v5432_v48 = vcombine.low %v5405_v41, %v5408_v42  ;;  %vm7307_vm1 = vcmp.eq.s32.totalorder %v5416_v44, 1  ;;  %vm1001_vm13 = vmor %vm969_vm9, %vm985_vm8 }
  0x2e   : > { %4439 = vmatpush3.bf16.msra.mxu1 %v5342_v26  ;;  %4898 = vset.pattern.permute.xlu0 %v7312_v17  ;;  %7492 = vst [vmem:[#allocation18_spill] sm:$0xff] %v5414_v43  ;;  %v5439_v50 = vld [vmem:[%s5259_s29 + $0x8] sm:$0xf]  ;;  %v5442_v51 = vld [vmem:[%s5259_s29 + $0xc] sm:$0xf]  ;;  %v5448_v52 = vcombine.low %v5421_v45, %v5424_v46  ;;  %v1035_v6 = vsel %vm1003_vm7, 65537, %v7312_v17 }
  0x2f   : > { %4440 = vmatprep.subr.bf16.mxu1 %v7310_v5  ;;  %706 = vperm.xlu0 %4898, %v5230_v1   ;;  %7493 = vst [vmem:[#allocation19_spill] sm:$0xff] %v5432_v48  ;;  %v5452_v53 = vld [vmem:[%s5264_s23 + $0x8] sm:$0xf]  ;;  %v5455_v54 = vld [vmem:[%s5264_s23 + $0xc] sm:$0xf]  ;;  %v5463_v56 = vcombine.low %v5439_v50, %v5442_v51  ;;  %vm984_vm11 = vcmp.ne.bf16.partialorder %v5294_v13, 0  ;;  %v1051_v11 = vunpack.c.l.b16 %v1035_v6 }
  0x30   : > { %4419 = vmatpush3.bf16.msra.mxu0 %v5356_v29  ;;  %815 = vperm.xlu1 %4891, %v686_v32   ;;  %7494 = vst [vmem:[#allocation20_spill] sm:$0xff] %v5448_v52  ;;  %v5467_v58 = vsel %vm7307_vm1, 1.06, %v5072_v57  ;;  %v5471_v59 = vld [vmem:[%s5259_s29] sm:$0xf]  ;;  %v5482_v62 = vcombine.low %v5452_v53, %v5455_v54  ;;  %vm968_vm12 = vcmp.ne.bf16.partialorder %v5305_v16, 0 }
  0x31   : > { %4420 = vmatprep.subr.bf16.mxu0 %v7310_v5  ;;  %7495 = vst [vmem:[#allocation21_spill] sm:$0xff] %v5463_v56  ;;  %v5474_v60 = vld [vmem:[%s5259_s29 + $0x4] sm:$0xf]  ;;  %v5477_v61 = vmul.f32 0.0, %v5467_v58  ;;  %v5489_v0 = vld [vmem:[%s5264_s23] sm:$0xf]  ;;  %vm1000_vm3 = vmor %vm968_vm12, %vm984_vm11 }
  0x32   : > { %4441 = vmatpush3.bf16.msra.mxu1 %v5371_v33  ;;  %7496 = vst [vmem:[#allocation22_spill] sm:$0xff] %v5482_v62  ;;  %v5492_v1 = vld [vmem:[%s5264_s23 + $0x4] sm:$0xf]  ;;  %v688_v7 = vld [vmem:[%s7479_s6 + $0x10] sm:$0xff]  ;;  %v1034_v8 = vsel %vm1002_vm10, 65537, %v7312_v17  ;;  %vm983_vm14 = vcmp.ne.bf16.partialorder %v5326_v22, 0  ;;  %s6055_s23 = scalar_lea.vmem %s7285_s4, %s5237_s20 }
  0x33   : > { %4442 = vmatprep.subr.bf16.mxu1 %v7310_v5  ;;  %726 = vperm.xlu0 %4898, %v5242_v3   ;;  %v1112_v3 = vrot.slane %v5477_v61, %v5458_v55  ;;  %vm967_vm15 = vcmp.ne.bf16.partialorder %v5334_v24, 0  ;;  %v1033_v13 = vsel %vm1001_vm13, 65537, %v7312_v17  ;;  %vm982_vm4 = vcmp.ne.bf16.partialorder %v5313_v19, 0  ;;  %v843_v14 = vld [vmem:[%s7292_s11 + $0x8] sm:$0xff]  ;;  %v844_v19 = vld [vmem:[%s7292_s11 + $0x10] sm:$0xff]  ;;  %v4202_v29 = vld [vmem:[%s7296_s15 + $0x78] sm:$0xff] }
  0x34   : > { %4421 = vmatpush3.bf16.msra.mxu0 %v5385_v36  ;;  %4893 = vset.pattern.permute.xlu1 %v7312_v17  ;;  %vm966_vm5 = vcmp.ne.bf16.partialorder %v5331_v23, 0  ;;  %v1050_v16 = vunpack.c.l.b16 %v1034_v8  ;;  %vm999_vm6 = vmor %vm967_vm15, %vm983_vm14  ;;  %v1032_v18 = vsel %vm1000_vm3, 65537, %v7312_v17  ;;  %vm5546_vm7 = vcmp.ne.s32.totalorder %v1051_v11, 0  ;;  %v5606_v6 = vld [vmem:[%s7286_s5 + $0x68] sm:$0xff]  ;;  %v5635_v11 = vld [vmem:[%s7286_s5 + $0x60] sm:$0xff]  ;;  %s4205_s24 = sshll.u32 %s5197_s0, 5 }
  0x35   : > { %4422 = vmatprep.subr.bf16.mxu0 %v7310_v5  ;;  %761 = vperm.xlu1 %4893, %v5247_v4   ;;  %v5500_v4 = vcombine.low %v5471_v59, %v5474_v60  ;;  %v7499_v22 = vmov 0  ;;  %v1049_v24 = vunpack.c.l.b16 %v1033_v13  ;;  %vm998_vm8 = vmor %vm966_vm5, %vm982_vm4  ;;  %vm981_vm9 = vcmp.ne.bf16.partialorder %v5350_v28, 0  ;;  %7513 = vst [vmem:[#allocation31_spill] sm:$0xff] %v5606_v6  ;;  %s7245_s22 = scalar_lea.hbm %s7299_s18, %s4205_s24  ;;  %s5080_s0 = smov [#allocation2]  }
  0x36   : > { %4443 = vmatpush3.bf16.msra.mxu1 %v5401_v40  ;;  %v7500_v22 = vsel %vm5546_vm7, 4294967295, %v7499_v22  ;;  %vm965_vm10 = vcmp.ne.bf16.partialorder %v5363_v31, 0  ;;  %vm5557_vm11 = vcmp.ne.s32.totalorder %v1050_v16, 0  ;;  %v7502_v23 = vmov 0  ;;  %7519 = vst [vmem:[#allocation33_spill] sm:$0xff] %v5635_v11  ;;  %v5658_v16 = vld [vmem:[%s7286_s5 + $0x58] sm:$0xff] }
  0x37   : > { %4444 = vmatprep.subr.bf16.mxu1 %v7310_v5  ;;  %711 = vperm.xlu0 %4898, %v691_v25   ;;  %7497 = vst [vmem:[#allocation23_spill] sm:$0xff] %v5500_v4  ;;  %v1115_v25 = vsel %vm7304_vm2, %v5467_v58, %v1112_v3  ;;  %v842_v3 = vld [vmem:[%s7292_s11] sm:$0xff]  ;;  %7501 = vst [vmem:[#allocation25_spill] sm:$0xff] %v7500_v22  ;;  %v7503_v23 = vsel %vm5557_vm11, 4294967295, %v7502_v23  ;;  %vm980_vm12 = vcmp.ne.bf16.partialorder %v5347_v27, 0  ;;  %vm964_vm13 = vcmp.ne.bf16.partialorder %v5360_v30, 0 }
  0x38   : > { %4423 = vmatpush3.bf16.msra.mxu0 %v5414_v43  ;;  %v1116_v57 = vpack.c.bf16 %v1115_v25, %v1115_v25  ;;  %7504 = vst [vmem:[#allocation26_spill] sm:$0xff] %v7503_v23  ;;  %v1030_v25 = vsel %vm998_vm8, 65537, %v7312_v17  ;;  %vm5572_vm14 = vcmp.ne.s32.totalorder %v1049_v24, 0  ;;  %v7506_v28 = vmov 0  ;;  %vm997_vm15 = vmor %vm965_vm10, %vm981_vm9  ;;  %v839_v27 = vld [vmem:[%s7290_s9 + $0x8] sm:$0xff]  ;;  %v5681_v24 = vld [vmem:[%s7286_s5 + $0x50] sm:$0xff] }
  0x39   : > { %4424 = vmatprep.subr.bf16.mxu0 %v7310_v5  ;;  %716 = vperm.xlu1 %4893, %v692_v49   ;;  %v7507_v28 = vsel %vm5572_vm14, 4294967295, %v7506_v28  ;;  %vm979_vm3 = vcmp.ne.bf16.partialorder %v5379_v35, 0  ;;  %vm963_vm4 = vcmp.ne.bf16.partialorder %v5392_v38, 0  ;;  %vm978_vm8 = vcmp.ne.bf16.partialorder %v5376_v34, 0  ;;  %v1423_v35 = vld [vmem:[%s7294_s13 + $0x18] sm:$0xff]  ;;  %7523 = vst [vmem:[#allocation35_spill] sm:$0xff] %v5658_v16 }
  0x3a   : > { %4445 = vmatpush3.bf16.msra.mxu1 %v5432_v48  ;;  %7508 = vst [vmem:[#allocation28_spill] sm:$0xff] %v7507_v28  ;;  %vm962_vm9 = vcmp.ne.bf16.partialorder %v5389_v37, 0  ;;  %v7514_v30 = vmov 0  ;;  %v7520_v38 = vmov 0  ;;  %vm960_vm2 = vcmp.ne.bf16.partialorder %v5421_v45, 0  ;;  %v834_v34 = vld [vmem:[%s7288_s7] sm:$0xff] }
  0x3b   : > { %4446 = vmatprep.subr.bf16.mxu1 %v7310_v5  ;;  %756 = vperm.xlu0 %4898, %v686_v32   ;;  %v5508_v32 = vcombine.low %v5489_v0, %v5492_v1  ;;  %7524 = vst [vmem:[#allocation36_spill] sm:$0xff] %v5681_v24  ;;  %vm958_vm0 = vcmp.ne.bf16.partialorder %v5452_v53, 0  ;;  %v5721_v45 = vld [vmem:[%s7286_s5 + $0x48] sm:$0xff]  ;;  %v1554_v53 = vld [vmem:[%s7295_s14 + $0x10] sm:$0xff]  ;;  %v4187_v43 = vld [vmem:[%s7294_s13 + $0x60] sm:$0xff]  ;;  %s5010_s6 = sshll.u32 %s5080_s0, 4  ;;  %s5011_s6 = int_to_ptr.vmem [resolvable:$false] %s5010_s6 }
  0x3c   : > { %4425 = vmatpush3.bf16.msra.mxu0 %v5448_v52  ;;  %7532 = vst [vmem:[#allocation40_spill] sm:$0xff] %v5721_v45  ;;  %v4155_v22 = vld [vmem:[%s7296_s15 + $0x48] sm:$0xff]  ;;  %v4197_v28 = vld [vmem:[%s7295_s14 + $0x70] sm:$0xff] }
  0x3d   : > { %4426 = vmatprep.subr.bf16.mxu0 %v7310_v5  ;;  %4894 = vset.pattern.permute.xlu1 %v5068_v2  ;;  %7498 = vst [vmem:[#allocation24_spill] sm:$0xff] %v5508_v32 }
  0x3e   : > { %4447 = vmatpush3.bf16.msra.mxu1 %v5463_v56  ;;  %787 = vperm.xlu1 %4894, %v692_v49   ;;  %v693_v49 = vld [vmem:[%s7289_s8 + $0x18] sm:$0xff] }
  0x3f   : > { %4448 = vmatprep.subr.bf16.mxu1 %v7310_v5  ;;  %736 = vperm.xlu0 %4898, %v696_v63  }
  0x40   : > { %4427 = vmatpush3.bf16.msra.mxu0 %v5482_v62  ;;  %v4188_v62 = vld [vmem:[%s7294_s13 + $0x68] sm:$0xff] }
  0x41   : > { %4428 = vmatprep.subr.bf16.mxu0 %v7310_v5 }
  0x42   : > { %4449 = vmatpush3.bf16.msra.mxu1 %v5500_v4  ;;  %803 = vperm.xlu1 %4894, %v696_v63   ;;  %v1048_v63 = vunpack.c.l.b16 %v1032_v18 }
  0x43   : > { %848 = vperm.xlu0 %4898, %v838_v39   ;;  %v5582_v39 = vld [vmem:[%s7286_s5 + $0x70] sm:$0xff] }
  0x44   : > { %4429 = vmatpush3.bf16.msra.mxu0 %v5508_v32  ;;  %7509 = vst [vmem:[#allocation29_spill] sm:$0xff] %v5582_v39  ;;  %vm5592_vm5 = vcmp.ne.s32.totalorder %v1048_v63, 0 }
  0x45   : > { %4451 = vmatmul.mubr.bf16.vlgmr.msra.gmra.mxu1 %v1116_v57 }
  0x46   : > { %4895 = vset.pattern.permute.xlu1 %v7312_v17 }
  0x47   : > { %4431 = vmatmul.mubr.bf16.vlgmr.msra.gmra.mxu0 %v1116_v57  ;;  %721 = vperm.xlu0 %4898, %v693_v49   ;;  %v836_v57 = vld [vmem:[%s7288_s7 + $0x10] sm:$0xff] }
  0x48   : > { %868 = vperm.xlu1 %4895, %v842_v3   ;;  %v1046_v3 = vunpack.c.l.b16 %v1030_v25 }
  0x4b   : > { %766 = vperm.xlu0 %4898, %v688_v7  }
  0x4c   : > { %741 = vperm.xlu1 %4895, %v5284_v10   ;;  %v1031_v10 = vsel %vm999_vm6, 65537, %v7312_v17  ;;  %vm996_vm6 = vmor %vm964_vm13, %vm980_vm12  ;;  %vm977_vm13 = vcmp.ne.bf16.partialorder %v5408_v42, 0  ;;  %v1555_v42 = vld [vmem:[%s7295_s14 + $0x18] sm:$0xff] }
  0x4d   : > { %v1047_v31 = vunpack.c.l.b16 %v1031_v10  ;;  %vm5625_vm12 = vmor %vm963_vm4, %vm979_vm3  ;;  %v1028_v13 = vsel %vm996_vm6, 65537, %v7312_v17  ;;  %vm5647_vm3 = vcmp.ne.s32.totalorder %v1046_v3, 0  ;;  %vm976_vm6 = vcmp.ne.bf16.partialorder %v5405_v41, 0  ;;  %v5716_v41 = vld [vmem:[%s7286_s5 + $0x40] sm:$0xff]  ;;  %v5742_v3 = vld [vmem:[%s7286_s5 + $0x38] sm:$0xff] }
  0x4e   : > { %v7521_v38 = vsel %vm5647_vm3, 4294967295, %v7520_v38  ;;  %vm994_vm4 = vmor %vm962_vm9, %vm978_vm8  ;;  %v1027_v18 = vsel %vm5625_vm12, 65537, %v7312_v17  ;;  %v1044_v37 = vunpack.c.l.b16 %v1028_v13  ;;  %vm975_vm9 = vcmp.ne.bf16.partialorder %v5442_v51, 0  ;;  %7531 = vst [vmem:[#allocation39_spill] sm:$0xff] %v5716_v41  ;;  %v1553_v13 = vld [vmem:[%s7295_s14 + $0x8] sm:$0xff] }
  0x4f   : > { %873 = vperm.xlu0 %4898, %v843_v14   ;;  %vm5617_vm10 = vcmp.ne.s32.totalorder %v1047_v31, 0  ;;  %7522 = vst [vmem:[#allocation34_spill] sm:$0xff] %v7521_v38  ;;  %v1026_v10 = vsel %vm994_vm4, 65537, %v7312_v17  ;;  %vm959_vm12 = vcmp.ne.bf16.partialorder %v5455_v54, 0  ;;  %vm974_vm4 = vcmp.ne.bf16.partialorder %v5439_v50, 0  ;;  %v835_v50 = vld [vmem:[%s7288_s7 + $0x8] sm:$0xff] }
  0x50   : > { %4896 = vset.pattern.permute.xlu1 %v5068_v2  ;;  %v5564_v2 = vld [vmem:[%s7286_s5 + $0x78] sm:$0xff]  ;;  %v7515_v30 = vsel %vm5617_vm10, 4294967295, %v7514_v30  ;;  %vm5709_vm1 = vcmp.ne.s32.totalorder %v1044_v37, 0  ;;  %v7528_v54 = vmov 0  ;;  %v1042_v63 = vunpack.c.l.b16 %v1026_v10  ;;  %v5807_v37 = vld [vmem:[%s7286_s5 + $0x20] sm:$0xff] }
  0x51   : > { %791 = vperm.xlu1 %4896, %v693_v49   ;;  %7505 = vst [vmem:[#allocation27_spill] sm:$0xff] %v5564_v2  ;;  %4454 = vmatprep.subr.msk.mxu0 %vm5546_vm7, %v5564_v2  ;;  %v7510_v49 = vmov 0  ;;  %7516 = vst [vmem:[#allocation32_spill] sm:$0xff] %v7515_v30  ;;  %v7529_v54 = vsel %vm5709_vm1, 4294967295, %v7528_v54  ;;  %v7533_v31 = vmov 0 }
  0x52   : > { %4455 = vmatpush3.msk.msra.mxu0 %vm5546_vm7, %v5564_v2  ;;  %v7511_v49 = vsel %vm5592_vm5, 4294967295, %v7510_v49  ;;  %7530 = vst [vmem:[#allocation38_spill] sm:$0xff] %v7529_v54  ;;  %vm991_vm7 = vmor %vm959_vm12, %vm975_vm9  ;;  %vm972_vm12 = vcmp.ne.bf16.partialorder %v5471_v59, 0  ;;  %v7541_v59 = vmov 0  ;;  %v6080_v30 = vld [vmem:[%s6064_s21] sm:$0x1] }
  0x53   : > { %878 = vperm.xlu0 %4898, %v844_v19   ;;  %4456 = vmatprep.subr.msk.mxu0 %vm5557_vm11, %v5582_v39  ;;  %7512 = vst [vmem:[#allocation30_spill] sm:$0xff] %v7511_v49  ;;  %v1043_v19 = vunpack.c.l.b16 %v1027_v18  ;;  %vm990_vm9 = vmor %vm958_vm0, %vm974_vm4  ;;  %vm5756_vm0 = vcmp.ne.s32.totalorder %v1042_v63, 0  ;;  %v840_v18 = vld [vmem:[%s7290_s9 + $0x10] sm:$0xff]  ;;  %v5826_v63 = vld [vmem:[%s7286_s5 + $0x18] sm:$0xff] }
  0x54   : > { %4457 = vmatpush3.msk.msra.mxu0 %vm5557_vm11, %v5582_v39  ;;  %v1022_v8 = vsel %vm990_vm9, 65537, %v7312_v17  ;;  %v4198_v39 = vld [vmem:[%s7295_s14 + $0x78] sm:$0xff]  ;;  %v6072_v49 = vld [vmem:[%s6055_s23] sm:$0x1]  ;;  %vm7362_vm11 = vcmp.eq.s32.totalorder %v5416_v44, 3  ;;  %7559 = vst [vmem:[#allocation49_spill] sm:$0xff] %v6080_v30 }
  0x55   : > { %823 = vperm.xlu1 %4896, %v688_v7   ;;  %v1029_v7 = vsel %vm997_vm15, 65537, %v7312_v17  ;;  %4458 = vmatprep.subr.msk.mxu0 %vm5572_vm14, %v5606_v6  ;;  %vm961_vm15 = vcmp.ne.bf16.partialorder %v5424_v46, 0  ;;  %v7525_v46 = vmov 0  ;;  %7557 = vst [vmem:[#allocation48_spill] sm:$0xff] %v6072_v49 }
  0x56   : > { %4459 = vmatpush3.msk.msra.mxu0 %vm5572_vm14, %v5606_v6  ;;  %v1045_v14 = vunpack.c.l.b16 %v1029_v7  ;;  %vm993_vm8 = vmor %vm961_vm15, %vm977_vm13  ;;  %v1023_v7 = vsel %vm991_vm7, 65537, %v7312_v17  ;;  %vm7560_vm14 = vcmp.eq.s32.totalorder %v5416_v44, 2 }
  0x57   : > { %902 = vperm.xlu0 %4898, %v836_v57   ;;  %4460 = vmatprep.subr.msk.mxu0 %vm5592_vm5, %v5635_v11  ;;  %vm992_vm15 = vmor %vm960_vm2, %vm976_vm6  ;;  %v1025_v51 = vsel %vm993_vm8, 65537, %v7312_v17  ;;  %vm973_vm2 = vcmp.ne.bf16.partialorder %v5474_v60, 0  ;;  %vm957_vm6 = vcmp.ne.bf16.partialorder %v5492_v1, 0  ;;  %vm5732_vm8 = vcmp.ne.s32.totalorder %v1043_v19, 0 }
  0x58   : > { %4461 = vmatpush3.msk.msra.mxu0 %vm5592_vm5, %v5635_v11  ;;  %vm5695_vm13 = vcmp.ne.s32.totalorder %v1045_v14, 0  ;;  %v1024_v25 = vsel %vm992_vm15, 65537, %v7312_v17  ;;  %v7534_v31 = vsel %vm5732_vm8, 4294967295, %v7533_v31  ;;  %v1041_v57 = vunpack.c.l.b16 %v1025_v51  ;;  %vm989_vm7 = vmor %vm957_vm6, %vm973_vm2 }
  0x59   : > { %4897 = vset.pattern.permute.xlu1 %v7312_v17  ;;  %4462 = vmatprep.subr.msk.mxu0 %vm5617_vm10, %v5658_v16  ;;  %v7526_v46 = vsel %vm5695_vm13, 4294967295, %v7525_v46  ;;  %7535 = vst [vmem:[#allocation41_spill] sm:$0xff] %v7534_v31  ;;  %vm956_vm15 = vcmp.ne.bf16.partialorder %v5489_v0, 0  ;;  %v5767_v0 = vld [vmem:[%s7286_s5 + $0x30] sm:$0xff]  ;;  %v7538_v60 = vmov 0  ;;  %v1039_v1 = vunpack.c.l.b16 %v1023_v7  ;;  %vm680_vm5 = vmor %vm7560_vm14, %vm7362_vm11 }
  0x5a   : > { %853 = vperm.xlu1 %4897, %v839_v27   ;;  %4463 = vmatpush3.msk.msra.mxu0 %vm5617_vm10, %v5658_v16  ;;  %7527 = vst [vmem:[#allocation37_spill] sm:$0xff] %v7526_v46  ;;  %v1040_v27 = vunpack.c.l.b16 %v1024_v25  ;;  %vm5779_vm4 = vcmp.ne.s32.totalorder %v1041_v57, 0  ;;  %vm988_vm2 = vmor %vm956_vm15, %vm972_vm12  ;;  %v1021_v14 = vsel %vm989_vm7, 65537, %v7312_v17  ;;  %v7544_v19 = vmov 0  ;;  %v841_v25 = vld [vmem:[%s7290_s9 + $0x18] sm:$0xff]  ;;  %v5844_v7 = vld [vmem:[%s7286_s5 + $0x10] sm:$0xff] }
  0x5b   : > { %1441 = vperm.xlu0 %4898, %v1423_v35   ;;  %4464 = vmatprep.subr.msk.mxu0 %vm5647_vm3, %v5681_v24  ;;  %v7539_v60 = vsel %vm5779_vm4, 4294967295, %v7538_v60  ;;  %v5788_v35 = vld [vmem:[%s7286_s5 + $0x28] sm:$0xff]  ;;  %v1020_v10 = vsel %vm988_vm2, 65537, %v7312_v17  ;;  %vm5819_vm9 = vcmp.ne.s32.totalorder %v1039_v1, 0  ;;  %v1037_v51 = vunpack.c.l.b16 %v1021_v14  ;;  %v5880_v14 = vld [vmem:[%s7286_s5] sm:$0xff]  ;;  %v4189_v17 = vld [vmem:[%s7294_s13 + $0x70] sm:$0xff] }
  0x5c   : > { %4465 = vmatpush3.msk.msra.mxu0 %vm5647_vm3, %v5681_v24  ;;  %7540 = vst [vmem:[#allocation42_spill] sm:$0xff] %v7539_v60  ;;  %vm5800_vm6 = vcmp.ne.s32.totalorder %v1040_v27, 0  ;;  %v7545_v19 = vsel %vm5819_vm9, 4294967295, %v7544_v19  ;;  %v1036_v57 = vunpack.c.l.b16 %v1020_v10  ;;  %v7550_v27 = vmov 0  ;;  %v4099_v10 = vld [vmem:[%s7294_s13 + $0x30] sm:$0xff]  ;;  %v4196_v16 = vld [vmem:[%s7295_s14 + $0x68] sm:$0xff] }
  0x5d   : > { %4466 = vmatprep.subr.msk.mxu0 %vm5695_vm13, %v5721_v45  ;;  %v7542_v59 = vsel %vm5800_vm6, 4294967295, %v7541_v59  ;;  %7546 = vst [vmem:[#allocation44_spill] sm:$0xff] %v7545_v19  ;;  %vm5855_vm15 = vcmp.ne.s32.totalorder %v1037_v51, 0  ;;  %v7553_v1 = vmov 0  ;;  %v4098_v51 = vld [vmem:[%s7294_s13 + $0x28] sm:$0xff]  ;;  %vm7343_vm2 = vcmp.eq.s32.totalorder %v5416_v44, 2 }
  0x5e   : > { %892 = vperm.xlu1 %4897, %v834_v34   ;;  %4467 = vmatpush3.msk.msra.mxu0 %vm5695_vm13, %v5721_v45  ;;  %7543 = vst [vmem:[#allocation43_spill] sm:$0xff] %v7542_v59  ;;  %v1038_v34 = vunpack.c.l.b16 %v1022_v8  ;;  %v7551_v27 = vsel %vm5855_vm15, 4294967295, %v7550_v27  ;;  %v5862_v8 = vld [vmem:[%s7286_s5 + $0x8] sm:$0xff]  ;;  %vm5873_vm7 = vcmp.ne.s32.totalorder %v1036_v57, 0  ;;  %v4097_v57 = vld [vmem:[%s7294_s13 + $0x20] sm:$0xff]  ;;  %v681_v46 = vsel %vm680_vm5, %v6080_v30, 0.0 }
  0x5f   : > { %1573 = vperm.xlu0 %4898, %v1555_v42   ;;  %4468 = vmatprep.subr.msk.mxu0 %vm5709_vm1, %v5716_v41  ;;  %v1552_v42 = vld [vmem:[%s7295_s14] sm:$0xff]  ;;  %7552 = vst [vmem:[#allocation46_spill] sm:$0xff] %v7551_v27  ;;  %v7554_v1 = vsel %vm5873_vm7, 4294967295, %v7553_v1  ;;  %vm7563_vm5 = vcmp.eq.s32.totalorder %v5416_v44, 1  ;;  %vm7572_vm3 = vcmp.eq.s32.totalorder %v5416_v44, 3  ;;  %v7575_v45 = vmov 0.0  }
  0x60   : > { %4469 = vmatpush3.msk.msra.mxu0 %vm5709_vm1, %v5716_v41  ;;  %vm5837_vm12 = vcmp.ne.s32.totalorder %v1038_v34, 0  ;;  %7555 = vst [vmem:[#allocation47_spill] sm:$0xff] %v7554_v1  ;;  %v837_v34 = vld [vmem:[%s7288_s7 + $0x18] sm:$0xff]  ;;  %vm7566_vm10 = vmmov %vm7563_vm5 }
  0x61   : > { %4470 = vmatprep.subr.msk.mxu0 %vm5732_vm8, %v5742_v3 }
  0x62   : > { %771 = vperm.xlu1 %4897, %v5319_v20   ;;  %v7536_v20 = vmov 0  ;;  %4471 = vmatpush3.msk.msra.mxu0 %vm5732_vm8, %v5742_v3 }
  0x63   : > { %v7537_v20 = vsel %vm5756_vm0, 4294967295, %v7536_v20  ;;  %1568 = vperm.xlu0 %4898, %v1554_v53   ;;  %4472 = vmatprep.subr.msk.mxu0 %vm5756_vm0, %v5767_v0  ;;  %v7547_v53 = vmov 0 }
  0x64   : > { %4473 = vmatpush3.msk.msra.mxu0 %vm5756_vm0, %v5767_v0  ;;  %v7548_v53 = vsel %vm5837_vm12, 4294967295, %v7547_v53 }
  0x65   : > { %4474 = vmatprep.subr.msk.mxu0 %vm5779_vm4, %v5788_v35  ;;  %7549 = vst [vmem:[#allocation45_spill] sm:$0xff] %v7548_v53 }
  0x66   : > { %897 = vperm.xlu1 %4897, %v835_v50   ;;  %4475 = vmatpush3.msk.msra.mxu0 %vm5779_vm4, %v5788_v35  ;;  %v1591_v50 = vld [vmem:[%s7296_s15 + $0x8] sm:$0xff] }
  0x67   : > { %1563 = vperm.xlu0 %4898, %v1553_v13   ;;  %4476 = vmatprep.subr.msk.mxu0 %vm5800_vm6, %v5807_v37  ;;  %v845_v13 = vld [vmem:[%s7292_s11 + $0x18] sm:$0xff] }
  0x68   : > { %4477 = vmatpush3.msk.msra.mxu0 %vm5800_vm6, %v5807_v37 }
  0x69   : > { %4478 = vmatprep.subr.msk.mxu0 %vm5819_vm9, %v5826_v63 }
  0x6a   : > { %858 = vperm.xlu1 %4897, %v840_v18   ;;  %4479 = vmatpush3.msk.msra.mxu0 %vm5819_vm9, %v5826_v63  ;;  %v1627_v18 = vld [vmem:[%s7298_s17] sm:$0x3] }
  0x6b   : > { %1558 = vperm.xlu0 %4898, %v1552_v42   ;;  %4480 = vmatprep.subr.msk.mxu0 %vm5837_vm12, %v5844_v7  ;;  %v1422_v42 = vld [vmem:[%s7294_s13 + $0x10] sm:$0xff] }
  0x6c   : > { %4481 = vmatpush3.msk.msra.mxu0 %vm5837_vm12, %v5844_v7 }
  0x6d   : > { %4482 = vmatprep.subr.msk.mxu0 %vm5855_vm15, %v5862_v8 }
  0x6e   : > { %863 = vperm.xlu1 %4897, %v841_v25   ;;  %4483 = vmatpush3.msk.msra.mxu0 %vm5855_vm15, %v5862_v8  ;;  %v1421_v25 = vld [vmem:[%s7294_s13 + $0x8] sm:$0xff] }
  0x6f   : > { %1601 = vperm.xlu0 %4898, %v1591_v50   ;;  %4484 = vmatprep.subr.msk.mxu0 %vm5873_vm7, %v5880_v14  ;;  %v1420_v50 = vld [vmem:[%s7294_s13] sm:$0xff] }
  0x70   : > { %4485 = vmatpush3.msk.msra.mxu0 %vm5873_vm7, %v5880_v14 }
  0x71   : > { %4537 = vmatprep.subr.bf16.mxu0 %v7310_v5 }
  0x72   : > { %883 = vperm.xlu1 %4897, %v845_v13   ;;  %v4112_v13 = vld [vmem:[%s7296_s15 + $0x38] sm:$0xff] }
  0x73   : > { %1630 = vperm.xlu0 %4898, %v1627_v18   ;;  %v1593_v18 = vld [vmem:[%s7296_s15 + $0x18] sm:$0xff] }
  0x76   : > { %907 = vperm.xlu1 %4897, %v837_v34   ;;  %v4111_v34 = vld [vmem:[%s7296_s15 + $0x30] sm:$0xff] }
  0x77   : > { %2169 = vperm.xlu0 %4898, %v4099_v10   ;;  %v1592_v10 = vld [vmem:[%s7296_s15 + $0x10] sm:$0xff] }
  0x7a   : > { %1436 = vperm.xlu1 %4897, %v1422_v42   ;;  %v4109_v42 = vld [vmem:[%s7296_s15 + $0x20] sm:$0xff] }
  0x7b   : > { %2164 = vperm.xlu0 %4898, %v4098_v51   ;;  %v1590_v51 = vld [vmem:[%s7296_s15] sm:$0xff] }
  0x7e   : > { %1431 = vperm.xlu1 %4897, %v1421_v25   ;;  %v4144_v25 = vld [vmem:[%s7294_s13 + $0x50] sm:$0xff] }
  0x7f   : > { %2159 = vperm.xlu0 %4898, %v4097_v57   ;;  %v4100_v57 = vld [vmem:[%s7294_s13 + $0x38] sm:$0xff] }
  0x82   : > { %1426 = vperm.xlu1 %4897, %v1420_v50   ;;  %v4143_v50 = vld [vmem:[%s7294_s13 + $0x48] sm:$0xff] }
  0x83   : > { %2345 = vperm.xlu0 %4898, %v4112_v13   ;;  %v4108_v13 = vld [vmem:[%s7295_s14 + $0x38] sm:$0xff] }
  0x86   : > { %1611 = vperm.xlu1 %4897, %v1593_v18   ;;  %v4142_v18 = vld [vmem:[%s7294_s13 + $0x40] sm:$0xff] }
  0x87   : > { %2340 = vperm.xlu0 %4898, %v4111_v34   ;;  %v4107_v34 = vld [vmem:[%s7295_s14 + $0x30] sm:$0xff] }
  0x8a   : > { %1606 = vperm.xlu1 %4897, %v1592_v10   ;;  %v4157_v10 = vld [vmem:[%s7296_s15 + $0x58] sm:$0xff] }
  0x8b   : > { %2330 = vperm.xlu0 %4898, %v4109_v42  }
  0x8e   : > { %1596 = vperm.xlu1 %4897, %v1590_v51  }
  0x8f   : > { %2893 = vperm.xlu0 %4898, %v4144_v25   ;;  %v4106_v25 = vld [vmem:[%s7295_s14 + $0x28] sm:$0xff] }
  0x92   : > { %2174 = vperm.xlu1 %4897, %v4100_v57   ;;  %v4156_v57 = vld [vmem:[%s7296_s15 + $0x50] sm:$0xff] }
  0x93   : > { %2888 = vperm.xlu0 %4898, %v4143_v50  }
  0x96   : > { %2306 = vperm.xlu1 %4897, %v4108_v13  }
  0x97   : > { %2883 = vperm.xlu0 %4898, %v4142_v18   ;;  %v4105_v18 = vld [vmem:[%s7295_s14 + $0x20] sm:$0xff] }
  0x98   : > { %v5961_v42 = vpop.permute.xlu1 %779  ;;  %v5963_v51 = vpop.permute.xlu0 %799 }
  0x9a   : > { %2301 = vperm.xlu1 %4897, %v4107_v34   ;;  %v4154_v34 = vld [vmem:[%s7296_s15 + $0x40] sm:$0xff] }
  0x9b   : > { %3069 = vperm.xlu0 %4898, %v4157_v10  }
  0x9c   : > { %v5971_v50 = vpop.permute.xlu1 %795 }
  0x9d   : > { %v5973_v13 = vpop.permute.xlu0 %819 }
  0x9e   : > { %2296 = vperm.xlu1 %4897, %v4106_v25   ;;  %v4110_v25 = vld [vmem:[%s7296_s15 + $0x28] sm:$0xff] }
  0x9f   : > { %3064 = vperm.xlu0 %4898, %v4156_v57  }
  0xa1   : > { %v5981_v10 = vpop.permute.xlu0 %807 }
  0xa2   : > { %2291 = vperm.xlu1 %4897, %v4105_v18   ;;  %v5983_v5 = vpop.permute.xlu1 %731  ;;  %v4145_v18 = vld [vmem:[%s7294_s13 + $0x58] sm:$0xff] }
  0xa3   : > { %3054 = vperm.xlu0 %4898, %v4154_v34  }
  0xa5   : > { %v5991_v57 = vpop.permute.xlu0 %827 }
  0xa6   : > { %2335 = vperm.xlu1 %4897, %v4110_v25   ;;  %v4153_v25 = vld [vmem:[%s7295_s14 + $0x58] sm:$0xff] }
  0xa7   : > { %v5996_v32 = vpop.permute.xlu1 %783  ;;  %3617 = vperm.xlu0 %4898, %v4189_v17   ;;  %v4152_v17 = vld [vmem:[%s7295_s14 + $0x50] sm:$0xff] }
  0xaa   : > { %2898 = vperm.xlu1 %4897, %v4145_v18   ;;  %v6001_v34 = vpop.permute.xlu0 %706 }
  0xab   : > { %3612 = vperm.xlu0 %4898, %v4188_v62   ;;  %v6006_v52 = vpop.permute.xlu1 %815  ;;  %v4151_v62 = vld [vmem:[%s7295_s14 + $0x48] sm:$0xff] }
  0xae   : > { %3030 = vperm.xlu1 %4897, %v4153_v25   ;;  %v727_v36 = vpop.permute.xlu0 %726  ;;  %v4201_v25 = vld [vmem:[%s7296_s15 + $0x70] sm:$0xff] }
  0xaf   : > { %3607 = vperm.xlu0 %4898, %v4187_v43   ;;  %v4150_v43 = vld [vmem:[%s7295_s14 + $0x40] sm:$0xff] }
  0xb0   : > { %v6014_v18 = vpop.permute.xlu1 %761 }
  0xb2   : > { %3025 = vperm.xlu1 %4897, %v4152_v17   ;;  %v6027_v12 = vpop.permute.xlu0 %711  ;;  %v4199_v17 = vld [vmem:[%s7296_s15 + $0x60] sm:$0xff] }
  0xb3   : > { %3793 = vperm.xlu0 %4898, %v4202_v29  }
  0xb4   : > { %v6022_v21 = vpop.permute.xlu1 %716 }
  0xb6   : > { %3020 = vperm.xlu1 %4897, %v4151_v62   ;;  %v757_v2 = vpop.permute.xlu0 %756 }
  0xb7   : > { %3788 = vperm.xlu0 %4898, %v4201_v25   ;;  %v4190_v25 = vld [vmem:[%s7294_s13 + $0x78] sm:$0xff] }
  0xb9   : > { %v6035_v29 = vpop.permute.xlu1 %787 }
  0xba   : > { %3015 = vperm.xlu1 %4897, %v4150_v43   ;;  %v6045_v23 = vpop.permute.xlu0 %736 }
  0xbb   : > { %3778 = vperm.xlu0 %4898, %v4199_v17  }
  0xbd   : > { %v6040_v62 = vpop.permute.xlu1 %803 }
  0xbe   : > { %3059 = vperm.xlu1 %4897, %v4155_v22   ;;  %v7556_v22 = vmov 0   ;;  %v849_v6 = vpop.permute.xlu0 %848 }
  0xbf   : > { %v698_v17 = vsel %vm7343_vm2, 1, %v7556_v22  ;;  %vm7558_vm2 = vcmp.eq.s32.totalorder %v5416_v44, 1 }
  0xc0   : > { %v748_v11 = vsel %vm7558_vm2, 1, %v7556_v22 }
  0xc1   : > { %v752_v24 = vrot.slane %v748_v11, %v5458_v55  ;;  %v4195_v11 = vld [vmem:[%s7295_s14 + $0x60] sm:$0xff] }
  0xc2   : > { %3622 = vperm.xlu1 %4897, %v4190_v25   ;;  %v6100_v54 = vpop.permute.xlu0 %721 }
  0xc3   : > { %v869_v43 = vpop.permute.xlu1 %868 }
  0xc6   : > { %3754 = vperm.xlu1 %4897, %v4198_v39   ;;  %v702_v39 = vrot.slane %v698_v17, %v5458_v55  ;;  %v683_v17 = vsel %vm7362_vm11, %v6072_v49, 0.0  ;;  %vm6113_vm11 = vcmp.eq.s32.totalorder %v752_v24, 1  ;;  %v4200_v24 = vld [vmem:[%s7296_s15 + $0x68] sm:$0xff] }
  0xc7   : > { %v6066_v25 = vpop.permute.xlu1 %741 }
  0xc8   : > { %vm6096_vm2 = vcmp.eq.s32.totalorder %v702_v39, 1  ;;  %v682_v39 = vsel %vm7563_vm5, 1.06, %v681_v46 }
  0xc9   : > { %v744_v49 = vsel %vm6096_vm2, %v6001_v34, %v727_v36  ;;  %v810_v36 = vsel %vm6096_vm2, %v5961_v42, %v5971_v50  ;;  %v918_v34 = vrot.slane %v682_v39, %v5458_v55  ;;  %v745_v42 = vsel %vm6096_vm2, %v6027_v12, %v5983_v5 }
  0xca   : > { %3749 = vperm.xlu1 %4897, %v4197_v28   ;;  %v684_v28 = vsel %vm7560_vm14, %v5467_v58, %v683_v17  ;;  %v774_v17 = vsel %vm6113_vm11, %v757_v2, %v744_v49  ;;  %v830_v46 = vsel %vm6113_vm11, %v6006_v52, %v810_v36  ;;  %v811_v50 = vsel %vm6096_vm2, %v5996_v32, %v5963_v51 }
  0xcb   : > { %v920_v2 = vmul.f32 %v918_v34, %v774_v17  ;;  %v886_v52 = vsel %vm6096_vm2, %v849_v6, %v869_v43  ;;  %v7569_v5 = vmov 0  ;;  %v831_v12 = vsel %vm6113_vm11, %v5973_v13, %v811_v50 }
  0xcc   : > { %v6092_v38 = vpop.permute.xlu1 %791  ;;  %v812_v51 = vsel %vm6096_vm2, %v6035_v29, %v6040_v62  ;;  %v746_v13 = vsel %vm6096_vm2, %v6022_v21, %v6045_v23 }
  0xce   : > { %3744 = vperm.xlu1 %4897, %v4196_v16   ;;  %v685_v16 = vsel %vm7566_vm10, 0.0, %v684_v28  ;;  %v767_v28 = vpop.permute.xlu0 %766  ;;  %vm7567_vm10 = vmmov %vm7560_vm14 }
  0xcf   : > { %v928_v31 = vrot.slane %v685_v16, %v5458_v55  ;;  %v775_v16 = vsel %vm6113_vm11, %v6014_v18, %v745_v42  ;;  %vm7568_vm14 = vmmov %vm7563_vm5 }
  0xd0   : > { %v824_v30 = vpop.permute.xlu1 %823  ;;  %vm6152_vm5 = vmor %vm7568_vm14, %vm7567_vm10  ;;  %v921_v32 = vmul.f32 %v918_v34, %v775_v16 }
  0xd1   : > { %v7570_v5 = vsel %vm6152_vm5, 4294967295, %v7569_v5  ;;  %vm678_vm10 = vmor %vm6152_vm5, %vm7572_vm3  ;;  %v931_v18 = vmul.f32 %v928_v31, %v831_v12  ;;  %v832_v43 = vsel %vm6113_vm11, %v824_v30, %v812_v51  ;;  %v813_v12 = vsel %vm6096_vm2, %v6092_v38, %v5981_v10 }
  0xd2   : > { %3739 = vperm.xlu1 %4897, %v4195_v11   ;;  %v930_v11 = vmul.f32 %v928_v31, %v830_v46  ;;  %v874_v17 = vpop.permute.xlu0 %873  ;;  %7571 = vst [vmem:[#allocation50_spill] sm:$0xff] %v7570_v5  ;;  %v946_v50 = vsel %vm678_vm10, 1, %v7556_v22  ;;  %v7611_v22 = vld [vmem:[#allocation10_spill] sm:$0xff] }
  0xd3   : > { %v935_v42 = vadd.f32 %v931_v18, %v921_v32  ;;  %v950_v16 = vrot.slane %v946_v50, %v5458_v55 }
  0xd4   : > { %v934_v36 = vadd.f32 %v930_v11, %v920_v2  ;;  %v776_v11 = vsel %vm6113_vm11, %v767_v28, %v746_v13 }
  0xd5   : > { %v854_v49 = vpop.permute.xlu1 %853  ;;  %vm6185_vm3 = vcmp.eq.s32.totalorder %v950_v16, 1 }
  0xd6   : > { %3783 = vperm.xlu1 %4897, %v4200_v24   ;;  %v879_v2 = vpop.permute.xlu0 %878  ;;  %v887_v29 = vsel %vm6096_vm2, %v854_v49, %v874_v17 }
  0xd9   : > { %v893_v39 = vpop.permute.xlu1 %892 }
  0xda   : > { %v910_v24 = vsel %vm6113_vm11, %v893_v39, %v886_v52  ;;  %v932_v52 = vmul.f32 %v928_v31, %v832_v43 }
  0xdb   : > { %v938_v46 = vadd.f32 %v934_v36, %v910_v24  ;;  %v922_v36 = vmul.f32 %v918_v34, %v776_v11  ;;  %v903_v24 = vpop.permute.xlu0 %902 }
  0xdd   : > { %4915 = vtanh.f32 %v938_v46  ;;  %v772_v6 = vpop.permute.xlu1 %771  ;;  %v936_v23 = vadd.f32 %v932_v52, %v922_v36  ;;  %v747_v46 = vsel %vm6096_vm2, %v6100_v54, %v6066_v25  ;;  %v833_v25 = vsel %vm6113_vm11, %v5991_v57, %v813_v12 }
  0xde   : > { %v777_v18 = vsel %vm6113_vm11, %v772_v6, %v747_v46  ;;  %v933_v43 = vmul.f32 %v928_v31, %v833_v25 }
  0xdf   : > { %v923_v38 = vmul.f32 %v918_v34, %v777_v18  ;;  %v5073_v34 = vmov 1966171168  }
  0xe1   : > { %v898_v62 = vpop.permute.xlu1 %897 }
  0xe2   : > { %v911_v30 = vsel %vm6113_vm11, %v898_v62, %v887_v29 }
  0xe3   : > { %v939_v39 = vadd.f32 %v935_v42, %v911_v30  ;;  %v1303_v42 = vunpack.c.l.s4 %v5073_v34  ;;  %v1069_v34 = vsel %vm5855_vm15, %v5862_v8, 0.0  ;;  %v1073_v8 = vsel %vm5779_vm4, %v5788_v35, 0.0 }
  0xe5   : > { %4917 = vtanh.f32 %v939_v39  ;;  %v859_v21 = vpop.permute.xlu1 %858  ;;  %v1304_v52 = vunpack.c.0.s8 %v1303_v42 }
  0xe6   : > { %v888_v28 = vsel %vm6096_vm2, %v859_v21, %v879_v2  ;;  %v937_v2 = vadd.f32 %v933_v43, %v923_v38 }
  0xe7   : > { %v912_v49 = vsel %vm6113_vm11, %v903_v24, %v888_v28  ;;  %v6251_v21 = vsub.s32 %v1304_v52, %v5426_v47  ;;  %v1070_v52 = vsel %vm5837_vm12, %v5844_v7, 0.0  ;;  %v1074_v7 = vsel %vm5756_vm0, %v5767_v0, 0.0 }
  0xe8   : > { %v940_v17 = vadd.f32 %v936_v23, %v912_v49 }
  0xe9   : > { %v864_v32 = vpop.permute.xlu1 %863 }
  0xea   : > { %v6197_v51 = vpop.eup %4915  ;;  %4919 = vtanh.f32 %v940_v17 }
  0xeb   : > { %4486 = vmatprep.mubr.msk.f32.mxu0 %vm6185_vm3, %v6197_v51 }
  0xed   : > { %v884_v10 = vpop.permute.xlu1 %883 }
  0xee   : > { %v889_v13 = vsel %vm6096_vm2, %v864_v32, %v884_v10  ;;  %vm7370_vm2 = vcmask 261120  }
  0xf1   : > { %v908_v6 = vpop.permute.xlu1 %907 }
  0xf2   : > { %v6212_v11 = vpop.eup %4917  ;;  %v913_v29 = vsel %vm6113_vm11, %v908_v6, %v889_v13  ;;  %vm7576_vm11 = vmmov 0  }
  0xf3   : > { %v941_v62 = vadd.f32 %v937_v2, %v913_v29  ;;  %4487 = vmatmul.mubr.msk.f32.vlgmr.msra.gmra.mxu0 %vm6185_vm3, %v6212_v11 }
  0xf4   : > { %4538 = vmatpush3.bf16.msra.mxu0 %v5279_v9 }
  0xf5   : > { %4921 = vtanh.f32 %v941_v62  ;;  %4539 = vmatprep.subr.bf16.mxu0 %v7575_v45  ;;  %v1416_v62 = vld [vmem:[%s7293_s12] sm:$0xff] }
  0xf6   : > { %4500 = vmatprep.mubr.msk.f32.mxu1 %vm7370_vm2, %v1416_v62  ;;  %v7585_v62 = vld [vmem:[#allocation35_spill] sm:$0xff] }
  0xf7   : > { %v6224_v31 = vpop.eup %4919 }
  0xf8   : > { %4489 = vmatprep.mubr.msk.f32.mxu0 %vm6185_vm3, %v6224_v31  ;;  %4540 = vmatpush3.bf16.msra.mxu0 %v5302_v15 }
  0xf9   : > { %4541 = vmatprep.subr.bf16.mxu0 %v7575_v45 }
  0xfc   : > { %4542 = vmatpush3.bf16.msra.mxu0 %v5342_v26 }
  0xfd   : > { %4543 = vmatprep.subr.bf16.mxu0 %v7575_v45 }
 0x100   : > { %4544 = vmatpush3.bf16.msra.mxu0 %v5371_v33 }
 0x101   : > { %4545 = vmatprep.subr.bf16.mxu0 %v7575_v45 }
 0x102   : > { %v6238_v50 = vpop.eup %4921 }
 0x103   : > { %4490 = vmatmul.mubr.msk.f32.gmra.mxu0 %vm6185_vm3, %v6238_v50 }
 0x104   : > { %4546 = vmatpush3.bf16.msra.mxu0 %v5401_v40  ;;  %4553 = vmatprep.mubr.msk.bf16.mxu0 %vm7576_vm11, %v7575_v45 }
 0x105   : > { %v1287_v39 = vpop.f32.mrf.mxu1  ;;  %4547 = vmatprep.subr.bf16.mxu0 %v7575_v45 }
 0x106   : > { %v1294_v36 = vrot.slane %v1287_v39, 1  ;;  %v1297_v16 = vrot.slane %v1287_v39, 7 }
 0x107   : > { %v1199_v23 = vpop.f32.mrf.mxu0  ;;  %v4452_v49 = vpop.f32.mrf.mxu1 }
 0x108   : > { %v1296_v24 = vsub.f32 %v1199_v23, %v1294_v36  ;;  %v1299_v28 = vadd.f32 %v1297_v16, %v1199_v23  ;;  %4548 = vmatpush3.bf16.msra.mxu0 %v5432_v48  ;;  %v1071_v36 = vsel %vm5819_vm9, %v5826_v63, 0.0  ;;  %v1072_v23 = vsel %vm5800_vm6, %v5807_v37, 0.0  ;;  %v7577_v49 = vld [vmem:[#allocation41_spill] sm:$0xff] }
 0x109   : > { %v4432_v17 = vpop.f32.mrf.mxu0  ;;  %4549 = vmatprep.subr.bf16.mxu0 %v7575_v45  ;;  %v1290_v12 = vpop.f32.mrf.mxu1  ;;  %v1075_v63 = vsel %vm5732_vm8, %v5742_v3, 0.0  ;;  %vm7601_vm9 = vcmask 261120  }
 0x10a   : > { %v1308_v46 = vrot.slane %v1299_v28, %v6251_v21  ;;  %v1300_v47 = vmul.f32 %v1296_v24, %v5467_v58  ;;  %v6261_v43 = vmul.f32 %v1296_v24, %v5477_v61  ;;  %vm7602_vm6 = vmmov %vm7601_vm9  ;;  %v4998_v12 = vld [vmem:[%s7286_s5 + $0x28] sm:$0xff] }
 0x10b   : > { %v1202_v32 = vpop.f32.mrf.mxu0  ;;  %v4453_v25 = vpop.f32.mrf.mxu1  ;;  %vm7603_vm4 = vmmov %vm7602_vm6 }
 0x10c   : > { %v1309_v18 = vcombine.high %v1308_v46, %v1308_v46  ;;  %4550 = vmatpush3.bf16.msra.mxu0 %v5463_v56  ;;  %v7578_v46 = vld [vmem:[#allocation39_spill] sm:$0xff] }
 0x10d   : > { %v4433_v38 = vpop.f32.mrf.mxu0  ;;  %4551 = vmatprep.subr.bf16.mxu0 %v7575_v45  ;;  %v1076_v37 = vsel %vm5709_vm1, %v7578_v46, 0.0  ;;  %v7598_v46 = vld [vmem:[#allocation25_spill] sm:$0xff]  ;;  %v4997_v25 = vld [vmem:[%s7286_s5 + $0x30] sm:$0xff] }
 0x10e   : > { %v1316_v10 = vrot.slane %v1309_v18, %v6251_v21  ;;  %v7580_v18 = vld [vmem:[#allocation40_spill] sm:$0xff]  ;;  %vm7599_vm12 = vnez %v7598_v46 }
 0x10f   : > { %v1077_v35 = vsel %vm5695_vm13, %v7580_v18, 0.0  ;;  %v4991_v46 = vld [vmem:[%s7286_s5 + $0x60] sm:$0xff] }
 0x110   : > { %v1318_v13 = vmul.f32 %v1316_v10, %v5477_v61  ;;  %v6265_v6 = vmul.f32 %v1316_v10, %v5467_v58  ;;  %4552 = vmatpush3.bf16.msra.mxu0 %v5500_v4  ;;  %v1068_v61 = vsel %vm5873_vm7, %v5880_v14, 0.0  ;;  %v7583_v10 = vld [vmem:[#allocation34_spill] sm:$0xff] }
 0x111   : > { %v1084_v42 = vadd.f32 %v1069_v34, %v1068_v61  ;;  %vm7584_vm14 = vnez %v7583_v10  ;;  %v7586_v61 = vld [vmem:[#allocation32_spill] sm:$0xff] }
 0x112   : > { %v6268_v2 = vadd.f32 %v1318_v13, %v1300_v47  ;;  %v1322_v29 = vsub.f32 %v6261_v43, %v6265_v6  ;;  %v7582_v47 = vld [vmem:[#allocation36_spill] sm:$0xff]  ;;  %vm7587_vm10 = vnez %v7586_v61 }
 0x113   : > { %v1085_v39 = vadd.f32 %v1084_v42, %v1070_v52  ;;  %v1078_v0 = vsel %vm7584_vm14, %v7582_v47, 0.0  ;;  %v1079_v3 = vsel %vm7587_vm10, %v7585_v62, 0.0  ;;  %v7588_v42 = vld [vmem:[#allocation33_spill] sm:$0xff]  ;;  %v7589_v52 = vld [vmem:[#allocation30_spill] sm:$0xff]  ;;  %v4996_v10 = vld [vmem:[%s7286_s5 + $0x38] sm:$0xff] }
 0x114   : > { %vm7590_vm2 = vnez %v7589_v52  ;;  %v4994_v52 = vld [vmem:[%s7286_s5 + $0x48] sm:$0xff]  ;;  %v4995_v61 = vld [vmem:[%s7286_s5 + $0x40] sm:$0xff] }
 0x115   : > { %v1086_v16 = vadd.f32 %v1085_v39, %v1071_v36  ;;  %v1080_v39 = vsel %vm7590_vm2, %v7588_v42, 0.0 }
 0x117   : > { %v1087_v14 = vadd.f32 %v1086_v16, %v1072_v23  ;;  %v7591_v16 = vld [vmem:[#allocation31_spill] sm:$0xff]  ;;  %v7592_v23 = vld [vmem:[#allocation28_spill] sm:$0xff] }
 0x118   : > { %vm7593_vm7 = vnez %v7592_v23  ;;  %v4993_v23 = vld [vmem:[%s7286_s5 + $0x50] sm:$0xff] }
 0x119   : > { %v1088_v24 = vadd.f32 %v1087_v14, %v1073_v8  ;;  %v1081_v14 = vsel %vm7593_vm7, %v7591_v16, 0.0 }
 0x11b   : > { %v1089_v28 = vadd.f32 %v1088_v24, %v1074_v7  ;;  %v7594_v24 = vld [vmem:[#allocation29_spill] sm:$0xff]  ;;  %v7595_v7 = vld [vmem:[#allocation26_spill] sm:$0xff] }
 0x11c   : > { %vm7596_vm15 = vnez %v7595_v7  ;;  %v4992_v7 = vld [vmem:[%s7286_s5 + $0x58] sm:$0xff] }
 0x11d   : > { %v1090_v17 = vadd.f32 %v1089_v28, %v1075_v63  ;;  %v1082_v28 = vsel %vm7596_vm15, %v7594_v24, 0.0 }
 0x11f   : > { %v1091_v32 = vadd.f32 %v1090_v17, %v1076_v37  ;;  %v7597_v17 = vld [vmem:[#allocation27_spill] sm:$0xff] }
 0x120   : > { %v1083_v37 = vsel %vm7599_vm12, %v7597_v17, 0.0  ;;  %v1419_v17 = vld [vmem:[%s7293_s12 + $0x18] sm:$0xff] }
 0x121   : > { %v1092_v38 = vadd.f32 %v1091_v32, %v1077_v35 }
 0x123   : > { %v1093_v13 = vadd.f32 %v1092_v38, %v1078_v0 }
 0x125   : > { %v1094_v34 = vadd.f32 %v1093_v13, %v1079_v3 }
 0x127   : > { %v1095_v36 = vadd.f32 %v1094_v34, %v1080_v39 }
 0x129   : > { %v1096_v8 = vadd.f32 %v1095_v36, %v1081_v14 }
 0x12b   : > { %v1097_v63 = vadd.f32 %v1096_v8, %v1082_v28  ;;  %v1417_v28 = vld [vmem:[%s7293_s12 + $0x8] sm:$0xff] }
 0x12d   : > { %v1098_v32 = vadd.f32 %v1097_v63, %v1083_v37  ;;  %v1418_v63 = vld [vmem:[%s7293_s12 + $0x10] sm:$0xff]  ;;  %v1442_v37 = vpop.permute.xlu0 %1441 }
 0x12f   : > { %v1099_v18 = vrot.slane %v1098_v32, 4 }
 0x131   : > { %v1100_v35 = vadd.f32 %v1099_v18, %v1098_v32  ;;  %v1437_v32 = vpop.permute.xlu1 %1436  ;;  %v1574_v18 = vpop.permute.xlu0 %1573 }
 0x133   : > { %v1101_v38 = vrot.slane %v1100_v35, 2 }
 0x135   : > { %v1102_v47 = vadd.f32 %v1101_v38, %v1100_v35  ;;  %v1432_v35 = vpop.permute.xlu1 %1431  ;;  %v1569_v38 = vpop.permute.xlu0 %1568 }
 0x137   : > { %v1103_v0 = vrot.slane %v1102_v47, 1 }
 0x139   : > { %v1104_v13 = vadd.f32 %v1103_v0, %v1102_v47  ;;  %v1427_v47 = vpop.permute.xlu1 %1426  ;;  %v7604_v0 = vld [vmem:[#allocation49_spill] sm:$0xff] }
 0x13b   : > { %v1105_v62 = vmax.f32 %v1104_v13, 1.0  ;;  %v1323_v13 = vsub.f32 %v7604_v0, %v6268_v2 }
 0x13d   : > { %4923 = vrcp.f32 %v1105_v62  ;;  %v7605_v62 = vld [vmem:[#allocation48_spill] sm:$0xff] }
 0x14a   : > { %v6324_v42 = vpop.eup %4923 }
 0x14b   : > { %7600 = vst [vmem:[#allocation41_spill] sm:$0xff] %v6324_v42 }
 0x1b3   : > { %v4488_v3 = vpop.f32.mrf.mxu0 }
 0x1b4   : > { %v1413_v8 = vmul.f32 %v6324_v42, %v4488_v3  ;;  %v1325_v3 = vsub.f32 %v7605_v62, %v1322_v29 }
 0x1b5   : > { %v1393_v34 = vpop.f32.mrf.mxu0 }
 0x1b6   : > { %v1412_v24 = vmul.f32 %v6324_v42, %v1393_v34  ;;  %v1564_v34 = vpop.permute.xlu0 %1563 }
 0x1c3   : > { %v4491_v39 = vpop.f32.mrf.mxu0 }
 0x1c4   : > { %v1415_v36 = vmul.f32 %v6324_v42, %v4491_v39 }
 0x1c5   : > { %v1403_v16 = vpop.f32.mrf.mxu0 }
 0x1c6   : > { %v1414_v14 = vmul.f32 %v6324_v42, %v1403_v16  ;;  %4492 = vmatprep.subr.mxu1 %v1415_v36  ;;  %v1326_v16 = vsel %vm6152_vm5, 0.0, %v1325_v3 }
 0x1c7   : > { %4493 = vmatpush3.msra.mxu1 %v1415_v36  ;;  %v1612_v36 = vpop.permute.xlu1 %1611 }
 0x1c8   : > { %4494 = vmatprep.subr.mxu1 %v1414_v14 }
 0x1c9   : > { %4495 = vmatpush3.msra.mxu1 %v1414_v14 }
 0x1ca   : > { %4496 = vmatprep.subr.mxu1 %v1413_v8 }
 0x1cb   : > { %4497 = vmatpush3.msra.mxu1 %v1413_v8  ;;  %v1580_v8 = vrot.slane %v1326_v16, %v5458_v55  ;;  %v1607_v2 = vpop.permute.xlu1 %1606 }
 0x1cc   : > { %4498 = vmatprep.subr.mxu1 %v1412_v24 }
 0x1cd   : > { %4499 = vmatpush3.msra.mxu1 %v1412_v24  ;;  %v1559_v24 = vpop.permute.xlu0 %1558  ;;  %v1583_v43 = vmul.f32 %v1580_v8, %v1564_v34  ;;  %v1585_v57 = vmul.f32 %v1580_v8, %v1574_v18 }
 0x1ce   : > { %4501 = vmatmul.mubr.msk.f32.vlgmr.msra.gmra.mxu1 %vm7601_vm9, %v1417_v28  ;;  %4506 = vmatprep.subr.mxu1 %v7575_v45  ;;  %v1582_v41 = vmul.f32 %v1580_v8, %v1559_v24 }
 0x1cf   : > { %4503 = vmatprep.mubr.msk.f32.mxu1 %vm7602_vm6, %v1418_v63  ;;  %v1597_v16 = vpop.permute.xlu1 %1596 }
 0x1d1   : > { %v1602_v30 = vpop.permute.xlu0 %1601 }
 0x1d2   : > { %4504 = vmatmul.mubr.msk.f32.gmra.mxu1 %vm7603_vm4, %v1419_v17  ;;  %vm7606_vm4 = vcmp.eq.s32.totalorder %v5416_v44, 1 }
 0x1d3   : > { %4514 = vmatprep.mubr.msk.f32.mxu1 %vm7576_vm11, %v7575_v45  ;;  %v1324_v39 = vsel %vm7606_vm4, 0.0, %v1323_v13  ;;  %vm7620_vm9 = vmmov %vm7606_vm4 }
 0x1d4   : > { %v1448_v14 = vrot.slane %v1324_v39, %v5458_v55 }
 0x1d6   : > { %v1451_v28 = vmul.f32 %v1448_v14, %v1432_v35  ;;  %v1450_v6 = vmul.f32 %v1448_v14, %v1427_v47  ;;  %v1453_v13 = vmul.f32 %v1448_v14, %v1442_v37  ;;  %v1452_v42 = vmul.f32 %v1448_v14, %v1437_v32  ;;  %v7616_v14 = vld [vmem:[#allocation20_spill] sm:$0xff] }
 0x1d7   : > { %v1584_v35 = vmul.f32 %v1580_v8, %v1569_v38  ;;  %v7614_v38 = vld [vmem:[#allocation16_spill] sm:$0xff]  ;;  %v7617_v8 = vld [vmem:[#allocation22_spill] sm:$0xff] }
 0x28e   : > { %v4502_v63 = vpop.f32.mrf.mxu1 }
 0x28f   : > { %v1539_v17 = vadd.f32 %v4502_v63, %v1451_v28 }
 0x290   : > { %v1533_v29 = vpop.f32.mrf.mxu1 }
 0x291   : > { %v1587_v0 = vadd.f32 %v1583_v43, %v1539_v17  ;;  %v1534_v62 = vadd.f32 %v1533_v29, %v1450_v6  ;;  %v6416_v17 = vld [vmem:[%s7286_s5 + $0x78] sm:$0xff]  ;;  %v6421_v43 = vpop.permute.xlu0 %1630 }
 0x292   : > { %v4505_v54 = vpop.f32.mrf.mxu1  ;;  %7619 = vst [vmem:[#allocation39_spill] sm:$0xff] %v6421_v43 }
 0x293   : > { %v1615_v3 = vadd.f32 %v1602_v30, %v1587_v0  ;;  %v1586_v5 = vadd.f32 %v1582_v41, %v1534_v62  ;;  %v1549_v39 = vadd.f32 %v4505_v54, %v1453_v13  ;;  %v7607_v41 = vsel %vm6185_vm3, %v6212_v11, 0.0 }
 0x294   : > { %v1543_v4 = vpop.f32.mrf.mxu1  ;;  %v7610_v11 = vsel %vm6185_vm3, %v6224_v31, 0.0  ;;  %v7612_v31 = vld [vmem:[#allocation12_spill] sm:$0xff] }
 0x295   : > { %4925 = vtanh.f32 %v1615_v3  ;;  %v1614_v56 = vadd.f32 %v1597_v16, %v1586_v5  ;;  %v1589_v28 = vadd.f32 %v1585_v57, %v1549_v39  ;;  %v1544_v34 = vadd.f32 %v1543_v4, %v1452_v42 }
 0x296   : > { %v7608_v5 = vsel %vm6185_vm3, %v6197_v51, 0.0  ;;  %v7609_v4 = vsel %vm6185_vm3, %v6238_v50, 0.0  ;;  %v6389_v51 = vld [vmem:[%s7297_s16] sm:$0x3]  ;;  %v7613_v50 = vld [vmem:[#allocation14_spill] sm:$0xff] }
 0x297   : > { %4927 = vtanh.f32 %v1614_v56  ;;  %v1617_v47 = vadd.f32 %v1612_v36, %v1589_v28  ;;  %v1588_v63 = vadd.f32 %v1584_v35, %v1544_v34  ;;  %v7615_v36 = vld [vmem:[#allocation18_spill] sm:$0xff] }
 0x299   : > { %4929 = vtanh.f32 %v1617_v47  ;;  %v1616_v24 = vadd.f32 %v1607_v2, %v1588_v63  ;;  %v7618_v2 = vld [vmem:[#allocation24_spill] sm:$0xff] }
 0x29b   : > { %4931 = vtanh.f32 %v1616_v24 }
 0x2a2   : > { %v4926_v37 = vpop.eup %4925 }
 0x2a3   : > { %v6361_v54 = vadd.f32 %v4926_v37, %v7607_v41 }
 0x2a4   : > { %v4928_v30 = vpop.eup %4927 }
 0x2a5   : > { %v6367_v57 = vadd.f32 %v4928_v30, %v7608_v5  ;;  %v7392_v5 = vmov 683565275  }
 0x2a6   : > { %v4930_v56 = vpop.eup %4929 }
 0x2a7   : > { %v6373_v42 = vadd.f32 %v4930_v56, %v7609_v4  ;;  %v7394_v4 = vmov 2475754826  }
 0x2a8   : > { %v4932_v32 = vpop.eup %4931 }
 0x2a9   : > { %4507 = vmatpush3.msra.mxu1 %v6373_v42  ;;  %v6380_v18 = vadd.f32 %v4932_v32, %v7610_v11 }
 0x2aa   : > { %4508 = vmatprep.subr.mxu1 %v7575_v45 }
 0x2ab   : > { %4509 = vmatpush3.msra.mxu1 %v6380_v18 }
 0x2ac   : > { %4510 = vmatprep.subr.mxu1 %v7575_v45 }
 0x2ad   : > { %4511 = vmatpush3.msra.mxu1 %v6361_v54 }
 0x2ae   : > { %4512 = vmatprep.subr.mxu1 %v7575_v45 }
 0x2af   : > { %4513 = vmatpush3.msra.mxu1 %v6367_v57 }
 0x2b0   : > { %4515 = vmatmul.mubr.msk.f32.vlgmr.msra.gmra.mxu1 %vm7602_vm6, %v6389_v51  ;;  %4517 = vmatprep.subr.bf16.mxu1 %v7575_v45 }
 0x2b1   : > { %4518 = vmatpush3.bf16.msra.mxu1 %v7611_v22  ;;  %4533 = vmatprep.mubr.msk.bf16.mxu1 %vm7576_vm11, %v7575_v45 }
 0x2b2   : > { %4519 = vmatprep.subr.bf16.mxu1 %v7575_v45 }
 0x2b5   : > { %4520 = vmatpush3.bf16.msra.mxu1 %v7612_v31 }
 0x2b6   : > { %4521 = vmatprep.subr.bf16.mxu1 %v7575_v45 }
 0x2b9   : > { %4522 = vmatpush3.bf16.msra.mxu1 %v7613_v50 }
 0x2ba   : > { %4523 = vmatprep.subr.bf16.mxu1 %v7575_v45 }
 0x2bd   : > { %4524 = vmatpush3.bf16.msra.mxu1 %v7614_v38 }
 0x2be   : > { %4525 = vmatprep.subr.bf16.mxu1 %v7575_v45 }
 0x2c1   : > { %4526 = vmatpush3.bf16.msra.mxu1 %v7615_v36 }
 0x2c2   : > { %4527 = vmatprep.subr.bf16.mxu1 %v7575_v45 }
 0x2c5   : > { %4528 = vmatpush3.bf16.msra.mxu1 %v7616_v14 }
 0x2c6   : > { %4529 = vmatprep.subr.bf16.mxu1 %v7575_v45 }
 0x2c9   : > { %4530 = vmatpush3.bf16.msra.mxu1 %v7617_v8 }
 0x2ca   : > { %4531 = vmatprep.subr.bf16.mxu1 %v7575_v45 }
 0x2cd   : > { %4532 = vmatpush3.bf16.msra.mxu1 %v7618_v2 }
 0x2ce   : > { %4557 = vmatprep.subr.msk.mxu1 %vm7599_vm12, %v6416_v17 }
 0x370   : > { %v1702_v6 = vpop.f32.mrf.mxu1 }
 0x371   : > { %v6424_v29 = vadd.f32 %v1702_v6, %v6421_v43  ;;  %v7398_v6 = vmov 2131351028  }
 0x372   : > { %v4516_v0 = vpop.f32.mrf.mxu1 }
 0x373   : > { %v1715_v62 = vrot.slane %v6424_v29, %v6251_v21 }
 0x375   : > { %v1716_v13 = vcombine.high %v1715_v62, %v1715_v62 }
 0x377   : > { %v1723_v3 = vrot.slane %v1716_v13, %v6251_v21  ;;  %v7400_v13 = vmov 2102212464  }
 0x379   : > { %v6431_v39 = vsel %vm7620_vm9, 0.0, %v1723_v3 }
 0x37a   : > { %v1730_v16 = vand.u32 2139095040, %v6431_v39  ;;  %v7391_v47 = vand.u32 2147483647, %v6431_v39  ;;  %vm1819_vm8 = vweird.f32 %v6431_v39 }
 0x37c   : > { %v1731_v35 = vshrl.u32 %v1730_v16, 23  ;;  %v1734_v37 = vand.u32 8388607, %v7391_v47 }
 0x37e   : > { %v4069_v28 = vadd.s32 4294967169, %v1731_v35  ;;  %v7402_v35 = vmov 920167782  }
 0x380   : > { %v1737_v34 = vadd.s32 1, %v4069_v28 }
 0x382   : > { %vm1738_vm3 = vcmp.gt.s32.totalorder %v1737_v34, 0 }
 0x383   : > { %v1739_v63 = vsel %vm1738_vm3, %v1737_v34, 0 }
 0x384   : > { %v1741_v24 = vand.u32 31, %v1739_v63  ;;  %v1740_v30 = vshrl.u32 %v1739_v63, 5  ;;  %v7404_v63 = vmov 1326507024  }
 0x386   : > { %v1742_v41 = vsub.s32 32, %v1741_v24  ;;  %v1744_v56 = vshll.u32 %v7392_v5, %v1741_v24  ;;  %v1747_v32 = vshll.u32 %v7394_v4, %v1741_v24  ;;  %v1750_v62 = vshll.u32 %v7398_v6, %v1741_v24 }
 0x387   : > { %v1753_v16 = vshll.u32 %v7400_v13, %v1741_v24  ;;  %v1756_v34 = vshll.u32 %v7402_v35, %v1741_v24  ;;  %v1735_v5 = vor.u32 8388608, %v1734_v37  ;;  %vm1759_vm4 = vcmp.lt.s32.totalorder %v1740_v30, 1 }
 0x388   : > { %v1745_v11 = vshrl.u32 %v7394_v4, %v1742_v41  ;;  %v1748_v0 = vshrl.u32 %v7398_v6, %v1742_v41  ;;  %v1751_v3 = vshrl.u32 %v7400_v13, %v1742_v41  ;;  %v1754_v28 = vshrl.u32 %v7402_v35, %v1742_v41 }
 0x389   : > { %v1757_v47 = vshrl.u32 %v7404_v63, %v1742_v41  ;;  %vm1762_vm6 = vcmp.lt.s32.totalorder %v1740_v30, 4  ;;  %v7621_v13 = vmov 683565275   ;;  %vm1761_vm9 = vcmp.lt.s32.totalorder %v1740_v30, 3 }
 0x38a   : > { %v1746_v4 = vor.u32 %v1745_v11, %v1744_v56  ;;  %v1749_v43 = vor.u32 %v1748_v0, %v1747_v32  ;;  %v1752_v2 = vor.u32 %v1751_v3, %v1750_v62  ;;  %v1755_v8 = vor.u32 %v1754_v28, %v1753_v16 }
 0x38b   : > { %v1758_v14 = vor.u32 %v1757_v47, %v1756_v34  ;;  %v1743_v50 = vshrl.u32 %v7621_v13, %v1742_v41  ;;  %vm1760_vm3 = vcmp.lt.s32.totalorder %v1740_v30, 2  ;;  %v1775_v63 = vshll.u32 %v1735_v5, 8 }
 0x38c   : > { %v1764_v6 = vsel %vm1762_vm6, %v1752_v2, 2102212464  ;;  %v1767_v36 = vsel %vm1759_vm4, %v1746_v4, %v1749_v43  ;;  %v1771_v38 = vsel %vm1759_vm4, %v1749_v43, %v1752_v2  ;;  %v1768_v31 = vsel %vm1762_vm6, %v1755_v8, 920167782 }
 0x38d   : > { %v1772_v22 = vsel %vm1762_vm6, %v1758_v14, 1326507024  ;;  %v1769_v24 = vsel %vm1761_vm9, %v1752_v2, %v1768_v31  ;;  %v1763_v37 = vsel %vm1759_vm4, %v1743_v50, %v1746_v4  ;;  %v1765_v56 = vsel %vm1761_vm9, %v1749_v43, %v1764_v6 }
 0x38e   : > { %v1773_v35 = vsel %vm1761_vm9, %v1755_v8, %v1772_v22  ;;  %v1770_v32 = vsel %vm1760_vm3, %v1767_v36, %v1769_v24  ;;  %v1766_v16 = vsel %vm1760_vm3, %v1763_v37, %v1765_v56  ;;  %vm7623_vm9 = vcmp.eq.s32.totalorder %v5416_v44, 3 }
 0x38f   : > { %v1774_v11 = vsel %vm1760_vm3, %v1771_v38, %v1773_v35  ;;  %v6451_v62 = vmul.u32.u64.low %v1775_v63, %v1770_v32  ;;  %v6452_v3 = vmul.u32.u64.high %v1775_v63, %v1770_v32, %v6451_v62  ;;  %v1782_v14 = vmul.u32 %v1775_v63, %v1766_v16 }
 0x390   : > { %v6448_v0 = vmul.u32.u64.low %v1775_v63, %v1774_v11  ;;  %v6449_v47 = vmul.u32.u64.high %v1775_v63, %v1774_v11, %v6448_v0 }
 0x391   : > { %v1785_v41 = vadd.s32 1, %v6452_v3 }
 0x392   : > { %vm1784_vm5 = vc.u32 %v6449_v47, %v6451_v62  ;;  %v1783_v6 = vadd.s32 %v6451_v62, %v6449_v47 }
 0x393   : > { %v1786_v31 = vsel %vm1784_vm5, %v1785_v41, %v6452_v3  ;;  %vm1729_vm5 = vcmp.lt.s32.totalorder %v6431_v39, 0 }
 0x394   : > { %v1787_v22 = vadd.s32 %v1786_v31, %v1782_v14  ;;  %v7622_v14 = vand.u32 2147483647, %v6431_v39 }
 0x396   : > { %v1788_v8 = vadd.s32 536870912, %v1787_v22  ;;  %vm1728_vm6 = vcmp.le.f32.partialorder %v7622_v14, 0.7853982  ;;  %v6519_v14 = vld [vmem:[%s7286_s5 + $0x58] sm:$0xff] }
 0x398   : > { %v1789_v50 = vshrl.u32 %v1788_v8, 30 }
 0x39a   : > { %v1790_v2 = vshll.u32 %v1789_v50, 30  ;;  %v1813_v41 = vsub.s32 4, %v1789_v50 }
 0x39c   : > { %v1791_v36 = vsub.s32 %v1787_v22, %v1790_v2  ;;  %v1814_v62 = vsel %vm1729_vm5, %v1813_v41, %v1789_v50  ;;  %v6508_v41 = vld [vmem:[%s7286_s5 + $0x60] sm:$0xff] }
 0x39d   : > { %v1816_v22 = vsel %vm1728_vm6, 0, %v1814_v62  ;;  %v6552_v62 = vld [vmem:[%s7286_s5 + $0x40] sm:$0xff] }
 0x39e   : > { %v1793_v38 = vsub.s32 0, %v1791_v36  ;;  %v1924_v8 = vadd.s32 3, %v1816_v22  ;;  %v1820_v2 = vand.u32 3, %v1816_v22  ;;  %v6563_v22 = vld [vmem:[%s7286_s5 + $0x38] sm:$0xff] }
 0x3a0   : > { %v4070_v43 = vmin.u32 %v1793_v38, %v1791_v36  ;;  %vm1825_vm3 = vcmp.eq.s32.totalorder %v1820_v2, 2  ;;  %vm1822_vm11 = vcmp.eq.s32.totalorder %v1820_v2, 0 }
 0x3a2   : > { %v1795_v30 = vclz %v4070_v43 }
 0x3a4   : > { %v4071_v5 = vadd.s32 4294967294, %v1795_v30 }
 0x3a6   : > { %vm4072_vm4 = vcmp.lt.s32.totalorder %v4071_v5, 0 }
 0x3a7   : > { %v1798_v4 = vsel %vm4072_vm4, 0, %v4071_v5  ;;  %v1706_v5 = vsel %vm7623_vm9, %v6424_v29, 0.0  ;;  %vm7628_vm9 = vnez %v7539_v60 }
 0x3a8   : > { %v1799_v35 = vsub.s32 32, %v1798_v4  ;;  %v1803_v28 = vsub.s32 4294967266, %v1798_v4  ;;  %v1800_v34 = vshll.u32 %v1791_v36, %v1798_v4  ;;  %v1925_v36 = vand.u32 3, %v1924_v8  ;;  %v6574_v8 = vld [vmem:[%s7286_s5 + $0x30] sm:$0xff] }
 0x3aa   : > { %v1801_v24 = vshrl.u32 %v1783_v6, %v1799_v35  ;;  %v1804_v63 = vadd.s32 127, %v1803_v28  ;;  %vm1930_vm4 = vcmp.eq.s32.totalorder %v1925_v36, 2  ;;  %vm1927_vm0 = vcmp.eq.s32.totalorder %v1925_v36, 0 }
 0x3ac   : > { %v1802_v37 = vor.u32 %v1801_v24, %v1800_v34  ;;  %v1805_v56 = vshll.u32 %v1804_v63, 23  ;;  %v6466_v34 = vadd.f32 %v1706_v5, %v5467_v58  ;;  %v6640_v5 = vld [vmem:[%s7286_s5] sm:$0xff] }
 0x3ad   : > { %7637 = vst [vmem:[#allocation35_spill] sm:$0xff] %v6640_v5 }
 0x3ae   : > { %v1806_v32 = vor.u32 4788187, %v1805_v56  ;;  %v1809_v0 = vcvt.s32.f32 %v1802_v37 }
 0x3b0   : > { %v1807_v11 = vand.u32 2147483647, %v1806_v32 }
 0x3b2   : > { %v1810_v3 = vmul.f32 %v1809_v0, %v1807_v11 }
 0x3b4   : > { %v1811_v16 = vxor.u32 2147483648, %v1810_v3 }
 0x3b6   : > { %v1812_v31 = vsel %vm1729_vm5, %v1811_v16, %v1810_v3  ;;  %vm1821_vm5 = vcmp.lt.s32.totalorder %v1820_v2, 2  ;;  %v6486_v3 = vld [vmem:[%s7286_s5 + $0x70] sm:$0xff]  ;;  %v6497_v16 = vld [vmem:[%s7286_s5 + $0x68] sm:$0xff] }
 0x3b7   : > { %v1815_v47 = vsel %vm1728_vm6, %v6431_v39, %v1812_v31  ;;  %vm1926_vm6 = vcmp.lt.s32.totalorder %v1925_v36, 2  ;;  %v6530_v31 = vld [vmem:[%s7286_s5 + $0x50] sm:$0xff]  ;;  %v6585_v2 = vld [vmem:[%s7286_s5 + $0x28] sm:$0xff]  ;;  %v6596_v36 = vld [vmem:[%s7286_s5 + $0x20] sm:$0xff] }
 0x3b8   : > { %4933 = vcosq.f32 %v1815_v47  ;;  %7627 = vst [vmem:[#allocation38_spill] sm:$0xff] %v6585_v2  ;;  %7629 = vst [vmem:[#allocation40_spill] sm:$0xff] %v6596_v36 }
 0x3b9   : > { %4935 = vsinq.f32 %v1815_v47  ;;  %v6541_v47 = vld [vmem:[%s7286_s5 + $0x48] sm:$0xff] }
 0x3c5   : > { %v4934_v38 = vpop.eup %4933 }
 0x3c6   : > { %v4936_v43 = vpop.eup %4935  ;;  %v1826_v30 = vxor.u32 2147483648, %v4934_v38 }
 0x3c7   : > { %v1823_v4 = vxor.u32 2147483648, %v4936_v43 }
 0x3c8   : > { %v1827_v6 = vsel %vm1825_vm3, %v1826_v30, %v4936_v43  ;;  %v1932_v35 = vsel %vm1930_vm4, %v1826_v30, %v4936_v43  ;;  %vm7630_vm3 = vnez %v7542_v59  ;;  %vm7632_vm4 = vnez %v7545_v19  ;;  %v6618_v43 = vld [vmem:[%s7286_s5 + $0x10] sm:$0xff]  ;;  %v6629_v30 = vld [vmem:[%s7286_s5 + $0x8] sm:$0xff] }
 0x3c9   : > { %v1824_v50 = vsel %vm1822_vm11, %v4934_v38, %v1823_v4  ;;  %v1929_v28 = vsel %vm1927_vm0, %v4934_v38, %v1823_v4  ;;  %vm7624_vm0 = vcmask 1040384   ;;  %vm7626_vm11 = vnez %v7537_v20  ;;  %v6607_v38 = vld [vmem:[%s7286_s5 + $0x18] sm:$0xff]  ;;  %7633 = vst [vmem:[#allocation36_spill] sm:$0xff] %v6618_v43  ;;  %7635 = vst [vmem:[#allocation34_spill] sm:$0xff] %v6629_v30  ;;  %v7640_v4 = vld [vmem:[#allocation21_spill] sm:$0xff] }
 0x3ca   : > { %v1828_v24 = vsel %vm1821_vm5, %v1824_v50, %v1827_v6  ;;  %v1933_v63 = vsel %vm1926_vm6, %v1929_v28, %v1932_v35  ;;  %7631 = vst [vmem:[#allocation37_spill] sm:$0xff] %v6607_v38  ;;  %vm7634_vm5 = vnez %v7548_v53  ;;  %vm7636_vm6 = vnez %v7551_v27  ;;  %v7641_v6 = vld [vmem:[#allocation23_spill] sm:$0xff]  ;;  %v4093_v35 = vld [vmem:[%s7293_s12 + $0x20] sm:$0xff] }
 0x3cb   : > { %v1829_v37 = vsel %vm1819_vm8, nan, %v1828_v24  ;;  %v1934_v29 = vsel %vm1819_vm8, nan, %v1933_v63  ;;  %vm7625_vm8 = vnez %v7577_v49 }
 0x3cc   : > { %v6470_v56 = vmul.f32 %v1934_v29, %v6466_v34  ;;  %v6473_v32 = vmul.f32 %v1829_v37, %v6466_v34 }
 0x3ce   : > { %v1940_v11 = vrot.slane %v6470_v56, %v5458_v55 }
 0x3d0   : > { %v1942_v0 = vsel %vm7624_vm0, %v6473_v32, %v1940_v11  ;;  %vm7638_vm0 = vnez %v7554_v1 }
 0x3d1   : > { %v1943_v58 = vpack.c.bf16 %v1942_v0, %v1942_v0 }
 0x3d3   : > { %4534 = vmatmul.mubr.bf16.vlgmr.msra.gmra.mxu1 %v1943_v58  ;;  %4554 = vmatmul.mubr.bf16.vlgmr.msra.gmra.mxu0 %v1943_v58 }
 0x3d4   : > { %4558 = vmatpush3.msk.msra.mxu1 %vm7599_vm12, %v6416_v17  ;;  %4589 = vmatprep.mubr.f32.mxu1 %v6367_v57 }
 0x3d5   : > { %4559 = vmatprep.subr.msk.mxu1 %vm7596_vm15, %v6486_v3 }
 0x3d6   : > { %4560 = vmatpush3.msk.msra.mxu1 %vm7596_vm15, %v6486_v3 }
 0x3d7   : > { %4561 = vmatprep.subr.msk.mxu1 %vm7593_vm7, %v6497_v16 }
 0x3d8   : > { %4562 = vmatpush3.msk.msra.mxu1 %vm7593_vm7, %v6497_v16 }
 0x3d9   : > { %4563 = vmatprep.subr.msk.mxu1 %vm7590_vm2, %v6508_v41 }
 0x3da   : > { %4564 = vmatpush3.msk.msra.mxu1 %vm7590_vm2, %v6508_v41 }
 0x3db   : > { %4565 = vmatprep.subr.msk.mxu1 %vm7587_vm10, %v6519_v14 }
 0x3dc   : > { %4566 = vmatpush3.msk.msra.mxu1 %vm7587_vm10, %v6519_v14 }
 0x3dd   : > { %4567 = vmatprep.subr.msk.mxu1 %vm7584_vm14, %v6530_v31 }
 0x3de   : > { %4568 = vmatpush3.msk.msra.mxu1 %vm7584_vm14, %v6530_v31 }
 0x3df   : > { %4569 = vmatprep.subr.msk.mxu1 %vm5695_vm13, %v6541_v47 }
 0x3e0   : > { %4570 = vmatpush3.msk.msra.mxu1 %vm5695_vm13, %v6541_v47 }
 0x3e1   : > { %4571 = vmatprep.subr.msk.mxu1 %vm5709_vm1, %v6552_v62 }
 0x3e2   : > { %4572 = vmatpush3.msk.msra.mxu1 %vm5709_vm1, %v6552_v62 }
 0x3e3   : > { %4573 = vmatprep.subr.msk.mxu1 %vm7625_vm8, %v6563_v22 }
 0x3e4   : > { %4574 = vmatpush3.msk.msra.mxu1 %vm7625_vm8, %v6563_v22 }
 0x3e5   : > { %4575 = vmatprep.subr.msk.mxu1 %vm7626_vm11, %v6574_v8 }
 0x3e6   : > { %4576 = vmatpush3.msk.msra.mxu1 %vm7626_vm11, %v6574_v8 }
 0x3e7   : > { %4577 = vmatprep.subr.msk.mxu1 %vm7628_vm9, %v6585_v2 }
 0x3e8   : > { %4578 = vmatpush3.msk.msra.mxu1 %vm7628_vm9, %v6585_v2 }
 0x3e9   : > { %4579 = vmatprep.subr.msk.mxu1 %vm7630_vm3, %v6596_v36 }
 0x3ea   : > { %4580 = vmatpush3.msk.msra.mxu1 %vm7630_vm3, %v6596_v36 }
 0x3eb   : > { %4581 = vmatprep.subr.msk.mxu1 %vm7632_vm4, %v6607_v38 }
 0x3ec   : > { %4582 = vmatpush3.msk.msra.mxu1 %vm7632_vm4, %v6607_v38 }
 0x3ed   : > { %4583 = vmatprep.subr.msk.mxu1 %vm7634_vm5, %v6618_v43 }
 0x3ee   : > { %4584 = vmatpush3.msk.msra.mxu1 %vm7634_vm5, %v6618_v43 }
 0x3ef   : > { %4585 = vmatprep.subr.msk.mxu1 %vm7636_vm6, %v6629_v30 }
 0x3f0   : > { %4586 = vmatpush3.msk.msra.mxu1 %vm7636_vm6, %v6629_v30  ;;  %vm7639_vm6 = vmmov 0  }
 0x3f1   : > { %4587 = vmatprep.subr.msk.mxu1 %vm7638_vm0, %v6640_v5 }
 0x3f2   : > { %4588 = vmatpush3.msk.msra.mxu1 %vm7638_vm0, %v6640_v5  ;;  %vm7642_vm0 = vcmask 261120  }
 0x3f3   : > { %4590 = vmatmul.mubr.f32.vlgmr.msra.gmra.mxu1 %v6361_v54  ;;  %4640 = vmatprep.subr.bf16.mxu1 %v7575_v45  ;;  %vm7644_vm5 = vmmov %vm7642_vm0 }
 0x3f4   : > { %4592 = vmatprep.mubr.f32.mxu1 %v6380_v18  ;;  %4641 = vmatpush3.bf16.msra.mxu1 %v5279_v9  ;;  %vm7645_vm4 = vmmov %vm7642_vm0 }
 0x3f5   : > { %4642 = vmatprep.subr.bf16.mxu1 %v7575_v45  ;;  %4603 = vmatprep.mubr.msk.f32.mxu0 %vm7642_vm0, %v4093_v35 }
 0x3f7   : > { %4593 = vmatmul.mubr.f32.gmra.mxu1 %v6373_v42 }
 0x3f8   : > { %4643 = vmatpush3.bf16.msra.mxu1 %v5302_v15  ;;  %4656 = vmatprep.mubr.msk.bf16.mxu1 %vm7639_vm6, %v7575_v45 }
 0x3f9   : > { %4644 = vmatprep.subr.bf16.mxu1 %v7575_v45 }
 0x3fc   : > { %4645 = vmatpush3.bf16.msra.mxu1 %v5342_v26 }
 0x3fd   : > { %4646 = vmatprep.subr.bf16.mxu1 %v7575_v45 }
 0x400   : > { %4647 = vmatpush3.bf16.msra.mxu1 %v5371_v33 }
 0x401   : > { %4648 = vmatprep.subr.bf16.mxu1 %v7575_v45 }
 0x404   : > { %4649 = vmatpush3.bf16.msra.mxu1 %v5401_v40 }
 0x405   : > { %4650 = vmatprep.subr.bf16.mxu1 %v7575_v45 }
 0x408   : > { %4651 = vmatpush3.bf16.msra.mxu1 %v5432_v48 }
 0x409   : > { %4652 = vmatprep.subr.bf16.mxu1 %v7575_v45 }
 0x40c   : > { %4653 = vmatpush3.bf16.msra.mxu1 %v7640_v4 }
 0x40d   : > { %4654 = vmatprep.subr.bf16.mxu1 %v7575_v45 }
 0x410   : > { %4655 = vmatpush3.bf16.msra.mxu1 %v7641_v6 }
 0x493   : > { %v1978_v50 = vpop.f32.mrf.mxu1  ;;  %v2018_v28 = vpop.f32.mrf.mxu0 }
 0x494   : > { %v2025_v24 = vrot.slane %v2018_v28, 1  ;;  %v2028_v63 = vrot.slane %v2018_v28, 7 }
 0x495   : > { %v4535_v37 = vpop.f32.mrf.mxu1  ;;  %v4555_v29 = vpop.f32.mrf.mxu0 }
 0x496   : > { %v2027_v11 = vsub.f32 %v1978_v50, %v2025_v24  ;;  %v2030_v0 = vadd.f32 %v2028_v63, %v1978_v50  ;;  %v7643_v29 = vld [vmem:[#allocation41_spill] sm:$0xff] }
 0x497   : > { %v1981_v58 = vpop.f32.mrf.mxu1  ;;  %v2021_v4 = vpop.f32.mrf.mxu0 }
 0x498   : > { %v2039_v48 = vrot.slane %v2030_v0, %v6251_v21  ;;  %v2031_v15 = vmul.f32 %v2027_v11, %v6473_v32  ;;  %v2051_v9 = vmul.f32 %v2027_v11, %v6470_v56 }
 0x499   : > { %v4536_v40 = vpop.f32.mrf.mxu1  ;;  %v4556_v6 = vpop.f32.mrf.mxu0 }
 0x49a   : > { %v2040_v33 = vcombine.high %v2039_v48, %v2039_v48  ;;  %v2170_v6 = vpop.permute.xlu0 %2169 }
 0x49c   : > { %v2047_v26 = vrot.slane %v2040_v33, %v6251_v21 }
 0x49e   : > { %v2049_v35 = vmul.f32 %v2047_v26, %v6470_v56  ;;  %v2052_v28 = vmul.f32 %v2047_v26, %v6473_v32  ;;  %v4096_v26 = vld [vmem:[%s7293_s12 + $0x38] sm:$0xff]  ;;  %v2175_v32 = vpop.permute.xlu1 %2174  ;;  %v2165_v58 = vpop.permute.xlu0 %2164 }
 0x4a0   : > { %v2050_v37 = vadd.f32 %v2049_v35, %v2031_v15  ;;  %v2053_v24 = vsub.f32 %v2051_v9, %v2052_v28  ;;  %v4094_v9 = vld [vmem:[%s7293_s12 + $0x28] sm:$0xff]  ;;  %v4095_v15 = vld [vmem:[%s7293_s12 + $0x30] sm:$0xff]  ;;  %v6699_v35 = vld [vmem:[%s6064_s21] sm:$0x1] }
 0x4a1   : > { %7646 = vst [vmem:[#allocation32_spill] sm:$0xff] %v6699_v35 }
 0x4a2   : > { %v2307_v11 = vpop.permute.xlu1 %2306  ;;  %v2054_v28 = vsub.f32 %v6699_v35, %v2050_v37 }
 0x4b3   : > { %v4591_v50 = vpop.f32.mrf.mxu1 }
 0x4b4   : > { %v2144_v33 = vmul.f32 %v7643_v29, %v4591_v50  ;;  %v2302_v50 = vpop.permute.xlu1 %2301 }
 0x4b5   : > { %v2124_v63 = vpop.f32.mrf.mxu1 }
 0x4b6   : > { %v2143_v56 = vmul.f32 %v7643_v29, %v2124_v63  ;;  %v6703_v63 = vld [vmem:[%s6055_s23] sm:$0x1] }
 0x4b7   : > { %v4594_v4 = vpop.f32.mrf.mxu1  ;;  %7647 = vst [vmem:[#allocation33_spill] sm:$0xff] %v6703_v63 }
 0x4b8   : > { %v2146_v0 = vmul.f32 %v7643_v29, %v4594_v4  ;;  %v2056_v4 = vsub.f32 %v6703_v63, %v2053_v24 }
 0x4b9   : > { %v2134_v40 = vpop.f32.mrf.mxu1 }
 0x4ba   : > { %v2145_v48 = vmul.f32 %v7643_v29, %v2134_v40  ;;  %4595 = vmatprep.subr.mxu0 %v2146_v0 }
 0x4bb   : > { %4596 = vmatpush3.msra.mxu0 %v2146_v0  ;;  %v2160_v0 = vpop.permute.xlu0 %2159 }
 0x4bc   : > { %4597 = vmatprep.subr.mxu0 %v2145_v48 }
 0x4bd   : > { %4598 = vmatpush3.msra.mxu0 %v2145_v48  ;;  %v7649_v48 = vld [vmem:[#allocation50_spill] sm:$0xff] }
 0x4be   : > { %4599 = vmatprep.subr.mxu0 %v2144_v33 }
 0x4bf   : > { %4600 = vmatpush3.msra.mxu0 %v2144_v33 }
 0x4c0   : > { %4601 = vmatprep.subr.mxu0 %v2143_v56 }
 0x4c1   : > { %4602 = vmatpush3.msra.mxu0 %v2143_v56  ;;  %v2297_v56 = vpop.permute.xlu1 %2296 }
 0x4c2   : > { %4604 = vmatmul.mubr.msk.f32.vlgmr.msra.gmra.mxu0 %vm7642_vm0, %v4094_v9  ;;  %4609 = vmatprep.subr.mxu0 %v7575_v45 }
 0x4c3   : > { %4606 = vmatprep.mubr.msk.f32.mxu0 %vm7644_vm5, %v4095_v15  ;;  %vm7648_vm5 = vcmp.eq.s32.totalorder %v5416_v44, 1 }
 0x4c4   : > { %v2055_v40 = vsel %vm7648_vm5, 0.0, %v2054_v28 }
 0x4c5   : > { %v2181_v9 = vrot.slane %v2055_v40, %v5458_v55  ;;  %v2292_v35 = vpop.permute.xlu1 %2291 }
 0x4c6   : > { %4607 = vmatmul.mubr.msk.f32.gmra.mxu0 %vm7645_vm4, %v4096_v26  ;;  %vm7650_vm4 = vnez %v7649_v48  ;;  %v2346_v26 = vpop.permute.xlu0 %2345 }
 0x4c7   : > { %4617 = vmatprep.mubr.msk.f32.mxu0 %vm7639_vm6, %v7575_v45  ;;  %v2057_v33 = vsel %vm7650_vm4, 0.0, %v2056_v4  ;;  %v2184_v29 = vmul.f32 %v2181_v9, %v2165_v58  ;;  %v2183_v27 = vmul.f32 %v2181_v9, %v2160_v0  ;;  %v2186_v28 = vmul.f32 %v2181_v9, %v2175_v32 }
 0x4c8   : > { %v2313_v15 = vrot.slane %v2057_v33, %v5458_v55  ;;  %v2185_v40 = vmul.f32 %v2181_v9, %v2170_v6  ;;  %v7659_v6 = vld [vmem:[#allocation39_spill] sm:$0xff] }
 0x4c9   : > { %v2336_v33 = vpop.permute.xlu1 %2335 }
 0x4ca   : > { %v2316_v5 = vmul.f32 %v2313_v15, %v2297_v56  ;;  %v2315_v53 = vmul.f32 %v2313_v15, %v2292_v35  ;;  %v2341_v43 = vpop.permute.xlu0 %2340  ;;  %v2318_v38 = vmul.f32 %v2313_v15, %v2307_v11  ;;  %v2317_v60 = vmul.f32 %v2313_v15, %v2302_v50 }
 0x4ce   : > { %v2331_v0 = vpop.permute.xlu0 %2330 }
 0x582   : > { %v4605_v37 = vpop.f32.mrf.mxu0 }
 0x583   : > { %v2271_v1 = vadd.f32 %v4605_v37, %v2184_v29 }
 0x584   : > { %v2265_v24 = vpop.f32.mrf.mxu0 }
 0x585   : > { %v2320_v63 = vadd.f32 %v2316_v5, %v2271_v1  ;;  %v2266_v30 = vadd.f32 %v2265_v24, %v2183_v27 }
 0x586   : > { %v4608_v48 = vpop.f32.mrf.mxu0 }
 0x587   : > { %v2319_v4 = vadd.f32 %v2315_v53, %v2266_v30  ;;  %v2281_v19 = vadd.f32 %v4608_v48, %v2186_v28  ;;  %v2349_v2 = vadd.f32 %v2336_v33, %v2320_v63 }
 0x588   : > { %v2275_v59 = vpop.f32.mrf.mxu0 }
 0x589   : > { %v2322_v36 = vadd.f32 %v2318_v38, %v2281_v19  ;;  %v2276_v58 = vadd.f32 %v2275_v59, %v2185_v40  ;;  %v2348_v37 = vadd.f32 %v2331_v0, %v2319_v4  ;;  %v7657_v38 = vld [vmem:[#allocation22_spill] sm:$0xff] }
 0x58b   : > { %v2351_v29 = vadd.f32 %v2346_v26, %v2322_v36  ;;  %v2321_v56 = vadd.f32 %v2317_v60, %v2276_v58  ;;  %v7656_v36 = vld [vmem:[#allocation20_spill] sm:$0xff] }
 0x58d   : > { %4937 = vtanh.f32 %v2351_v29  ;;  %v2350_v27 = vadd.f32 %v2341_v43, %v2321_v56  ;;  %v7658_v43 = vld [vmem:[#allocation24_spill] sm:$0xff] }
 0x58e   : > { %4939 = vtanh.f32 %v2349_v2  ;;  %v7654_v2 = vld [vmem:[#allocation16_spill] sm:$0xff] }
 0x58f   : > { %4941 = vtanh.f32 %v2350_v27  ;;  %v7660_v27 = vmov 2475754826  }
 0x590   : > { %4943 = vtanh.f32 %v2348_v37 }
 0x59a   : > { %v4938_v1 = vpop.eup %4937 }
 0x59b   : > { %v4940_v53 = vpop.eup %4939  ;;  %v6713_v30 = vadd.f32 %v4938_v1, %v6373_v42 }
 0x59c   : > { %v4942_v5 = vpop.eup %4941  ;;  %v6722_v60 = vadd.f32 %v4940_v53, %v6361_v54  ;;  %v7652_v54 = vld [vmem:[#allocation12_spill] sm:$0xff]  ;;  %v7661_v53 = vmov 2131351028  }
 0x59d   : > { %4610 = vmatpush3.msra.mxu0 %v6713_v30  ;;  %v6717_v59 = vadd.f32 %v4942_v5, %v6380_v18  ;;  %v4944_v19 = vpop.eup %4943  ;;  %v7651_v18 = vld [vmem:[#allocation10_spill] sm:$0xff] }
 0x59e   : > { %4611 = vmatprep.subr.mxu0 %v7575_v45  ;;  %v6727_v42 = vadd.f32 %v4944_v19, %v6367_v57  ;;  %v7653_v57 = vld [vmem:[#allocation14_spill] sm:$0xff] }
 0x59f   : > { %4612 = vmatpush3.msra.mxu0 %v6717_v59 }
 0x5a0   : > { %4613 = vmatprep.subr.mxu0 %v7575_v45 }
 0x5a1   : > { %4614 = vmatpush3.msra.mxu0 %v6722_v60 }
 0x5a2   : > { %4615 = vmatprep.subr.mxu0 %v7575_v45 }
 0x5a3   : > { %4616 = vmatpush3.msra.mxu0 %v6727_v42 }
 0x5a4   : > { %4618 = vmatmul.mubr.msk.f32.vlgmr.msra.gmra.mxu0 %vm7642_vm0, %v6389_v51  ;;  %4620 = vmatprep.subr.bf16.mxu0 %v7575_v45  ;;  %v7655_v51 = vld [vmem:[#allocation18_spill] sm:$0xff] }
 0x5a5   : > { %4621 = vmatpush3.bf16.msra.mxu0 %v7651_v18  ;;  %4636 = vmatprep.mubr.msk.bf16.mxu0 %vm7639_vm6, %v7575_v45 }
 0x5a6   : > { %4622 = vmatprep.subr.bf16.mxu0 %v7575_v45 }
 0x5a9   : > { %4623 = vmatpush3.bf16.msra.mxu0 %v7652_v54 }
 0x5aa   : > { %4624 = vmatprep.subr.bf16.mxu0 %v7575_v45 }
 0x5ad   : > { %4625 = vmatpush3.bf16.msra.mxu0 %v7653_v57 }
 0x5ae   : > { %4626 = vmatprep.subr.bf16.mxu0 %v7575_v45 }
 0x5b1   : > { %4627 = vmatpush3.bf16.msra.mxu0 %v7654_v2 }
 0x5b2   : > { %4628 = vmatprep.subr.bf16.mxu0 %v7575_v45 }
 0x5b5   : > { %4629 = vmatpush3.bf16.msra.mxu0 %v7655_v51 }
 0x5b6   : > { %4630 = vmatprep.subr.bf16.mxu0 %v7575_v45 }
 0x5b9   : > { %4631 = vmatpush3.bf16.msra.mxu0 %v7656_v36 }
 0x5ba   : > { %4632 = vmatprep.subr.bf16.mxu0 %v7575_v45 }
 0x5bd   : > { %4633 = vmatpush3.bf16.msra.mxu0 %v7657_v38 }
 0x5be   : > { %4634 = vmatprep.subr.bf16.mxu0 %v7575_v45 }
 0x5c1   : > { %4635 = vmatpush3.bf16.msra.mxu0 %v7658_v43 }
 0x5c2   : > { %4660 = vmatprep.subr.msk.mxu0 %vm7599_vm12, %v6416_v17 }
 0x664   : > { %v2426_v32 = vpop.f32.mrf.mxu0 }
 0x665   : > { %v6755_v11 = vadd.f32 %v2426_v32, %v7659_v6  ;;  %v7662_v32 = vmov 2102212464  }
 0x666   : > { %v4619_v35 = vpop.f32.mrf.mxu0 }
 0x667   : > { %v2439_v50 = vrot.slane %v6755_v11, %v6251_v21 }
 0x669   : > { %v2440_v63 = vcombine.high %v2439_v50, %v2439_v50 }
 0x66b   : > { %v2447_v48 = vrot.slane %v2440_v63, %v6251_v21  ;;  %v7663_v63 = vmov 920167782  }
 0x66d   : > { %v2449_v9 = vsel %vm7648_vm5, 0.0, %v2447_v48 }
 0x66e   : > { %v6763_v15 = vadd.f32 %v2449_v9, %v6431_v39 }
 0x670   : > { %v2454_v26 = vand.u32 2139095040, %v6763_v15  ;;  %v7450_v40 = vand.u32 2147483647, %v6763_v15  ;;  %vm2543_vm8 = vweird.f32 %v6763_v15 }
 0x672   : > { %v2455_v24 = vshrl.u32 %v2454_v26, 23  ;;  %v2458_v29 = vand.u32 8388607, %v7450_v40  ;;  %v7664_v26 = vmov 1326507024  }
 0x674   : > { %v4114_v28 = vadd.s32 4294967169, %v2455_v24 }
 0x676   : > { %v2461_v4 = vadd.s32 1, %v4114_v28  ;;  %v2459_v28 = vor.u32 8388608, %v2458_v29 }
 0x678   : > { %vm2462_vm0 = vcmp.gt.s32.totalorder %v2461_v4, 0 }
 0x679   : > { %v2463_v33 = vsel %vm2462_vm0, %v2461_v4, 0 }
 0x67a   : > { %v2465_v58 = vand.u32 31, %v2463_v33  ;;  %v2464_v0 = vshrl.u32 %v2463_v33, 5 }
 0x67c   : > { %v2466_v56 = vsub.s32 32, %v2465_v58  ;;  %v2468_v37 = vshll.u32 %v7621_v13, %v2465_v58  ;;  %v2471_v39 = vshll.u32 %v7660_v27, %v2465_v58  ;;  %v2474_v19 = vshll.u32 %v7661_v53, %v2465_v58 }
 0x67d   : > { %v2477_v50 = vshll.u32 %v7662_v32, %v2465_v58  ;;  %v2480_v9 = vshll.u32 %v7663_v63, %v2465_v58  ;;  %vm2483_vm5 = vcmp.lt.s32.totalorder %v2464_v0, 1  ;;  %vm2486_vm0 = vcmp.lt.s32.totalorder %v2464_v0, 4 }
 0x67e   : > { %v2469_v1 = vshrl.u32 %v7660_v27, %v2466_v56  ;;  %v2472_v5 = vshrl.u32 %v7661_v53, %v2466_v56  ;;  %v2475_v35 = vshrl.u32 %v7662_v32, %v2466_v56  ;;  %v2478_v48 = vshrl.u32 %v7663_v63, %v2466_v56 }
 0x67f   : > { %v2481_v24 = vshrl.u32 %v7664_v26, %v2466_v56  ;;  %v2467_v36 = vshrl.u32 %v7621_v13, %v2466_v56  ;;  %vm2485_vm4 = vcmp.lt.s32.totalorder %v2464_v0, 3  ;;  %vm2484_vm6 = vcmp.lt.s32.totalorder %v2464_v0, 2 }
 0x680   : > { %v2470_v4 = vor.u32 %v2469_v1, %v2468_v37  ;;  %v2473_v33 = vor.u32 %v2472_v5, %v2471_v39  ;;  %v2476_v40 = vor.u32 %v2475_v35, %v2474_v19  ;;  %v2479_v6 = vor.u32 %v2478_v48, %v2477_v50 }
 0x681   : > { %v2482_v27 = vor.u32 %v2481_v24, %v2480_v9  ;;  %v2499_v26 = vshll.u32 %v2459_v28, 8 }
 0x682   : > { %v2488_v43 = vsel %vm2486_vm0, %v2476_v40, 2102212464  ;;  %v2491_v53 = vsel %vm2483_vm5, %v2470_v4, %v2473_v33  ;;  %v2495_v38 = vsel %vm2483_vm5, %v2473_v33, %v2476_v40  ;;  %v2492_v32 = vsel %vm2486_vm0, %v2479_v6, 920167782 }
 0x683   : > { %v2496_v51 = vsel %vm2486_vm0, %v2482_v27, 1326507024  ;;  %v2493_v58 = vsel %vm2485_vm4, %v2476_v40, %v2492_v32  ;;  %v2487_v29 = vsel %vm2483_vm5, %v2467_v36, %v2470_v4  ;;  %v2489_v37 = vsel %vm2485_vm4, %v2473_v33, %v2488_v43 }
 0x684   : > { %v2497_v63 = vsel %vm2485_vm4, %v2479_v6, %v2496_v51  ;;  %v2494_v39 = vsel %vm2484_vm6, %v2491_v53, %v2493_v58  ;;  %v2490_v48 = vsel %vm2484_vm6, %v2487_v29, %v2489_v37  ;;  %vm7666_vm5 = vcmp.eq.s32.totalorder %v5416_v44, 3 }
 0x685   : > { %v2498_v1 = vsel %vm2484_vm6, %v2495_v38, %v2497_v63  ;;  %v6783_v35 = vmul.u32.u64.low %v2499_v26, %v2494_v39  ;;  %v6784_v50 = vmul.u32.u64.high %v2499_v26, %v2494_v39, %v6783_v35  ;;  %v2506_v27 = vmul.u32 %v2499_v26, %v2490_v48 }
 0x686   : > { %v6780_v5 = vmul.u32.u64.low %v2499_v26, %v2498_v1  ;;  %v6781_v19 = vmul.u32.u64.high %v2499_v26, %v2498_v1, %v6780_v5 }
 0x687   : > { %v2509_v56 = vadd.s32 1, %v6784_v50 }
 0x688   : > { %vm2508_vm3 = vc.u32 %v6781_v19, %v6783_v35  ;;  %v2507_v24 = vadd.s32 %v6783_v35, %v6781_v19 }
 0x689   : > { %v2510_v40 = vsel %vm2508_vm3, %v2509_v56, %v6784_v50  ;;  %vm2453_vm3 = vcmp.lt.s32.totalorder %v6763_v15, 0 }
 0x68a   : > { %v2511_v51 = vadd.s32 %v2510_v40, %v2506_v27  ;;  %v7665_v27 = vand.u32 2147483647, %v6763_v15 }
 0x68c   : > { %v2512_v6 = vadd.s32 536870912, %v2511_v51  ;;  %vm2452_vm6 = vcmp.le.f32.partialorder %v7665_v27, 0.7853982  ;;  %v7689_v27 = vld [vmem:[#allocation11_spill] sm:$0xff] }
 0x68e   : > { %v2513_v36 = vshrl.u32 %v2512_v6, 30 }
 0x690   : > { %v2514_v43 = vshll.u32 %v2513_v36, 30  ;;  %v2537_v56 = vsub.s32 4, %v2513_v36 }
 0x692   : > { %v2515_v0 = vsub.s32 %v2511_v51, %v2514_v43  ;;  %v2538_v35 = vsel %vm2453_vm3, %v2537_v56, %v2513_v36  ;;  %v7688_v56 = vld [vmem:[#allocation9_spill] sm:$0xff] }
 0x693   : > { %v2540_v51 = vsel %vm2452_vm6, 0, %v2538_v35  ;;  %v7693_v35 = vld [vmem:[#allocation17_spill] sm:$0xff] }
 0x694   : > { %v2517_v38 = vsub.s32 0, %v2515_v0  ;;  %v2648_v6 = vadd.s32 3, %v2540_v51  ;;  %v2544_v43 = vand.u32 3, %v2540_v51  ;;  %v7694_v51 = vld [vmem:[#allocation19_spill] sm:$0xff] }
 0x696   : > { %v4115_v53 = vmin.u32 %v2517_v38, %v2515_v0  ;;  %vm2549_vm0 = vcmp.eq.s32.totalorder %v2544_v43, 2  ;;  %vm2546_vm9 = vcmp.eq.s32.totalorder %v2544_v43, 0 }
 0x698   : > { %v2519_v32 = vclz %v4115_v53 }
 0x69a   : > { %v4116_v63 = vadd.s32 4294967294, %v2519_v32 }
 0x69c   : > { %vm4117_vm4 = vcmp.lt.s32.totalorder %v4116_v63, 0 }
 0x69d   : > { %v2522_v9 = vsel %vm4117_vm4, 0, %v4116_v63  ;;  %v2430_v63 = vsel %vm7666_vm5, %v6755_v11, 0.0 }
 0x69e   : > { %v2523_v28 = vsub.s32 32, %v2522_v9  ;;  %v2527_v4 = vsub.s32 4294967266, %v2522_v9  ;;  %v2524_v33 = vshll.u32 %v2515_v0, %v2522_v9  ;;  %v2649_v0 = vand.u32 3, %v2648_v6  ;;  %v7695_v6 = vld [vmem:[#allocation21_spill] sm:$0xff] }
 0x6a0   : > { %v2525_v58 = vshrl.u32 %v2507_v24, %v2523_v28  ;;  %v2528_v26 = vadd.s32 127, %v2527_v4  ;;  %vm2654_vm4 = vcmp.eq.s32.totalorder %v2649_v0, 2  ;;  %vm2651_vm11 = vcmp.eq.s32.totalorder %v2649_v0, 0 }
 0x6a2   : > { %v2526_v29 = vor.u32 %v2525_v58, %v2524_v33  ;;  %v2529_v37 = vshll.u32 %v2528_v26, 23  ;;  %v6798_v33 = vadd.f32 %v2430_v63, %v6466_v34 }
 0x6a4   : > { %v2530_v39 = vor.u32 4788187, %v2529_v37  ;;  %v2533_v5 = vcvt.s32.f32 %v2526_v29 }
 0x6a6   : > { %v2531_v1 = vand.u32 2147483647, %v2530_v39 }
 0x6a8   : > { %v2534_v50 = vmul.f32 %v2533_v5, %v2531_v1 }
 0x6aa   : > { %v2535_v48 = vxor.u32 2147483648, %v2534_v50 }
 0x6ac   : > { %v2536_v40 = vsel %vm2453_vm3, %v2535_v48, %v2534_v50  ;;  %vm2545_vm3 = vcmp.lt.s32.totalorder %v2544_v43, 2  ;;  %v7685_v50 = vld [vmem:[#allocation35_spill] sm:$0xff] }
 0x6ad   : > { %v2539_v19 = vsel %vm2452_vm6, %v6763_v15, %v2536_v40  ;;  %vm2650_vm6 = vcmp.lt.s32.totalorder %v2649_v0, 2  ;;  %v7686_v48 = vld [vmem:[#allocation47_spill] sm:$0xff]  ;;  %v7691_v40 = vld [vmem:[#allocation13_spill] sm:$0xff] }
 0x6ae   : > { %4945 = vcosq.f32 %v2539_v19  ;;  %v7696_v43 = vld [vmem:[#allocation23_spill] sm:$0xff]  ;;  %v4138_v0 = vld [vmem:[%s7293_s12 + $0x40] sm:$0xff] }
 0x6af   : > { %4947 = vsinq.f32 %v2539_v19  ;;  %v7692_v19 = vld [vmem:[#allocation15_spill] sm:$0xff] }
 0x6bb   : > { %v4946_v38 = vpop.eup %4945 }
 0x6bc   : > { %v4948_v53 = vpop.eup %4947  ;;  %v2550_v32 = vxor.u32 2147483648, %v4946_v38 }
 0x6bd   : > { %v2547_v9 = vxor.u32 2147483648, %v4948_v53 }
 0x6be   : > { %v2551_v24 = vsel %vm2549_vm0, %v2550_v32, %v4948_v53  ;;  %v2656_v28 = vsel %vm2654_vm4, %v2550_v32, %v4948_v53 }
 0x6bf   : > { %v2548_v36 = vsel %vm2546_vm9, %v4946_v38, %v2547_v9  ;;  %v2653_v4 = vsel %vm2651_vm11, %v4946_v38, %v2547_v9  ;;  %vm7667_vm11 = vcmask 1040384   ;;  %vm7669_vm9 = vnez %v7537_v20 }
 0x6c0   : > { %v2552_v58 = vsel %vm2545_vm3, %v2548_v36, %v2551_v24  ;;  %v2657_v26 = vsel %vm2650_vm6, %v2653_v4, %v2656_v28 }
 0x6c1   : > { %v2553_v29 = vsel %vm2543_vm8, nan, %v2552_v58  ;;  %v2658_v11 = vsel %vm2543_vm8, nan, %v2657_v26  ;;  %vm7668_vm8 = vnez %v7577_v49 }
 0x6c2   : > { %v6802_v37 = vmul.f32 %v2658_v11, %v6798_v33  ;;  %v6805_v39 = vmul.f32 %v2553_v29, %v6798_v33 }
 0x6c4   : > { %v2664_v1 = vrot.slane %v6802_v37, %v5458_v55 }
 0x6c6   : > { %v2666_v5 = vsel %vm7667_vm11, %v6805_v39, %v2664_v1  ;;  %vm7687_vm11 = vnez %v7686_v48 }
 0x6c7   : > { %v2667_v34 = vpack.c.bf16 %v2666_v5, %v2666_v5 }
 0x6c9   : > { %4637 = vmatmul.mubr.bf16.vlgmr.msra.gmra.mxu0 %v2667_v34  ;;  %4657 = vmatmul.mubr.bf16.vlgmr.msra.gmra.mxu1 %v2667_v34 }
 0x6ca   : > { %4661 = vmatpush3.msk.msra.mxu0 %vm7599_vm12, %v6416_v17  ;;  %4692 = vmatprep.mubr.f32.mxu0 %v6727_v42  ;;  %v7670_v17 = vld [vmem:[#allocation38_spill] sm:$0xff] }
 0x6cb   : > { %4662 = vmatprep.subr.msk.mxu0 %vm7596_vm15, %v6486_v3 }
 0x6cc   : > { %4663 = vmatpush3.msk.msra.mxu0 %vm7596_vm15, %v6486_v3  ;;  %v7671_v3 = vld [vmem:[#allocation42_spill] sm:$0xff] }
 0x6cd   : > { %4664 = vmatprep.subr.msk.mxu0 %vm7593_vm7, %v6497_v16  ;;  %vm7672_vm5 = vnez %v7671_v3 }
 0x6ce   : > { %4665 = vmatpush3.msk.msra.mxu0 %vm7593_vm7, %v6497_v16  ;;  %v7673_v16 = vld [vmem:[#allocation40_spill] sm:$0xff] }
 0x6cf   : > { %4666 = vmatprep.subr.msk.mxu0 %vm7590_vm2, %v6508_v41 }
 0x6d0   : > { %4667 = vmatpush3.msk.msra.mxu0 %vm7590_vm2, %v6508_v41  ;;  %v7674_v41 = vld [vmem:[#allocation43_spill] sm:$0xff] }
 0x6d1   : > { %4668 = vmatprep.subr.msk.mxu0 %vm7587_vm10, %v6519_v14  ;;  %vm7675_vm0 = vnez %v7674_v41 }
 0x6d2   : > { %4669 = vmatpush3.msk.msra.mxu0 %vm7587_vm10, %v6519_v14  ;;  %v7676_v14 = vld [vmem:[#allocation37_spill] sm:$0xff] }
 0x6d3   : > { %4670 = vmatprep.subr.msk.mxu0 %vm7584_vm14, %v6530_v31 }
 0x6d4   : > { %4671 = vmatpush3.msk.msra.mxu0 %vm7584_vm14, %v6530_v31  ;;  %v7677_v31 = vld [vmem:[#allocation44_spill] sm:$0xff] }
 0x6d5   : > { %4672 = vmatprep.subr.msk.mxu0 %vm5695_vm13, %v6541_v47  ;;  %vm7678_vm4 = vnez %v7677_v31 }
 0x6d6   : > { %4673 = vmatpush3.msk.msra.mxu0 %vm5695_vm13, %v6541_v47  ;;  %v7679_v47 = vld [vmem:[#allocation36_spill] sm:$0xff] }
 0x6d7   : > { %4674 = vmatprep.subr.msk.mxu0 %vm5709_vm1, %v6552_v62 }
 0x6d8   : > { %4675 = vmatpush3.msk.msra.mxu0 %vm5709_vm1, %v6552_v62  ;;  %v7680_v62 = vld [vmem:[#allocation45_spill] sm:$0xff] }
 0x6d9   : > { %4676 = vmatprep.subr.msk.mxu0 %vm7668_vm8, %v6563_v22  ;;  %vm7681_vm3 = vnez %v7680_v62 }
 0x6da   : > { %4677 = vmatpush3.msk.msra.mxu0 %vm7668_vm8, %v6563_v22  ;;  %v7682_v22 = vld [vmem:[#allocation34_spill] sm:$0xff] }
 0x6db   : > { %4678 = vmatprep.subr.msk.mxu0 %vm7669_vm9, %v6574_v8 }
 0x6dc   : > { %4679 = vmatpush3.msk.msra.mxu0 %vm7669_vm9, %v6574_v8  ;;  %v7683_v8 = vld [vmem:[#allocation46_spill] sm:$0xff] }
 0x6dd   : > { %4680 = vmatprep.subr.msk.mxu0 %vm7672_vm5, %v7670_v17  ;;  %vm7684_vm6 = vnez %v7683_v8 }
 0x6de   : > { %4681 = vmatpush3.msk.msra.mxu0 %vm7672_vm5, %v7670_v17 }
 0x6df   : > { %4682 = vmatprep.subr.msk.mxu0 %vm7675_vm0, %v7673_v16 }
 0x6e0   : > { %4683 = vmatpush3.msk.msra.mxu0 %vm7675_vm0, %v7673_v16 }
 0x6e1   : > { %4684 = vmatprep.subr.msk.mxu0 %vm7678_vm4, %v7676_v14 }
 0x6e2   : > { %4685 = vmatpush3.msk.msra.mxu0 %vm7678_vm4, %v7676_v14 }
 0x6e3   : > { %4686 = vmatprep.subr.msk.mxu0 %vm7681_vm3, %v7679_v47 }
 0x6e4   : > { %4687 = vmatpush3.msk.msra.mxu0 %vm7681_vm3, %v7679_v47 }
 0x6e5   : > { %4688 = vmatprep.subr.msk.mxu0 %vm7684_vm6, %v7682_v22 }
 0x6e6   : > { %4689 = vmatpush3.msk.msra.mxu0 %vm7684_vm6, %v7682_v22  ;;  %vm7690_vm6 = vmmov 0  }
 0x6e7   : > { %4690 = vmatprep.subr.msk.mxu0 %vm7687_vm11, %v7685_v50 }
 0x6e8   : > { %4691 = vmatpush3.msk.msra.mxu0 %vm7687_vm11, %v7685_v50  ;;  %vm7697_vm11 = vcmask 261120  }
 0x6e9   : > { %4693 = vmatmul.mubr.f32.vlgmr.msra.gmra.mxu0 %v6722_v60  ;;  %4743 = vmatprep.subr.bf16.mxu0 %v7575_v45  ;;  %vm7699_vm3 = vmmov %vm7697_vm11 }
 0x6ea   : > { %4695 = vmatprep.mubr.f32.mxu0 %v6717_v59  ;;  %4744 = vmatpush3.bf16.msra.mxu0 %v7688_v56  ;;  %vm7700_vm4 = vmmov %vm7699_vm3 }
 0x6eb   : > { %4745 = vmatprep.subr.bf16.mxu0 %v7575_v45  ;;  %4706 = vmatprep.mubr.msk.f32.mxu1 %vm7697_vm11, %v4138_v0  ;;  %v4141_v0 = vld [vmem:[%s7293_s12 + $0x58] sm:$0xff] }
 0x6ed   : > { %4696 = vmatmul.mubr.f32.gmra.mxu0 %v6713_v30 }
 0x6ee   : > { %4746 = vmatpush3.bf16.msra.mxu0 %v7689_v27  ;;  %4759 = vmatprep.mubr.msk.bf16.mxu0 %vm7690_vm6, %v7575_v45 }
 0x6ef   : > { %4747 = vmatprep.subr.bf16.mxu0 %v7575_v45 }
 0x6f2   : > { %4748 = vmatpush3.bf16.msra.mxu0 %v7691_v40  ;;  %v7698_v40 = vld [vmem:[#allocation41_spill] sm:$0xff] }
 0x6f3   : > { %4749 = vmatprep.subr.bf16.mxu0 %v7575_v45 }
 0x6f6   : > { %4750 = vmatpush3.bf16.msra.mxu0 %v7692_v19 }
 0x6f7   : > { %4751 = vmatprep.subr.bf16.mxu0 %v7575_v45 }
 0x6fa   : > { %4752 = vmatpush3.bf16.msra.mxu0 %v7693_v35 }
 0x6fb   : > { %4753 = vmatprep.subr.bf16.mxu0 %v7575_v45 }
 0x6fe   : > { %4754 = vmatpush3.bf16.msra.mxu0 %v7694_v51 }
 0x6ff   : > { %4755 = vmatprep.subr.bf16.mxu0 %v7575_v45 }
 0x702   : > { %4756 = vmatpush3.bf16.msra.mxu0 %v7695_v6 }
 0x703   : > { %4757 = vmatprep.subr.bf16.mxu0 %v7575_v45 }
 0x706   : > { %4758 = vmatpush3.bf16.msra.mxu0 %v7696_v43  ;;  %v4140_v43 = vld [vmem:[%s7293_s12 + $0x50] sm:$0xff] }
 0x789   : > { %v2702_v38 = vpop.f32.mrf.mxu0  ;;  %v2742_v53 = vpop.f32.mrf.mxu1 }
 0x78a   : > { %v2749_v32 = vrot.slane %v2742_v53, 1  ;;  %v2752_v63 = vrot.slane %v2742_v53, 7  ;;  %v2894_v53 = vpop.permute.xlu0 %2893 }
 0x78b   : > { %v4638_v9 = vpop.f32.mrf.mxu0  ;;  %v4658_v24 = vpop.f32.mrf.mxu1 }
 0x78c   : > { %v2751_v28 = vsub.f32 %v2702_v38, %v2749_v32  ;;  %v2754_v36 = vadd.f32 %v2752_v63, %v2702_v38  ;;  %v2899_v38 = vpop.permute.xlu1 %2898  ;;  %v7701_v9 = vld [vmem:[#allocation32_spill] sm:$0xff] }
 0x78d   : > { %v2705_v4 = vpop.f32.mrf.mxu0  ;;  %v2745_v58 = vpop.f32.mrf.mxu1 }
 0x78e   : > { %v2763_v26 = vrot.slane %v2754_v36, %v6251_v21  ;;  %v2755_v34 = vmul.f32 %v2751_v28, %v6805_v39  ;;  %v2775_v16 = vmul.f32 %v2751_v28, %v6802_v37  ;;  %v2889_v63 = vpop.permute.xlu0 %2888  ;;  %v7702_v36 = vld [vmem:[#allocation33_spill] sm:$0xff] }
 0x78f   : > { %v4639_v29 = vpop.f32.mrf.mxu0  ;;  %v4659_v11 = vpop.f32.mrf.mxu1 }
 0x790   : > { %v2764_v1 = vcombine.high %v2763_v26, %v2763_v26  ;;  %v3031_v32 = vpop.permute.xlu1 %3030  ;;  %v7704_v29 = vld [vmem:[#allocation50_spill] sm:$0xff] }
 0x792   : > { %v2771_v5 = vrot.slane %v2764_v1, %v6251_v21  ;;  %v2884_v58 = vpop.permute.xlu0 %2883 }
 0x794   : > { %v2773_v17 = vmul.f32 %v2771_v5, %v6802_v37  ;;  %v2776_v14 = vmul.f32 %v2771_v5, %v6805_v39  ;;  %v4139_v39 = vld [vmem:[%s7293_s12 + $0x48] sm:$0xff]  ;;  %v3026_v28 = vpop.permute.xlu1 %3025 }
 0x796   : > { %v2774_v47 = vadd.f32 %v2773_v17, %v2755_v34  ;;  %v2777_v22 = vsub.f32 %v2775_v16, %v2776_v14  ;;  %v3070_v17 = vpop.permute.xlu0 %3069 }
 0x798   : > { %v2778_v24 = vsub.f32 %v7701_v9, %v2774_v47  ;;  %v2780_v4 = vsub.f32 %v7702_v36, %v2777_v22  ;;  %v3021_v1 = vpop.permute.xlu1 %3020 }
 0x7a9   : > { %v4694_v50 = vpop.f32.mrf.mxu0 }
 0x7aa   : > { %v2868_v6 = vmul.f32 %v7698_v40, %v4694_v50  ;;  %v3016_v50 = vpop.permute.xlu1 %3015 }
 0x7ab   : > { %v2848_v56 = vpop.f32.mrf.mxu0 }
 0x7ac   : > { %v2867_v37 = vmul.f32 %v7698_v40, %v2848_v56 }
 0x7ad   : > { %v4697_v27 = vpop.f32.mrf.mxu0 }
 0x7ae   : > { %v2870_v19 = vmul.f32 %v7698_v40, %v4697_v27 }
 0x7af   : > { %v2858_v35 = vpop.f32.mrf.mxu0 }
 0x7b0   : > { %v2869_v51 = vmul.f32 %v7698_v40, %v2858_v35  ;;  %4698 = vmatprep.subr.mxu1 %v2870_v19 }
 0x7b1   : > { %4699 = vmatpush3.msra.mxu1 %v2870_v19 }
 0x7b2   : > { %4700 = vmatprep.subr.mxu1 %v2869_v51 }
 0x7b3   : > { %4701 = vmatpush3.msra.mxu1 %v2869_v51 }
 0x7b4   : > { %4702 = vmatprep.subr.mxu1 %v2868_v6 }
 0x7b5   : > { %4703 = vmatpush3.msra.mxu1 %v2868_v6 }
 0x7b6   : > { %4704 = vmatprep.subr.mxu1 %v2867_v37 }
 0x7b7   : > { %4705 = vmatpush3.msra.mxu1 %v2867_v37  ;;  %v3065_v37 = vpop.permute.xlu0 %3064 }
 0x7b8   : > { %4707 = vmatmul.mubr.msk.f32.vlgmr.msra.gmra.mxu1 %vm7697_vm11, %v4139_v39  ;;  %4712 = vmatprep.subr.mxu1 %v7575_v45  ;;  %vm7705_vm11 = vnez %v7704_v29 }
 0x7b9   : > { %4709 = vmatprep.mubr.msk.f32.mxu1 %vm7699_vm3, %v4140_v43  ;;  %vm7703_vm3 = vcmp.eq.s32.totalorder %v5416_v44, 1  ;;  %v2781_v11 = vsel %vm7705_vm11, 0.0, %v2780_v4  ;;  %v3060_v4 = vpop.permute.xlu1 %3059 }
 0x7ba   : > { %v2779_v26 = vsel %vm7703_vm3, 0.0, %v2778_v24  ;;  %v3037_v34 = vrot.slane %v2781_v11, %v5458_v55 }
 0x7bb   : > { %v2905_v5 = vrot.slane %v2779_v26, %v5458_v55 }
 0x7bc   : > { %4710 = vmatmul.mubr.msk.f32.gmra.mxu1 %vm7700_vm4, %v4141_v0  ;;  %v3040_v56 = vmul.f32 %v3037_v34, %v3021_v1  ;;  %v3039_v51 = vmul.f32 %v3037_v34, %v3016_v50  ;;  %v3042_v9 = vmul.f32 %v3037_v34, %v3031_v32  ;;  %v3041_v11 = vmul.f32 %v3037_v34, %v3026_v28  ;;  %v7710_v34 = vld [vmem:[#allocation39_spill] sm:$0xff] }
 0x7bd   : > { %4720 = vmatprep.mubr.msk.f32.mxu1 %vm7690_vm6, %v7575_v45  ;;  %v2908_v16 = vmul.f32 %v2905_v5, %v2889_v63  ;;  %v2907_v27 = vmul.f32 %v2905_v5, %v2884_v58  ;;  %v2910_v6 = vmul.f32 %v2905_v5, %v2899_v38  ;;  %v2909_v24 = vmul.f32 %v2905_v5, %v2894_v53  ;;  %v3055_v58 = vpop.permute.xlu0 %3054 }
 0x878   : > { %v4708_v14 = vpop.f32.mrf.mxu1 }
 0x879   : > { %v2995_v47 = vadd.f32 %v4708_v14, %v2908_v16 }
 0x87a   : > { %v2989_v22 = vpop.f32.mrf.mxu1 }
 0x87b   : > { %v3044_v19 = vadd.f32 %v3040_v56, %v2995_v47  ;;  %v2990_v35 = vadd.f32 %v2989_v22, %v2907_v27 }
 0x87c   : > { %v4711_v39 = vpop.f32.mrf.mxu1 }
 0x87d   : > { %v3043_v43 = vadd.f32 %v3039_v51, %v2990_v35  ;;  %v3005_v0 = vadd.f32 %v4711_v39, %v2910_v6  ;;  %v3073_v29 = vadd.f32 %v3060_v4, %v3044_v19 }
 0x87e   : > { %v2999_v36 = vpop.f32.mrf.mxu1 }
 0x87f   : > { %v3046_v26 = vadd.f32 %v3042_v9, %v3005_v0  ;;  %v3000_v63 = vadd.f32 %v2999_v36, %v2909_v24  ;;  %v3072_v14 = vadd.f32 %v3055_v58, %v3043_v43 }
 0x881   : > { %v3075_v16 = vadd.f32 %v3070_v17, %v3046_v26  ;;  %v3045_v1 = vadd.f32 %v3041_v11, %v3000_v63  ;;  %v7711_v11 = vmov 2475754826  }
 0x883   : > { %4949 = vtanh.f32 %v3075_v16  ;;  %v3074_v47 = vadd.f32 %v3065_v37, %v3045_v1  ;;  %v7712_v1 = vmov 2131351028  }
 0x884   : > { %4951 = vtanh.f32 %v3073_v29 }
 0x885   : > { %4953 = vtanh.f32 %v3074_v47  ;;  %v7713_v47 = vmov 2102212464  }
 0x886   : > { %4955 = vtanh.f32 %v3072_v14 }
 0x890   : > { %v4950_v38 = vpop.eup %4949 }
 0x891   : > { %v4952_v50 = vpop.eup %4951  ;;  %v6964_v32 = vadd.f32 %v4950_v38, %v6713_v30 }
 0x892   : > { %v4954_v53 = vpop.eup %4953  ;;  %v6973_v29 = vadd.f32 %v4952_v50, %v6722_v60  ;;  %v7706_v60 = vld [vmem:[#allocation18_spill] sm:$0xff] }
 0x893   : > { %4713 = vmatpush3.msra.mxu1 %v6964_v32  ;;  %v6968_v28 = vadd.f32 %v4954_v53, %v6717_v59  ;;  %v4956_v5 = vpop.eup %4955  ;;  %v6985_v59 = vld [vmem:[%s7297_s16] sm:$0x3]  ;;  %v7714_v53 = vmov 920167782  }
 0x894   : > { %4714 = vmatprep.subr.mxu1 %v7575_v45  ;;  %v6978_v30 = vadd.f32 %v4956_v5, %v6727_v42  ;;  %v7707_v42 = vld [vmem:[#allocation20_spill] sm:$0xff] }
 0x895   : > { %4715 = vmatpush3.msra.mxu1 %v6968_v28 }
 0x896   : > { %4716 = vmatprep.subr.mxu1 %v7575_v45 }
 0x897   : > { %4717 = vmatpush3.msra.mxu1 %v6973_v29 }
 0x898   : > { %4718 = vmatprep.subr.mxu1 %v7575_v45 }
 0x899   : > { %4719 = vmatpush3.msra.mxu1 %v6978_v30 }
 0x89a   : > { %4721 = vmatmul.mubr.msk.f32.vlgmr.msra.gmra.mxu1 %vm7700_vm4, %v6985_v59  ;;  %4723 = vmatprep.subr.bf16.mxu1 %v7575_v45 }
 0x89b   : > { %4724 = vmatpush3.bf16.msra.mxu1 %v7651_v18  ;;  %4739 = vmatprep.mubr.msk.bf16.mxu1 %vm7690_vm6, %v7575_v45  ;;  %v7708_v18 = vld [vmem:[#allocation22_spill] sm:$0xff] }
 0x89c   : > { %4725 = vmatprep.subr.bf16.mxu1 %v7575_v45 }
 0x89f   : > { %4726 = vmatpush3.bf16.msra.mxu1 %v7652_v54  ;;  %v7709_v54 = vld [vmem:[#allocation24_spill] sm:$0xff] }
 0x8a0   : > { %4727 = vmatprep.subr.bf16.mxu1 %v7575_v45 }
 0x8a3   : > { %4728 = vmatpush3.bf16.msra.mxu1 %v7653_v57  ;;  %v7010_v57 = vld [vmem:[%s7286_s5 + $0x78] sm:$0xff] }
 0x8a4   : > { %4729 = vmatprep.subr.bf16.mxu1 %v7575_v45 }
 0x8a7   : > { %4730 = vmatpush3.bf16.msra.mxu1 %v7654_v2 }
 0x8a8   : > { %4731 = vmatprep.subr.bf16.mxu1 %v7575_v45 }
 0x8ab   : > { %4732 = vmatpush3.bf16.msra.mxu1 %v7706_v60 }
 0x8ac   : > { %4733 = vmatprep.subr.bf16.mxu1 %v7575_v45 }
 0x8af   : > { %4734 = vmatpush3.bf16.msra.mxu1 %v7707_v42  ;;  %v7715_v42 = vmov 1326507024  }
 0x8b0   : > { %4735 = vmatprep.subr.bf16.mxu1 %v7575_v45 }
 0x8b3   : > { %4736 = vmatpush3.bf16.msra.mxu1 %v7708_v18 }
 0x8b4   : > { %4737 = vmatprep.subr.bf16.mxu1 %v7575_v45 }
 0x8b7   : > { %4738 = vmatpush3.bf16.msra.mxu1 %v7709_v54 }
 0x8b8   : > { %4763 = vmatprep.subr.msk.mxu1 %vm7599_vm12, %v7010_v57 }
 0x95a   : > { %v3150_v2 = vpop.f32.mrf.mxu1 }
 0x95b   : > { %v7016_v17 = vadd.f32 %v3150_v2, %v7710_v34 }
 0x95c   : > { %v4722_v56 = vpop.f32.mrf.mxu1 }
 0x95d   : > { %v3163_v27 = vrot.slane %v7016_v17, %v6251_v21 }
 0x95f   : > { %v3164_v22 = vcombine.high %v3163_v27, %v3163_v27 }
 0x961   : > { %v3171_v19 = vrot.slane %v3164_v22, %v6251_v21 }
 0x963   : > { %v3173_v35 = vsel %vm7703_vm3, 0.0, %v3171_v19 }
 0x964   : > { %v7024_v51 = vadd.f32 %v3173_v35, %v6763_v15 }
 0x966   : > { %v3178_v6 = vand.u32 2139095040, %v7024_v51  ;;  %v3175_v0 = vand.u32 2147483647, %v7024_v51  ;;  %vm3267_vm8 = vweird.f32 %v7024_v51 }
 0x968   : > { %v3179_v37 = vshrl.u32 %v3178_v6, 23  ;;  %v3182_v36 = vand.u32 8388607, %v3175_v0 }
 0x96a   : > { %v4159_v39 = vadd.s32 4294967169, %v3179_v37  ;;  %v3183_v54 = vor.u32 8388608, %v3182_v36 }
 0x96c   : > { %v3185_v43 = vadd.s32 1, %v4159_v39 }
 0x96e   : > { %vm3186_vm4 = vcmp.gt.s32.totalorder %v3185_v43, 0 }
 0x96f   : > { %v3187_v9 = vsel %vm3186_vm4, %v3185_v43, 0 }
 0x970   : > { %v3189_v24 = vand.u32 31, %v3187_v9  ;;  %v3188_v26 = vshrl.u32 %v3187_v9, 5 }
 0x972   : > { %v3190_v4 = vsub.s32 32, %v3189_v24  ;;  %v3192_v63 = vshll.u32 %v7621_v13, %v3189_v24  ;;  %v3195_v15 = vshll.u32 %v7711_v11, %v3189_v24  ;;  %v3198_v14 = vshll.u32 %v7712_v1, %v3189_v24 }
 0x973   : > { %v3201_v50 = vshll.u32 %v7713_v47, %v3189_v24  ;;  %v3204_v60 = vshll.u32 %v7714_v53, %v3189_v24  ;;  %vm3207_vm3 = vcmp.lt.s32.totalorder %v3188_v26, 1  ;;  %vm3210_vm4 = vcmp.lt.s32.totalorder %v3188_v26, 4 }
 0x974   : > { %v3193_v16 = vshrl.u32 %v7711_v11, %v3190_v4  ;;  %v3196_v58 = vshrl.u32 %v7712_v1, %v3190_v4  ;;  %v3199_v38 = vshrl.u32 %v7713_v47, %v3190_v4  ;;  %v3202_v5 = vshrl.u32 %v7714_v53, %v3190_v4 }
 0x975   : > { %v3205_v18 = vshrl.u32 %v7715_v42, %v3190_v4  ;;  %v3191_v39 = vshrl.u32 %v7621_v13, %v3190_v4  ;;  %vm3209_vm11 = vcmp.lt.s32.totalorder %v3188_v26, 3  ;;  %vm3208_vm6 = vcmp.lt.s32.totalorder %v3188_v26, 2 }
 0x976   : > { %v3194_v2 = vor.u32 %v3193_v16, %v3192_v63  ;;  %v3197_v56 = vor.u32 %v3196_v58, %v3195_v15  ;;  %v3200_v27 = vor.u32 %v3199_v38, %v3198_v14  ;;  %v3203_v22 = vor.u32 %v3202_v5, %v3201_v50 }
 0x977   : > { %v3206_v19 = vor.u32 %v3205_v18, %v3204_v60  ;;  %v3223_v1 = vshll.u32 %v3183_v54, 8 }
 0x978   : > { %v3212_v35 = vsel %vm3210_vm4, %v3200_v27, 2102212464  ;;  %v3215_v6 = vsel %vm3207_vm3, %v3194_v2, %v3197_v56  ;;  %v3219_v37 = vsel %vm3207_vm3, %v3197_v56, %v3200_v27  ;;  %v3216_v43 = vsel %vm3210_vm4, %v3203_v22, 920167782 }
 0x979   : > { %v3220_v9 = vsel %vm3210_vm4, %v3206_v19, 1326507024  ;;  %v3217_v24 = vsel %vm3209_vm11, %v3200_v27, %v3216_v43  ;;  %v3211_v36 = vsel %vm3207_vm3, %v3191_v39, %v3194_v2  ;;  %v3213_v63 = vsel %vm3209_vm11, %v3197_v56, %v3212_v35 }
 0x97a   : > { %v3221_v11 = vsel %vm3209_vm11, %v3203_v22, %v3220_v9  ;;  %v3218_v15 = vsel %vm3208_vm6, %v3215_v6, %v3217_v24  ;;  %v3214_v50 = vsel %vm3208_vm6, %v3211_v36, %v3213_v63  ;;  %vm7716_vm3 = vcmp.eq.s32.totalorder %v5416_v44, 3 }
 0x97b   : > { %v3222_v16 = vsel %vm3208_vm6, %v3219_v37, %v3221_v11  ;;  %v7044_v47 = vmul.u32.u64.low %v3223_v1, %v3218_v15  ;;  %v7045_v38 = vmul.u32.u64.high %v3223_v1, %v3218_v15, %v7044_v47  ;;  %v3230_v4 = vmul.u32 %v3223_v1, %v3214_v50 }
 0x97c   : > { %v7041_v58 = vmul.u32.u64.low %v3223_v1, %v3222_v16  ;;  %v7042_v14 = vmul.u32.u64.high %v3223_v1, %v3222_v16, %v7041_v58  ;;  %vm3176_vm6 = vcmp.le.f32.partialorder %v3175_v0, 0.7853982 }
 0x97d   : > { %v3233_v13 = vadd.s32 1, %v7045_v38 }
 0x97e   : > { %vm3232_vm0 = vc.u32 %v7042_v14, %v7044_v47  ;;  %v3231_v19 = vadd.s32 %v7044_v47, %v7042_v14 }
 0x97f   : > { %v3234_v26 = vsel %vm3232_vm0, %v3233_v13, %v7045_v38  ;;  %vm3177_vm0 = vcmp.lt.s32.totalorder %v7024_v51, 0 }
 0x980   : > { %v3235_v53 = vadd.s32 %v3234_v26, %v3230_v4 }
 0x982   : > { %v3236_v5 = vadd.s32 536870912, %v3235_v53 }
 0x984   : > { %v3237_v60 = vshrl.u32 %v3236_v5, 30 }
 0x986   : > { %v3238_v42 = vshll.u32 %v3237_v60, 30  ;;  %v3261_v16 = vsub.s32 4, %v3237_v60 }
 0x988   : > { %v3239_v18 = vsub.s32 %v3235_v53, %v3238_v42  ;;  %v3262_v47 = vsel %vm3177_vm0, %v3261_v16, %v3237_v60  ;;  %v3154_v42 = vsel %vm7716_vm3, %v7016_v17, 0.0 }
 0x989   : > { %v3264_v38 = vsel %vm3176_vm6, 0, %v3262_v47 }
 0x98a   : > { %v3241_v54 = vsub.s32 0, %v3239_v18  ;;  %v3372_v50 = vadd.s32 3, %v3264_v38  ;;  %v3268_v13 = vand.u32 3, %v3264_v38 }
 0x98c   : > { %v4160_v2 = vmin.u32 %v3241_v54, %v3239_v18  ;;  %v3373_v4 = vand.u32 3, %v3372_v50  ;;  %vm3273_vm4 = vcmp.eq.s32.totalorder %v3268_v13, 2  ;;  %vm3270_vm5 = vcmp.eq.s32.totalorder %v3268_v13, 0 }
 0x98e   : > { %v3243_v56 = vclz %v4160_v2  ;;  %vm3375_vm9 = vcmp.eq.s32.totalorder %v3373_v4, 0 }
 0x990   : > { %v4161_v27 = vadd.s32 4294967294, %v3243_v56  ;;  %v7059_v56 = vadd.f32 %v3154_v42, %v6798_v33 }
 0x992   : > { %vm4162_vm11 = vcmp.lt.s32.totalorder %v4161_v27, 0 }
 0x993   : > { %v3246_v22 = vsel %vm4162_vm11, 0, %v4161_v27  ;;  %vm3378_vm11 = vcmp.eq.s32.totalorder %v3373_v4, 2 }
 0x994   : > { %v3247_v35 = vsub.s32 32, %v3246_v22  ;;  %v3251_v6 = vsub.s32 4294967266, %v3246_v22  ;;  %v3248_v37 = vshll.u32 %v3239_v18, %v3246_v22 }
 0x996   : > { %v3249_v39 = vshrl.u32 %v3231_v19, %v3247_v35  ;;  %v3252_v43 = vadd.s32 127, %v3251_v6 }
 0x998   : > { %v3250_v9 = vor.u32 %v3249_v39, %v3248_v37  ;;  %v3253_v24 = vshll.u32 %v3252_v43, 23  ;;  %v4989_v43 = vld [vmem:[%s7286_s5 + $0x70] sm:$0xff] }
 0x99a   : > { %v3254_v11 = vor.u32 4788187, %v3253_v24  ;;  %v3257_v36 = vcvt.s32.f32 %v3250_v9  ;;  %v4990_v9 = vld [vmem:[%s7286_s5 + $0x68] sm:$0xff] }
 0x99c   : > { %v3255_v1 = vand.u32 2147483647, %v3254_v11 }
 0x99e   : > { %v3258_v63 = vmul.f32 %v3257_v36, %v3255_v1 }
 0x9a0   : > { %v3259_v15 = vxor.u32 2147483648, %v3258_v63 }
 0x9a2   : > { %v3260_v58 = vsel %vm3177_vm0, %v3259_v15, %v3258_v63  ;;  %vm3269_vm0 = vcmp.lt.s32.totalorder %v3268_v13, 2 }
 0x9a3   : > { %v3263_v14 = vsel %vm3176_vm6, %v7024_v51, %v3260_v58  ;;  %vm3374_vm6 = vcmp.lt.s32.totalorder %v3373_v4, 2 }
 0x9a4   : > { %4957 = vcosq.f32 %v3263_v14 }
 0x9a5   : > { %4959 = vsinq.f32 %v3263_v14 }
 0x9b1   : > { %v4958_v26 = vpop.eup %4957 }
 0x9b2   : > { %v4960_v53 = vpop.eup %4959  ;;  %v3274_v5 = vxor.u32 2147483648, %v4958_v26 }
 0x9b3   : > { %v3271_v18 = vxor.u32 2147483648, %v4960_v53 }
 0x9b4   : > { %v3275_v0 = vsel %vm3273_vm4, %v3274_v5, %v4960_v53  ;;  %v3380_v54 = vsel %vm3378_vm11, %v3274_v5, %v4960_v53  ;;  %vm7730_vm11 = vmmov 0  }
 0x9b5   : > { %v3272_v60 = vsel %vm3270_vm5, %v4958_v26, %v3271_v18  ;;  %v3377_v2 = vsel %vm3375_vm9, %v4958_v26, %v3271_v18  ;;  %vm7717_vm9 = vcmask 1040384  }
 0x9b6   : > { %v3276_v27 = vsel %vm3269_vm0, %v3272_v60, %v3275_v0  ;;  %v3381_v22 = vsel %vm3374_vm6, %v3377_v2, %v3380_v54  ;;  %vm7731_vm0 = vcmp.eq.s32.totalorder %v5416_v44, 1 }
 0x9b7   : > { %v3277_v19 = vsel %vm3267_vm8, nan, %v3276_v27  ;;  %v3382_v17 = vsel %vm3267_vm8, nan, %v3381_v22  ;;  %vm7726_vm8 = vcmask 261120  }
 0x9b8   : > { %v7063_v35 = vmul.f32 %v3382_v17, %v7059_v56  ;;  %v7066_v6 = vmul.f32 %v3277_v19, %v7059_v56  ;;  %v4184_v17 = vld [vmem:[%s7293_s12 + $0x68] sm:$0xff]  ;;  %vm7727_vm5 = vmmov %vm7726_vm8 }
 0x9b9   : > { %vm7728_vm3 = vmmov %vm7727_vm5 }
 0x9ba   : > { %v3388_v37 = vrot.slane %v7063_v35, %v5458_v55  ;;  %vm7729_vm4 = vmmov %vm7728_vm3 }
 0x9bc   : > { %v3390_v39 = vsel %vm7717_vm9, %v7066_v6, %v3388_v37  ;;  %v3618_v37 = vpop.permute.xlu0 %3617  ;;  %vm7734_vm9 = vmmov %vm7728_vm3 }
 0x9bd   : > { %v3391_v33 = vpack.c.bf16 %v3390_v39, %v3390_v39 }
 0x9bf   : > { %4740 = vmatmul.mubr.bf16.vlgmr.msra.gmra.mxu1 %v3391_v33  ;;  %4760 = vmatmul.mubr.bf16.vlgmr.msra.gmra.mxu0 %v3391_v33 }
 0x9c0   : > { %4764 = vmatpush3.msk.msra.mxu1 %vm7599_vm12, %v7010_v57  ;;  %4795 = vmatprep.mubr.f32.mxu1 %v6978_v30  ;;  %vm7718_vm12 = vnez %v7577_v49  ;;  %v4999_v49 = vld [vmem:[%s7286_s5 + $0x20] sm:$0xff]  ;;  %v3613_v33 = vpop.permute.xlu0 %3612 }
 0x9c1   : > { %4765 = vmatprep.subr.msk.mxu1 %vm7596_vm15, %v4989_v43 }
 0x9c2   : > { %4766 = vmatpush3.msk.msra.mxu1 %vm7596_vm15, %v4989_v43  ;;  %vm7721_vm15 = vnez %v7674_v41  ;;  %v5002_v41 = vld [vmem:[%s7286_s5 + $0x8] sm:$0xff]  ;;  %v5004_v43 = vld [vmem:[%s6064_s21] sm:$0x1] }
 0x9c3   : > { %4767 = vmatprep.subr.msk.mxu1 %vm7593_vm7, %v4990_v9 }
 0x9c4   : > { %4768 = vmatpush3.msk.msra.mxu1 %vm7593_vm7, %v4990_v9  ;;  %vm7722_vm7 = vnez %v7677_v31  ;;  %v5003_v31 = vld [vmem:[%s7286_s5] sm:$0xff] }
 0x9c5   : > { %4769 = vmatprep.subr.msk.mxu1 %vm7590_vm2, %v4991_v46 }
 0x9c6   : > { %4770 = vmatpush3.msk.msra.mxu1 %vm7590_vm2, %v4991_v46  ;;  %vm7723_vm2 = vnez %v7680_v62  ;;  %v4183_v62 = vld [vmem:[%s7293_s12 + $0x60] sm:$0xff] }
 0x9c7   : > { %4771 = vmatprep.subr.msk.mxu1 %vm7587_vm10, %v4992_v7  ;;  %4809 = vmatprep.mubr.msk.f32.mxu0 %vm7726_vm8, %v4183_v62 }
 0x9c8   : > { %4772 = vmatpush3.msk.msra.mxu1 %vm7587_vm10, %v4992_v7  ;;  %vm7725_vm10 = vnez %v7686_v48  ;;  %v5005_v7 = vld [vmem:[%s6055_s23] sm:$0x1]  ;;  %s614_s23 = sand.u32 1, %s5058_s28  }
 0x9c9   : > { %4773 = vmatprep.subr.msk.mxu1 %vm7584_vm14, %v4993_v23  ;;  %s4023_s21 = sshll.u32 %s614_s23, 1  ;;  %s3908_s29 = scalar_lea.sflag [#allocation3], %s614_s23 }
 0x9ca   : > { %4774 = vmatpush3.msk.msra.mxu1 %vm7584_vm14, %v4993_v23  ;;  %vm7724_vm14 = vnez %v7683_v8  ;;  %s616_s25 = scalar_lea.vmem [#allocation2], %s4023_s21  ;;  %s5012_s21 = scalar_lea.vmem %s5011_s6, 64 }
 0x9cb   : > { %4775 = vmatprep.subr.msk.mxu1 %vm5695_vm13, %v4994_v52  ;;  %s3921_s20 = sshll.u32 %s616_s25, 4  ;;  %s3922_s20 = int_to_ptr.vmem [resolvable:$true] %s3921_s20 }
 0x9cc   : > { %4776 = vmatpush3.msk.msra.mxu1 %vm5695_vm13, %v4994_v52  ;;  %vm7719_vm13 = vnez %v7537_v20  ;;  %v5000_v20 = vld [vmem:[%s7286_s5 + $0x18] sm:$0xff]  ;;  %v3608_v52 = vpop.permute.xlu0 %3607  ;;  %s5006_s19 = scalar_lea.vmem %s3922_s20, 32  ;;  %p5013_p0 = scmp.lt.s32.totalorder %s3922_s20, %s5011_s6 }
 0x9cd   : > { %4777 = vmatprep.subr.msk.mxu1 %vm5709_vm1, %v4995_v61  ;;  %p5007_p11 = scmp.ne.s32.totalorder %s3922_s20, %s5006_s19  ;;  %p5014_p1 = scmp.lt.s32.totalorder %s5012_s21, %s5006_s19 }
 0x9ce   : > { %4778 = vmatpush3.msk.msra.mxu1 %vm5709_vm1, %v4995_v61  ;;  %vm7720_vm1 = vnez %v7671_v3  ;;  %v5001_v3 = vld [vmem:[%s7286_s5 + $0x10] sm:$0xff] }
 0x9cf   : > { %4779 = vmatprep.subr.msk.mxu1 %vm7718_vm12, %v4996_v10  ;;  %p5008_p12 = pnand %p5007_p11, %p5214_p5  ;;  %p5015_p2 = por %p5014_p1, %p5013_p0 }
 0x9d0   : > { %4780 = vmatpush3.msk.msra.mxu1 %vm7718_vm12, %v4996_v10  ;;  %v7732_v10 = vld [vmem:[#allocation50_spill] sm:$0xff]  ;;  %vm7735_vm12 = vcmp.eq.s32.totalorder %v5416_v44, 3 }
 0x9d1   : > { %4781 = vmatprep.subr.msk.mxu1 %vm7719_vm13, %v4997_v25  ;;  %vm7733_vm6 = vnez %v7732_v10  ;;  %p5009_p13 = pneg %p5008_p12 }
 0x9d2   : > { %4782 = vmatpush3.msk.msra.mxu1 %vm7719_vm13, %v4997_v25  ;;  %vm7736_vm13 = vmmov %vm7731_vm0 }
 0x9d3   : > { %4783 = vmatprep.subr.msk.mxu1 %vm7720_vm1, %v4998_v12  ;;  %p5016_p3 = pnand %p5015_p2, %p5009_p13 }
 0x9d4   : > { %4784 = vmatpush3.msk.msra.mxu1 %vm7720_vm1, %v4998_v12  ;;  %vm7737_vm1 = vcmask 1040384  }
 0x9d5   : > { %4785 = vmatprep.subr.msk.mxu1 %vm7721_vm15, %v4999_v49 }
 0x9d6   : > { %4786 = vmatpush3.msk.msra.mxu1 %vm7721_vm15, %v4999_v49 }
 0x9d7   : > { %4787 = vmatprep.subr.msk.mxu1 %vm7722_vm7, %v5000_v20 }
 0x9d8   : > { %4788 = vmatpush3.msk.msra.mxu1 %vm7722_vm7, %v5000_v20 }
 0x9d9   : > { %4789 = vmatprep.subr.msk.mxu1 %vm7723_vm2, %v5001_v3 }
 0x9da   : > { %4790 = vmatpush3.msk.msra.mxu1 %vm7723_vm2, %v5001_v3  ;;  %v3794_v3 = vpop.permute.xlu0 %3793 }
 0x9db   : > { %4791 = vmatprep.subr.msk.mxu1 %vm7724_vm14, %v5002_v41 }
 0x9dc   : > { %4792 = vmatpush3.msk.msra.mxu1 %vm7724_vm14, %v5002_v41 }
 0x9dd   : > { %4793 = vmatprep.subr.msk.mxu1 %vm7725_vm10, %v5003_v31 }
 0x9de   : > { %4794 = vmatpush3.msk.msra.mxu1 %vm7725_vm10, %v5003_v31 }
 0x9df   : > { %4796 = vmatmul.mubr.f32.vlgmr.msra.gmra.mxu1 %v6973_v29 }
 0x9e0   : > { %4798 = vmatprep.mubr.f32.mxu1 %v6968_v28 }
 0x9e3   : > { %4799 = vmatmul.mubr.f32.gmra.mxu1 %v6964_v32 }
 0xa7f   : > { %v3426_v8 = vpop.f32.mrf.mxu1  ;;  %v3466_v57 = vpop.f32.mrf.mxu0 }
 0xa80   : > { %v3473_v24 = vrot.slane %v3466_v57, 1  ;;  %v3476_v11 = vrot.slane %v3466_v57, 7 }
 0xa81   : > { %v4741_v1 = vpop.f32.mrf.mxu1  ;;  %v4761_v36 = vpop.f32.mrf.mxu0 }
 0xa82   : > { %v3475_v48 = vsub.f32 %v3426_v8, %v3473_v24  ;;  %v3478_v63 = vadd.f32 %v3476_v11, %v3426_v8 }
 0xa83   : > { %v3429_v15 = vpop.f32.mrf.mxu1  ;;  %v3469_v16 = vpop.f32.mrf.mxu0 }
 0xa84   : > { %v3487_v58 = vrot.slane %v3478_v63, %v6251_v21  ;;  %v3479_v13 = vmul.f32 %v3475_v48, %v7066_v6  ;;  %v3499_v26 = vmul.f32 %v3475_v48, %v7063_v35  ;;  %v3789_v15 = vpop.permute.xlu0 %3788 }
 0xa85   : > { %v4742_v14 = vpop.f32.mrf.mxu1  ;;  %v4762_v47 = vpop.f32.mrf.mxu0 }
 0xa86   : > { %v3488_v38 = vcombine.high %v3487_v58, %v3487_v58 }
 0xa88   : > { %v3495_v50 = vrot.slane %v3488_v38, %v6251_v21 }
 0xa8a   : > { %v3497_v4 = vmul.f32 %v3495_v50, %v7063_v35  ;;  %v3500_v53 = vmul.f32 %v3495_v50, %v7066_v6  ;;  %v4185_v35 = vld [vmem:[%s7293_s12 + $0x70] sm:$0xff]  ;;  %v3623_v6 = vpop.permute.xlu1 %3622 }
 0xa8c   : > { %v3498_v5 = vadd.f32 %v3497_v4, %v3479_v13  ;;  %v3501_v42 = vsub.f32 %v3499_v26, %v3500_v53 }
 0xa8e   : > { %v3755_v39 = vpop.permute.xlu1 %3754  ;;  %v3502_v9 = vsub.f32 %v5004_v43, %v3498_v5  ;;  %v3504_v23 = vsub.f32 %v5005_v7, %v3501_v42 }
 0xa90   : > { %v3503_v61 = vsel %vm7731_vm0, 0.0, %v3502_v9  ;;  %v3505_v25 = vsel %vm7733_vm6, 0.0, %v3504_v23 }
 0xa91   : > { %v3629_v49 = vrot.slane %v3503_v61, %v5458_v55  ;;  %v3761_v20 = vrot.slane %v3505_v25, %v5458_v55 }
 0xa92   : > { %v3750_v46 = vpop.permute.xlu1 %3749 }
 0xa93   : > { %v3632_v41 = vmul.f32 %v3629_v49, %v3613_v33  ;;  %v3631_v24 = vmul.f32 %v3629_v49, %v3608_v52  ;;  %v3634_v63 = vmul.f32 %v3629_v49, %v3623_v6  ;;  %v3766_v47 = vmul.f32 %v3761_v20, %v3755_v39 }
 0xa94   : > { %v3633_v38 = vmul.f32 %v3629_v49, %v3618_v37  ;;  %v3765_v53 = vmul.f32 %v3761_v20, %v3750_v46 }
 0xa96   : > { %v3745_v12 = vpop.permute.xlu1 %3744 }
 0xa97   : > { %v3764_v57 = vmul.f32 %v3761_v20, %v3745_v12 }
 0xa9a   : > { %v3740_v62 = vpop.permute.xlu1 %3739 }
 0xa9b   : > { %v3763_v48 = vmul.f32 %v3761_v20, %v3740_v62 }
 0xa9e   : > { %v3784_v13 = vpop.permute.xlu1 %3783 }
 0xa9f   : > { %v4797_v18 = vpop.f32.mrf.mxu1 }
 0xaa0   : > { %v3592_v22 = vmul.f32 %v7698_v40, %v4797_v18 }
 0xaa1   : > { %v3572_v0 = vpop.f32.mrf.mxu1 }
 0xaa2   : > { %v3591_v19 = vmul.f32 %v7698_v40, %v3572_v0  ;;  %v3779_v0 = vpop.permute.xlu0 %3778 }
 0xaa3   : > { %v4800_v54 = vpop.f32.mrf.mxu1 }
 0xaa4   : > { %v3594_v60 = vmul.f32 %v7698_v40, %v4800_v54 }
 0xaa5   : > { %v3582_v2 = vpop.f32.mrf.mxu1 }
 0xaa6   : > { %v3593_v27 = vmul.f32 %v7698_v40, %v3582_v2  ;;  %4801 = vmatprep.subr.mxu0 %v3594_v60  ;;  %v4186_v40 = vld [vmem:[%s7293_s12 + $0x78] sm:$0xff] }
 0xaa7   : > { %4802 = vmatpush3.msra.mxu0 %v3594_v60 }
 0xaa8   : > { %4803 = vmatprep.subr.mxu0 %v3593_v27 }
 0xaa9   : > { %4804 = vmatpush3.msra.mxu0 %v3593_v27 }
 0xaaa   : > { %4805 = vmatprep.subr.mxu0 %v3592_v22 }
 0xaab   : > { %4806 = vmatpush3.msra.mxu0 %v3592_v22 }
 0xaac   : > { %4807 = vmatprep.subr.mxu0 %v3591_v19 }
 0xaad   : > { %4808 = vmatpush3.msra.mxu0 %v3591_v19 }
 0xaae   : > { %4810 = vmatmul.mubr.msk.f32.vlgmr.msra.gmra.mxu0 %vm7727_vm5, %v4184_v17  ;;  %4815 = vmatprep.subr.mxu0 %v7575_v45 }
 0xaaf   : > { %4812 = vmatprep.mubr.msk.f32.mxu0 %vm7728_vm3, %v4185_v35 }
 0xab2   : > { %4813 = vmatmul.mubr.msk.f32.gmra.mxu0 %vm7729_vm4, %v4186_v40 }
 0xab3   : > { %4823 = vmatprep.mubr.msk.f32.mxu0 %vm7730_vm11, %v7575_v45 }
 0xb6e   : > { %v4811_v31 = vpop.f32.mrf.mxu0 }
 0xb6f   : > { %v3719_v8 = vadd.f32 %v4811_v31, %v3632_v41 }
 0xb70   : > { %v3713_v11 = vpop.f32.mrf.mxu0 }
 0xb71   : > { %v3768_v1 = vadd.f32 %v3764_v57, %v3719_v8  ;;  %v3714_v36 = vadd.f32 %v3713_v11, %v3631_v24 }
 0xb72   : > { %v4814_v16 = vpop.f32.mrf.mxu0 }
 0xb73   : > { %v3767_v58 = vadd.f32 %v3763_v48, %v3714_v36  ;;  %v3729_v14 = vadd.f32 %v4814_v16, %v3634_v63  ;;  %v3797_v5 = vadd.f32 %v3784_v13, %v3768_v1 }
 0xb74   : > { %v3723_v50 = vpop.f32.mrf.mxu0 }
 0xb75   : > { %v3770_v4 = vadd.f32 %v3766_v47, %v3729_v14  ;;  %v3724_v26 = vadd.f32 %v3723_v50, %v3633_v38  ;;  %v3796_v54 = vadd.f32 %v3779_v0, %v3767_v58 }
 0xb77   : > { %v3799_v42 = vadd.f32 %v3794_v3, %v3770_v4  ;;  %v3769_v18 = vadd.f32 %v3765_v53, %v3724_v26 }
 0xb79   : > { %4961 = vtanh.f32 %v3799_v42  ;;  %v3798_v60 = vadd.f32 %v3789_v15, %v3769_v18 }
 0xb7a   : > { %4963 = vtanh.f32 %v3797_v5 }
 0xb7b   : > { %4965 = vtanh.f32 %v3798_v60 }
 0xb7c   : > { %4967 = vtanh.f32 %v3796_v54 }
 0xb86   : > { %v4962_v2 = vpop.eup %4961 }
 0xb87   : > { %v4964_v27 = vpop.eup %4963  ;;  %v3807_v22 = vadd.f32 %v4962_v2, %v6964_v32 }
 0xb88   : > { %v4966_v19 = vpop.eup %4965  ;;  %v3805_v40 = vadd.f32 %v4964_v27, %v6973_v29 }
 0xb89   : > { %4816 = vmatpush3.msra.mxu0 %v3807_v22  ;;  %v3806_v17 = vadd.f32 %v4966_v19, %v6968_v28  ;;  %v4968_v35 = vpop.eup %4967 }
 0xb8a   : > { %4817 = vmatprep.subr.mxu0 %v7575_v45  ;;  %v3804_v6 = vadd.f32 %v4968_v35, %v6978_v30 }
 0xb8b   : > { %4818 = vmatpush3.msra.mxu0 %v3806_v17 }
 0xb8c   : > { %4819 = vmatprep.subr.mxu0 %v7575_v45 }
 0xb8d   : > { %4820 = vmatpush3.msra.mxu0 %v3805_v40 }
 0xb8e   : > { %4821 = vmatprep.subr.mxu0 %v7575_v45 }
 0xb8f   : > { %4822 = vmatpush3.msra.mxu0 %v3804_v6 }
 0xb90   : > { %4824 = vmatmul.mubr.msk.f32.vlgmr.msra.gmra.mxu0 %vm7734_vm9, %v6985_v59 }
 0xc50   : > { %v3874_v32 = vpop.f32.mrf.mxu0 }
 0xc51   : > { %v3875_v28 = vadd.f32 %v3874_v32, %v7710_v34 }
 0xc52   : > { %v4825_v37 = vpop.f32.mrf.mxu0 }
 0xc53   : > { %v3887_v39 = vrot.slane %v3875_v28, %v6251_v21  ;;  %v3878_v30 = vsel %vm7735_vm12, %v3875_v28, 0.0 }
 0xc54   : > { %v3879_v34 = vadd.f32 %v3878_v30, %v7059_v56 }
 0xc55   : > { %v3888_v29 = vcombine.high %v3887_v39, %v3887_v39 }
 0xc57   : > { %v3895_v33 = vrot.slane %v3888_v29, %v6251_v21 }
 0xc59   : > { %v3897_v45 = vsel %vm7736_vm13, 0.0, %v3895_v33 }
 0xc5a   : > { %v3898_v59 = vadd.f32 %v3897_v45, %v7024_v51 }
 0xc5c   : > { %v3903_v43 = vrot.slane %v3898_v59, %v5458_v55 }
 0xc5e   : > { %v3905_v21 = vsel %vm7737_vm1, %v3879_v34, %v3903_v43 }
 0xc5f   : > { %3906 = vst [vmem:[%s616_s25] sm:$0x3] %v3905_v21 }
 0xc60   : > { %5019 = shalt.err (!%p5016_p3)
}
 0xc61   : > { %s5020_s24 = scalar_lea.hbm %s7245_s22, 32  ;;  %s5024_s26 = scalar_lea.hbm %s7299_s18, 64 }
 0xc62   : > { %p5021_p4 = scmp.ne.s32.totalorder %s7245_s22, %s5020_s24  ;;  %p5025_p9 = scmp.lt.s32.totalorder %s7245_s22, %s7299_s18 }
 0xc63   : > { %p5026_p10 = scmp.lt.s32.totalorder %s5024_s26, %s5020_s24 }
 0xc64   : > { %p5022_p7 = pnand %p5021_p4, %p5214_p5 }
 0xc65   : > { %p5027_p11 = por %p5026_p10, %p5025_p9 }
 0xc66   : > { %p5023_p8 = pneg %p5022_p7 }
 0xc68   : > { %p5028_p12 = pnand %p5027_p11, %p5023_p8 }
 0xc6a   : > { %5031 = shalt.err (!%p5028_p12)
}
 0xc6b   : > { %4838 = dma.vmem_to_hbm [thread:$0]  (%p5214_p5), %s3922_s20, 32, %s7245_s22, %s3908_s29  }
 0xc6c PF: > { %p4844_p13 = scmp.ge.s32.totalorder %s5066_s30, 2  ;;  %s3933_s6 = sand.u32 1, %s5054_s27  }
 0xc6d   : > { %s3934_s21 = scalar_lea.sflag [#allocation3], %s3933_s6 }
 0xc6e   : > { %p4841_p0 = pnand %p4844_p13, %p5218_p6 }
 0xc70   : > { %p4842_p1 = pneg %p4841_p0 }
 0xc72   : > { %5049 = dma.done.wait (%p4842_p1), %s3934_s21, 32  }
 0xc73   : > { %5051 = vsyncadd (%p4842_p1), %s3934_s21, 4294967264  ;;  %s7739_s30 = sld [smem:[#allocation6_spill]]  ;;  %s7742_s27 = smov %s5058_s28 }
 0xc74   : > { %s7740_s24 = sld [smem:[#allocation5_spill]] }
 0xc75   : > { %s7741_s29 = sld [smem:[#allocation7_spill]] }
 0xc79   : > { %p28_p2 = scmp.ge.s32.totalorder %s7739_s30, 4  }
 0xc7a   : > { %s7743_s28 = smov %s7740_s24 }
 0xc7b   :  { %30 = sbr.rel (!%p28_p2) target bundleno = 8 (0x8), region = 151 }
 0xc80   :  { %3939 = vsyncpa [#allocation3], 1 }
 0xc81   :  { %3941 = vsyncpa [#allocation3 + $0x1], 1 }

</bundles_post_ra>
